<compile_context>
chip_gen: v6e
topology: v6e:2x2x1
jax: 0.10.0
libtpu: 0.0.40
codegen_flags: <defaults>
</compile_context>

<pallas_src>
import jax
import jax.numpy as jnp
from jax import lax
from jax.experimental import pallas as pl
from jax.experimental.pallas import tpu as pltpu

BN_EPS = 1e-5


# ----------------------------- Pallas kernels ------------------------------

def _conv_relu_kernel(p_ref, w_ref, b_ref, o_ref):
    # im2col matmul (MXU) + bias + ReLU
    y = jnp.dot(p_ref[...], w_ref[...], preferred_element_type=jnp.float32)
    o_ref[...] = jnp.maximum(y + b_ref[...], 0.0)


def _conv_bn_relu_kernel(p_ref, w_ref, b_ref, g_ref, beta_ref, o_ref):
    # im2col matmul + bias + train-mode BatchNorm (single-pass batch stats
    # over rows = N*H*W) + ReLU, fully fused.
    y = jnp.dot(p_ref[...], w_ref[...], preferred_element_type=jnp.float32)
    y = y + b_ref[...]
    inv_m = 1.0 / y.shape[0]
    mean = jnp.sum(y, axis=0, keepdims=True) * inv_m
    var = jnp.sum(y * y, axis=0, keepdims=True) * inv_m - mean * mean
    scale = g_ref[...] * lax.rsqrt(var + BN_EPS)
    shift = beta_ref[...] - mean * scale
    o_ref[...] = jnp.maximum(y * scale + shift, 0.0)


def _head_kernel(x_ref, w6_ref, b6_ref, w7_ref, b7_ref, w8_ref, b8_ref,
                 s_ref, c_ref):
    # conv6 (1x1 spatial -> plain matmul) + sigmoid branch + linear7/linear8.
    x6 = jnp.dot(x_ref[...], w6_ref[...], preferred_element_type=jnp.float32)
    x6 = x6 + b6_ref[...]
    s_ref[...] = 1.0 / (1.0 + jnp.exp(-x6))
    c = jnp.dot(x6, w7_ref[...], preferred_element_type=jnp.float32) + b7_ref[...]
    c_ref[...] = jnp.dot(c, w8_ref[...], preferred_element_type=jnp.float32) + b8_ref[...]


def _vmem_spec():
    return pl.BlockSpec(memory_space=pltpu.MemorySpace.VMEM)


def _vmem_specs(n):
    return [_vmem_spec() for _ in range(n)]


# ------------------------------- JAX glue ----------------------------------

def _im2col(x, K, stride, padding):
    """Channel-last im2col.  x: (B, H, W, C) -> (B*Ho*Wo, K*K*C).

    Row order (b, oh, ow); column order (kh, kw, c) -- matches _conv_weight_mat.
    """
    B, H, W, C = x.shape
    if padding:
        x = jnp.pad(x, ((0, 0), (padding, padding), (padding, padding), (0, 0)))
    Hp, Wp = H + 2 * padding, W + 2 * padding
    Ho = (Hp - K) // stride + 1
    Wo = (Wp - K) // stride + 1
    ih = (jnp.arange(Ho) * stride)[:, None] + jnp.arange(K)[None, :]   # (Ho, K)
    iw = (jnp.arange(Wo) * stride)[:, None] + jnp.arange(K)[None, :]   # (Wo, K)
    p = x[:, ih]                                 # (B, Ho, K, Wp, C)
    p = p[:, :, :, iw]                           # (B, Ho, K, Wo, K, C)
    p = jnp.transpose(p, (0, 1, 3, 2, 4, 5))     # (B, Ho, Wo, K, K, C)
    return p.reshape(B * Ho * Wo, K * K * C), Ho, Wo


def _conv_weight_mat(w):
    """PyTorch Conv2d weight (Co, Ci, K, K) -> (K*K*Ci, Co), rows (kh, kw, ci)."""
    Co = w.shape[0]
    return jnp.transpose(w, (2, 3, 1, 0)).reshape(-1, Co)


def conv_relu(x, w, b, stride, padding):
    B = x.shape[0]
    Co, _, K, _ = w.shape
    patches, Ho, Wo = _im2col(x, K, stride, padding)
    wmat = _conv_weight_mat(w)
    M, Kd = patches.shape
    y = pl.pallas_call(
        _conv_relu_kernel,
        out_shape=jax.ShapeDtypeStruct((M, Co), jnp.float32),
        in_specs=_vmem_specs(3),
        out_specs=_vmem_spec(),
        cost_estimate=pl.CostEstimate(
            flops=2 * M * Kd * Co + 2 * M * Co,
            transcendentals=0,
            bytes_accessed=4 * (M * Kd + Kd * Co + 2 * M * Co)),
    )(patches, wmat, b.reshape(1, Co))
    return y.reshape(B, Ho, Wo, Co)


def conv_bn_relu(x, w, b, gamma, beta, stride, padding):
    B = x.shape[0]
    Co, _, K, _ = w.shape
    patches, Ho, Wo = _im2col(x, K, stride, padding)
    wmat = _conv_weight_mat(w)
    M, Kd = patches.shape
    y = pl.pallas_call(
        _conv_bn_relu_kernel,
        out_shape=jax.ShapeDtypeStruct((M, Co), jnp.float32),
        in_specs=_vmem_specs(5),
        out_specs=_vmem_spec(),
        cost_estimate=pl.CostEstimate(
            flops=2 * M * Kd * Co + 10 * M * Co,
            transcendentals=Co,
            bytes_accessed=4 * (M * Kd + Kd * Co + 2 * M * Co)),
    )(patches, wmat, b.reshape(1, Co), gamma.reshape(1, Co), beta.reshape(1, Co))
    return y.reshape(B, Ho, Wo, Co)


def head(x, w6, b6, w7, b7, w8, b8):
    """x: (B, 5, 5, 16) conv5 activation -> (sigmoid(conv6), linear8(linear7))."""
    B = x.shape[0]
    xflat = x.reshape(B, -1)                     # (B, 400), (h, w, c) order
    w6mat = _conv_weight_mat(w6)                 # (400, 120), rows (kh, kw, ci)
    n6, n7, n8 = w6.shape[0], w7.shape[0], w8.shape[0]
    kd = xflat.shape[1]
    return pl.pallas_call(
        _head_kernel,
        out_shape=(jax.ShapeDtypeStruct((B, n6), jnp.float32),
                   jax.ShapeDtypeStruct((B, n8), jnp.float32)),
        in_specs=_vmem_specs(7),
        out_specs=(_vmem_spec(), _vmem_spec()),
        cost_estimate=pl.CostEstimate(
            flops=2 * B * (kd * n6 + n6 * n7 + n7 * n8),
            transcendentals=B * n6,
            bytes_accessed=4 * (B * kd + kd * n6 + n6 * n7 + n7 * n8
                                + B * (n6 + n8))),
    )(xflat, w6mat, b6.reshape(1, n6), w7.T, b7.reshape(1, n7),
      w8.T, b8.reshape(1, n8))


def lenet5_forward(params, x_nchw):
    x = jnp.transpose(x_nchw, (0, 2, 3, 1))      # NCHW -> NHWC once
    x = conv_relu(x, params["w1"], params["b1"], 1, 0)                              # conv1+relu
    x = conv_bn_relu(x, params["w3"], params["b3"], params["g3"], params["be3"], 2, 1)  # conv3+bn3+relu
    x = conv_bn_relu(x, params["w4"], params["b4"], params["g4"], params["be4"], 1, 0)  # conv4+bn4+relu
    x = conv_bn_relu(x, params["w5"], params["b5"], params["g5"], params["be5"], 2, 1)  # conv5+bn5+relu
    s, c = head(x, params["w6"], params["b6"],
                params["w7"], params["bl7"], params["w8"], params["bl8"])
    return s, c                                   # matches (s.squeeze(1), c.squeeze(1))


# ------------------------- pure-JAX reference check -------------------------

def _ref_conv(x, w, b, stride, padding):
    y = lax.conv_general_dilated(
        x, w, window_strides=(stride, stride),
        padding=[(padding, padding), (padding, padding)],
        dimension_numbers=("NCHW", "OIHW", "NCHW"))
    return y + b.reshape(1, -1, 1, 1)


def _ref_bn(x, gamma, beta):
    mean = jnp.mean(x, axis=(0, 2, 3), keepdims=True)
    var = jnp.mean(jnp.square(x - mean), axis=(0, 2, 3), keepdims=True)
    xn = (x - mean) * lax.rsqrt(var + BN_EPS)
    return xn * gamma.reshape(1, -1, 1, 1) + beta.reshape(1, -1, 1, 1)


def lenet5_ref(params, x):
    x = jnp.maximum(_ref_conv(x, params["w1"], params["b1"], 1, 0), 0.0)
    x = jnp.maximum(_ref_bn(_ref_conv(x, params["w3"], params["b3"], 2, 1),
                            params["g3"], params["be3"]), 0.0)
    x = jnp.maximum(_ref_bn(_ref_conv(x, params["w4"], params["b4"], 1, 0),
                            params["g4"], params["be4"]), 0.0)
    x = jnp.maximum(_ref_bn(_ref_conv(x, params["w5"], params["b5"], 2, 1),
                            params["g5"], params["be5"]), 0.0)
    x = _ref_conv(x, params["w6"], params["b6"], 1, 0)       # (B, 120, 1, 1)
    x = x.reshape(-1, 120)
    c = x @ params["w7"].T + params["bl7"]
    c = c @ params["w8"].T + params["bl8"]
    s = jax.nn.sigmoid(x)
    return s, c


# ---------------------------------- main ------------------------------------

if __name__ == "__main__":
    nc, B, num_classes = 1, 2, 10
    ks = jax.random.split(jax.random.PRNGKey(0), 20)

    def cw(k, co, ci, K):
        return 0.02 * jax.random.normal(k, (co, ci, K, K), jnp.float32)

    params = {
        "w1": cw(ks[0], 6, nc, 5),
        "b1": 0.02 * jax.random.normal(ks[1], (6,), jnp.float32),
        "w3": cw(ks[2], 6, 6, 4),
        "b3": 0.02 * jax.random.normal(ks[3], (6,), jnp.float32),
        "g3": 1.0 + 0.02 * jax.random.normal(ks[4], (6,), jnp.float32),
        "be3": jnp.zeros((6,), jnp.float32),
        "w4": cw(ks[5], 16, 6, 5),
        "b4": 0.02 * jax.random.normal(ks[6], (16,), jnp.float32),
        "g4": 1.0 + 0.02 * jax.random.normal(ks[7], (16,), jnp.float32),
        "be4": jnp.zeros((16,), jnp.float32),
        "w5": cw(ks[8], 16, 16, 4),
        "b5": 0.02 * jax.random.normal(ks[9], (16,), jnp.float32),
        "g5": 1.0 + 0.02 * jax.random.normal(ks[10], (16,), jnp.float32),
        "be5": jnp.zeros((16,), jnp.float32),
        "w6": cw(ks[11], 120, 16, 5),
        "b6": 0.02 * jax.random.normal(ks[12], (120,), jnp.float32),
        "w7": 0.1 * jax.random.normal(ks[13], (84, 120), jnp.float32),
        "bl7": 0.1 * jax.random.normal(ks[14], (84,), jnp.float32),
        "w8": 0.1 * jax.random.normal(ks[15], (num_classes, 84), jnp.float32),
        "bl8": 0.1 * jax.random.normal(ks[16], (num_classes,), jnp.float32),
    }

    x = jax.random.normal(ks[17], (B, nc, 32, 32), jnp.float32)

    s, c = jax.jit(lenet5_forward)(params, x)
    jax.block_until_ready((s, c))

    s_ref, c_ref = lenet5_ref(params, x)
    assert s.shape == (B, 120), s.shape
    assert c.shape == (B, num_classes), c.shape
    assert bool(jnp.all(jnp.isfinite(s))) and bool(jnp.all(jnp.isfinite(c)))
    assert bool(jnp.allclose(s, s_ref, atol=1e-3, rtol=1e-3))
    assert bool(jnp.allclose(c, c_ref, atol=1e-3, rtol=1e-3))
    print("KERNEL_OK")
</pallas_src>

<mosaic_0001>
module attributes {stable_mosaic.version = 11 : i64} {
  func.func @_conv_relu_kernel(%arg0: memref<1568x25xf32, #tpu.memory_space<vmem>>, %arg1: memref<25x6xf32, #tpu.memory_space<vmem>>, %arg2: memref<1x6xf32, #tpu.memory_space<vmem>>, %arg3: memref<1568x6xf32, #tpu.memory_space<vmem>>) attributes {dimension_semantics = [], scalar_prefetch = 0 : i64, scratch_operands = 0 : i64, tpu.core_type = #tpu.core_type<tc>} {
    %c0 = arith.constant 0 : index
    %c0_0 = arith.constant 0 : index
    %0 = vector.load %arg0[%c0, %c0_0] : memref<1568x25xf32, #tpu.memory_space<vmem>>, vector<1568x25xf32>
    %c0_1 = arith.constant 0 : index
    %c0_2 = arith.constant 0 : index
    %1 = vector.load %arg1[%c0_1, %c0_2] : memref<25x6xf32, #tpu.memory_space<vmem>>, vector<25x6xf32>
    %cst = arith.constant dense<0.000000e+00> : vector<1568x6xf32>
    %2 = tpu.matmul %0, %1, %cst {dimension_numbers = #tpu.dot_dimension_numbers<[1], [0], [0], [1], [0, 0, 1, 1], [], []>} : vector<1568x25xf32>, vector<25x6xf32>, vector<1568x6xf32> -> vector<1568x6xf32>
    %c0_3 = arith.constant 0 : index
    %c0_4 = arith.constant 0 : index
    %3 = vector.load %arg2[%c0_3, %c0_4] : memref<1x6xf32, #tpu.memory_space<vmem>>, vector<1x6xf32>
    %4 = vector.broadcast %3 : vector<1x6xf32> to vector<1568x6xf32>
    %5 = arith.addf %2, %4 : vector<1568x6xf32>
    %cst_5 = arith.constant 0.000000e+00 : f32
    %6 = vector.broadcast %cst_5 : f32 to vector<1568x6xf32>
    %7 = arith.maximumf %5, %6 : vector<1568x6xf32>
    %c0_6 = arith.constant 0 : index
    %c0_7 = arith.constant 0 : index
    %8 = vector.load %arg3[%c0_6, %c0_7] : memref<1568x6xf32, #tpu.memory_space<vmem>>, vector<1568x6xf32>
    tpu.vector_store %arg3[%c0_6, %c0_7], %7 {strides = array<i32>} : memref<1568x6xf32, #tpu.memory_space<vmem>>, vector<1568x6xf32>,
    return
  }
}

module attributes {stable_mosaic.version = 11 : i64} {
  func.func @_conv_bn_relu_kernel(%arg0: memref<392x96xf32, #tpu.memory_space<vmem>>, %arg1: memref<96x6xf32, #tpu.memory_space<vmem>>, %arg2: memref<1x6xf32, #tpu.memory_space<vmem>>, %arg3: memref<1x6xf32, #tpu.memory_space<vmem>>, %arg4: memref<1x6xf32, #tpu.memory_space<vmem>>, %arg5: memref<392x6xf32, #tpu.memory_space<vmem>>) attributes {dimension_semantics = [], scalar_prefetch = 0 : i64, scratch_operands = 0 : i64, tpu.core_type = #tpu.core_type<tc>} {
    %c0 = arith.constant 0 : index
    %c0_0 = arith.constant 0 : index
    %0 = vector.load %arg0[%c0, %c0_0] : memref<392x96xf32, #tpu.memory_space<vmem>>, vector<392x96xf32>
    %c0_1 = arith.constant 0 : index
    %c0_2 = arith.constant 0 : index
    %1 = vector.load %arg1[%c0_1, %c0_2] : memref<96x6xf32, #tpu.memory_space<vmem>>, vector<96x6xf32>
    %cst = arith.constant dense<0.000000e+00> : vector<392x6xf32>
    %2 = tpu.matmul %0, %1, %cst {dimension_numbers = #tpu.dot_dimension_numbers<[1], [0], [0], [1], [0, 0, 1, 1], [], []>} : vector<392x96xf32>, vector<96x6xf32>, vector<392x6xf32> -> vector<392x6xf32>
    %c0_3 = arith.constant 0 : index
    %c0_4 = arith.constant 0 : index
    %3 = vector.load %arg2[%c0_3, %c0_4] : memref<1x6xf32, #tpu.memory_space<vmem>>, vector<1x6xf32>
    %4 = vector.broadcast %3 : vector<1x6xf32> to vector<392x6xf32>
    %5 = arith.addf %2, %4 : vector<392x6xf32>
    %cst_5 = arith.constant dense<0.000000e+00> : vector<6xf32>
    %6 = vector.multi_reduction <add>, %5, %cst_5 [0] : vector<392x6xf32> to vector<6xf32>
    %7 = vector.shape_cast %6 : vector<6xf32> to vector<1x6xf32>
    %cst_6 = arith.constant 0.00255102036 : f32
    %8 = vector.broadcast %cst_6 : f32 to vector<1x6xf32>
    %9 = arith.mulf %7, %8 : vector<1x6xf32>
    %10 = arith.mulf %5, %5 : vector<392x6xf32>
    %cst_7 = arith.constant dense<0.000000e+00> : vector<6xf32>
    %11 = vector.multi_reduction <add>, %10, %cst_7 [0] : vector<392x6xf32> to vector<6xf32>
    %12 = vector.shape_cast %11 : vector<6xf32> to vector<1x6xf32>
    %cst_8 = arith.constant 0.00255102036 : f32
    %13 = vector.broadcast %cst_8 : f32 to vector<1x6xf32>
    %14 = arith.mulf %12, %13 : vector<1x6xf32>
    %15 = arith.mulf %9, %9 : vector<1x6xf32>
    %16 = arith.subf %14, %15 : vector<1x6xf32>
    %c0_9 = arith.constant 0 : index
    %c0_10 = arith.constant 0 : index
    %17 = vector.load %arg3[%c0_9, %c0_10] : memref<1x6xf32, #tpu.memory_space<vmem>>, vector<1x6xf32>
    %cst_11 = arith.constant 9.99999974E-6 : f32
    %18 = vector.broadcast %cst_11 : f32 to vector<1x6xf32>
    %19 = arith.addf %16, %18 : vector<1x6xf32>
    %20 = math.rsqrt %19 : vector<1x6xf32>
    %21 = arith.mulf %17, %20 : vector<1x6xf32>
    %c0_12 = arith.constant 0 : index
    %c0_13 = arith.constant 0 : index
    %22 = vector.load %arg4[%c0_12, %c0_13] : memref<1x6xf32, #tpu.memory_space<vmem>>, vector<1x6xf32>
    %23 = arith.mulf %9, %21 : vector<1x6xf32>
    %24 = arith.subf %22, %23 : vector<1x6xf32>
    %25 = vector.broadcast %21 : vector<1x6xf32> to vector<392x6xf32>
    %26 = arith.mulf %5, %25 : vector<392x6xf32>
    %27 = vector.broadcast %24 : vector<1x6xf32> to vector<392x6xf32>
    %28 = arith.addf %26, %27 : vector<392x6xf32>
    %cst_14 = arith.constant 0.000000e+00 : f32
    %29 = vector.broadcast %cst_14 : f32 to vector<392x6xf32>
    %30 = arith.maximumf %28, %29 : vector<392x6xf32>
    %c0_15 = arith.constant 0 : index
    %c0_16 = arith.constant 0 : index
    %31 = vector.load %arg5[%c0_15, %c0_16] : memref<392x6xf32, #tpu.memory_space<vmem>>, vector<392x6xf32>
    tpu.vector_store %arg5[%c0_15, %c0_16], %30 {strides = array<i32>} : memref<392x6xf32, #tpu.memory_space<vmem>>, vector<392x6xf32>,
    return
  }
}

module attributes {stable_mosaic.version = 11 : i64} {
  func.func @_conv_bn_relu_kernel(%arg0: memref<200x150xf32, #tpu.memory_space<vmem>>, %arg1: memref<150x16xf32, #tpu.memory_space<vmem>>, %arg2: memref<1x16xf32, #tpu.memory_space<vmem>>, %arg3: memref<1x16xf32, #tpu.memory_space<vmem>>, %arg4: memref<1x16xf32, #tpu.memory_space<vmem>>, %arg5: memref<200x16xf32, #tpu.memory_space<vmem>>) attributes {dimension_semantics = [], scalar_prefetch = 0 : i64, scratch_operands = 0 : i64, tpu.core_type = #tpu.core_type<tc>} {
    %c0 = arith.constant 0 : index
    %c0_0 = arith.constant 0 : index
    %0 = vector.load %arg0[%c0, %c0_0] : memref<200x150xf32, #tpu.memory_space<vmem>>, vector<200x150xf32>
    %c0_1 = arith.constant 0 : index
    %c0_2 = arith.constant 0 : index
    %1 = vector.load %arg1[%c0_1, %c0_2] : memref<150x16xf32, #tpu.memory_space<vmem>>, vector<150x16xf32>
    %cst = arith.constant dense<0.000000e+00> : vector<200x16xf32>
    %2 = tpu.matmul %0, %1, %cst {dimension_numbers = #tpu.dot_dimension_numbers<[1], [0], [0], [1], [0, 0, 1, 1], [], []>} : vector<200x150xf32>, vector<150x16xf32>, vector<200x16xf32> -> vector<200x16xf32>
    %c0_3 = arith.constant 0 : index
    %c0_4 = arith.constant 0 : index
    %3 = vector.load %arg2[%c0_3, %c0_4] : memref<1x16xf32, #tpu.memory_space<vmem>>, vector<1x16xf32>
    %4 = vector.broadcast %3 : vector<1x16xf32> to vector<200x16xf32>
    %5 = arith.addf %2, %4 : vector<200x16xf32>
    %cst_5 = arith.constant dense<0.000000e+00> : vector<16xf32>
    %6 = vector.multi_reduction <add>, %5, %cst_5 [0] : vector<200x16xf32> to vector<16xf32>
    %7 = vector.shape_cast %6 : vector<16xf32> to vector<1x16xf32>
    %cst_6 = arith.constant 5.000000e-03 : f32
    %8 = vector.broadcast %cst_6 : f32 to vector<1x16xf32>
    %9 = arith.mulf %7, %8 : vector<1x16xf32>
    %10 = arith.mulf %5, %5 : vector<200x16xf32>
    %cst_7 = arith.constant dense<0.000000e+00> : vector<16xf32>
    %11 = vector.multi_reduction <add>, %10, %cst_7 [0] : vector<200x16xf32> to vector<16xf32>
    %12 = vector.shape_cast %11 : vector<16xf32> to vector<1x16xf32>
    %cst_8 = arith.constant 5.000000e-03 : f32
    %13 = vector.broadcast %cst_8 : f32 to vector<1x16xf32>
    %14 = arith.mulf %12, %13 : vector<1x16xf32>
    %15 = arith.mulf %9, %9 : vector<1x16xf32>
    %16 = arith.subf %14, %15 : vector<1x16xf32>
    %c0_9 = arith.constant 0 : index
    %c0_10 = arith.constant 0 : index
    %17 = vector.load %arg3[%c0_9, %c0_10] : memref<1x16xf32, #tpu.memory_space<vmem>>, vector<1x16xf32>
    %cst_11 = arith.constant 9.99999974E-6 : f32
    %18 = vector.broadcast %cst_11 : f32 to vector<1x16xf32>
    %19 = arith.addf %16, %18 : vector<1x16xf32>
    %20 = math.rsqrt %19 : vector<1x16xf32>
    %21 = arith.mulf %17, %20 : vector<1x16xf32>
    %c0_12 = arith.constant 0 : index
    %c0_13 = arith.constant 0 : index
    %22 = vector.load %arg4[%c0_12, %c0_13] : memref<1x16xf32, #tpu.memory_space<vmem>>, vector<1x16xf32>
    %23 = arith.mulf %9, %21 : vector<1x16xf32>
    %24 = arith.subf %22, %23 : vector<1x16xf32>
    %25 = vector.broadcast %21 : vector<1x16xf32> to vector<200x16xf32>
    %26 = arith.mulf %5, %25 : vector<200x16xf32>
    %27 = vector.broadcast %24 : vector<1x16xf32> to vector<200x16xf32>
    %28 = arith.addf %26, %27 : vector<200x16xf32>
    %cst_14 = arith.constant 0.000000e+00 : f32
    %29 = vector.broadcast %cst_14 : f32 to vector<200x16xf32>
    %30 = arith.maximumf %28, %29 : vector<200x16xf32>
    %c0_15 = arith.constant 0 : index
    %c0_16 = arith.constant 0 : index
    %31 = vector.load %arg5[%c0_15, %c0_16] : memref<200x16xf32, #tpu.memory_space<vmem>>, vector<200x16xf32>
    tpu.vector_store %arg5[%c0_15, %c0_16], %30 {strides = array<i32>} : memref<200x16xf32, #tpu.memory_space<vmem>>, vector<200x16xf32>,
    return
  }
}

module attributes {stable_mosaic.version = 11 : i64} {
  func.func @_conv_bn_relu_kernel(%arg0: memref<50x256xf32, #tpu.memory_space<vmem>>, %arg1: memref<256x16xf32, #tpu.memory_space<vmem>>, %arg2: memref<1x16xf32, #tpu.memory_space<vmem>>, %arg3: memref<1x16xf32, #tpu.memory_space<vmem>>, %arg4: memref<1x16xf32, #tpu.memory_space<vmem>>, %arg5: memref<50x16xf32, #tpu.memory_space<vmem>>) attributes {dimension_semantics = [], scalar_prefetch = 0 : i64, scratch_operands = 0 : i64, tpu.core_type = #tpu.core_type<tc>} {
    %c0 = arith.constant 0 : index
    %c0_0 = arith.constant 0 : index
    %0 = vector.load %arg0[%c0, %c0_0] : memref<50x256xf32, #tpu.memory_space<vmem>>, vector<50x256xf32>
    %c0_1 = arith.constant 0 : index
    %c0_2 = arith.constant 0 : index
    %1 = vector.load %arg1[%c0_1, %c0_2] : memref<256x16xf32, #tpu.memory_space<vmem>>, vector<256x16xf32>
    %cst = arith.constant dense<0.000000e+00> : vector<50x16xf32>
    %2 = tpu.matmul %0, %1, %cst {dimension_numbers = #tpu.dot_dimension_numbers<[1], [0], [0], [1], [0, 0, 1, 1], [], []>} : vector<50x256xf32>, vector<256x16xf32>, vector<50x16xf32> -> vector<50x16xf32>
    %c0_3 = arith.constant 0 : index
    %c0_4 = arith.constant 0 : index
    %3 = vector.load %arg2[%c0_3, %c0_4] : memref<1x16xf32, #tpu.memory_space<vmem>>, vector<1x16xf32>
    %4 = vector.broadcast %3 : vector<1x16xf32> to vector<50x16xf32>
    %5 = arith.addf %2, %4 : vector<50x16xf32>
    %cst_5 = arith.constant dense<0.000000e+00> : vector<16xf32>
    %6 = vector.multi_reduction <add>, %5, %cst_5 [0] : vector<50x16xf32> to vector<16xf32>
    %7 = vector.shape_cast %6 : vector<16xf32> to vector<1x16xf32>
    %cst_6 = arith.constant 2.000000e-02 : f32
    %8 = vector.broadcast %cst_6 : f32 to vector<1x16xf32>
    %9 = arith.mulf %7, %8 : vector<1x16xf32>
    %10 = arith.mulf %5, %5 : vector<50x16xf32>
    %cst_7 = arith.constant dense<0.000000e+00> : vector<16xf32>
    %11 = vector.multi_reduction <add>, %10, %cst_7 [0] : vector<50x16xf32> to vector<16xf32>
    %12 = vector.shape_cast %11 : vector<16xf32> to vector<1x16xf32>
    %cst_8 = arith.constant 2.000000e-02 : f32
    %13 = vector.broadcast %cst_8 : f32 to vector<1x16xf32>
    %14 = arith.mulf %12, %13 : vector<1x16xf32>
    %15 = arith.mulf %9, %9 : vector<1x16xf32>
    %16 = arith.subf %14, %15 : vector<1x16xf32>
    %c0_9 = arith.constant 0 : index
    %c0_10 = arith.constant 0 : index
    %17 = vector.load %arg3[%c0_9, %c0_10] : memref<1x16xf32, #tpu.memory_space<vmem>>, vector<1x16xf32>
    %cst_11 = arith.constant 9.99999974E-6 : f32
    %18 = vector.broadcast %cst_11 : f32 to vector<1x16xf32>
    %19 = arith.addf %16, %18 : vector<1x16xf32>
    %20 = math.rsqrt %19 : vector<1x16xf32>
    %21 = arith.mulf %17, %20 : vector<1x16xf32>
    %c0_12 = arith.constant 0 : index
    %c0_13 = arith.constant 0 : index
    %22 = vector.load %arg4[%c0_12, %c0_13] : memref<1x16xf32, #tpu.memory_space<vmem>>, vector<1x16xf32>
    %23 = arith.mulf %9, %21 : vector<1x16xf32>
    %24 = arith.subf %22, %23 : vector<1x16xf32>
    %25 = vector.broadcast %21 : vector<1x16xf32> to vector<50x16xf32>
    %26 = arith.mulf %5, %25 : vector<50x16xf32>
    %27 = vector.broadcast %24 : vector<1x16xf32> to vector<50x16xf32>
    %28 = arith.addf %26, %27 : vector<50x16xf32>
    %cst_14 = arith.constant 0.000000e+00 : f32
    %29 = vector.broadcast %cst_14 : f32 to vector<50x16xf32>
    %30 = arith.maximumf %28, %29 : vector<50x16xf32>
    %c0_15 = arith.constant 0 : index
    %c0_16 = arith.constant 0 : index
    %31 = vector.load %arg5[%c0_15, %c0_16] : memref<50x16xf32, #tpu.memory_space<vmem>>, vector<50x16xf32>
    tpu.vector_store %arg5[%c0_15, %c0_16], %30 {strides = array<i32>} : memref<50x16xf32, #tpu.memory_space<vmem>>, vector<50x16xf32>,
    return
  }
}

module attributes {stable_mosaic.version = 11 : i64} {
  func.func @_head_kernel(%arg0: memref<2x400xf32, #tpu.memory_space<vmem>>, %arg1: memref<400x120xf32, #tpu.memory_space<vmem>>, %arg2: memref<1x120xf32, #tpu.memory_space<vmem>>, %arg3: memref<120x84xf32, #tpu.memory_space<vmem>>, %arg4: memref<1x84xf32, #tpu.memory_space<vmem>>, %arg5: memref<84x10xf32, #tpu.memory_space<vmem>>, %arg6: memref<1x10xf32, #tpu.memory_space<vmem>>, %arg7: memref<2x120xf32, #tpu.memory_space<vmem>>, %arg8: memref<2x10xf32, #tpu.memory_space<vmem>>) attributes {dimension_semantics = [], scalar_prefetch = 0 : i64, scratch_operands = 0 : i64, tpu.core_type = #tpu.core_type<tc>} {
    %c0 = arith.constant 0 : index
    %c0_0 = arith.constant 0 : index
    %0 = vector.load %arg0[%c0, %c0_0] : memref<2x400xf32, #tpu.memory_space<vmem>>, vector<2x400xf32>
    %c0_1 = arith.constant 0 : index
    %c0_2 = arith.constant 0 : index
    %1 = vector.load %arg1[%c0_1, %c0_2] : memref<400x120xf32, #tpu.memory_space<vmem>>, vector<400x120xf32>
    %cst = arith.constant dense<0.000000e+00> : vector<2x120xf32>
    %2 = tpu.matmul %0, %1, %cst {dimension_numbers = #tpu.dot_dimension_numbers<[1], [0], [0], [1], [0, 0, 1, 1], [], []>} : vector<2x400xf32>, vector<400x120xf32>, vector<2x120xf32> -> vector<2x120xf32>
    %c0_3 = arith.constant 0 : index
    %c0_4 = arith.constant 0 : index
    %3 = vector.load %arg2[%c0_3, %c0_4] : memref<1x120xf32, #tpu.memory_space<vmem>>, vector<1x120xf32>
    %4 = vector.broadcast %3 : vector<1x120xf32> to vector<2x120xf32>
    %5 = arith.addf %2, %4 : vector<2x120xf32>
    %cst_5 = arith.constant 0.000000e+00 : f32
    %6 = vector.broadcast %cst_5 : f32 to vector<2x120xf32>
    %7 = arith.subf %6, %5 : vector<2x120xf32>
    %8 = math.exp %7 : vector<2x120xf32>
    %cst_6 = arith.constant 1.000000e+00 : f32
    %9 = vector.broadcast %cst_6 : f32 to vector<2x120xf32>
    %10 = arith.addf %9, %8 : vector<2x120xf32>
    %cst_7 = arith.constant 1.000000e+00 : f32
    %11 = vector.broadcast %cst_7 : f32 to vector<2x120xf32>
    %12 = arith.divf %11, %10 : vector<2x120xf32>
    %c0_8 = arith.constant 0 : index
    %c0_9 = arith.constant 0 : index
    %13 = vector.load %arg7[%c0_8, %c0_9] : memref<2x120xf32, #tpu.memory_space<vmem>>, vector<2x120xf32>
    tpu.vector_store %arg7[%c0_8, %c0_9], %12 {strides = array<i32>} : memref<2x120xf32, #tpu.memory_space<vmem>>, vector<2x120xf32>,
    %c0_10 = arith.constant 0 : index
    %c0_11 = arith.constant 0 : index
    %14 = vector.load %arg3[%c0_10, %c0_11] : memref<120x84xf32, #tpu.memory_space<vmem>>, vector<120x84xf32>
    %cst_12 = arith.constant dense<0.000000e+00> : vector<2x84xf32>
    %15 = tpu.matmul %5, %14, %cst_12 {dimension_numbers = #tpu.dot_dimension_numbers<[1], [0], [0], [1], [0, 0, 1, 1], [], []>} : vector<2x120xf32>, vector<120x84xf32>, vector<2x84xf32> -> vector<2x84xf32>
    %c0_13 = arith.constant 0 : index
    %c0_14 = arith.constant 0 : index
    %16 = vector.load %arg4[%c0_13, %c0_14] : memref<1x84xf32, #tpu.memory_space<vmem>>, vector<1x84xf32>
    %17 = vector.broadcast %16 : vector<1x84xf32> to vector<2x84xf32>
    %18 = arith.addf %15, %17 : vector<2x84xf32>
    %c0_15 = arith.constant 0 : index
    %c0_16 = arith.constant 0 : index
    %19 = vector.load %arg5[%c0_15, %c0_16] : memref<84x10xf32, #tpu.memory_space<vmem>>, vector<84x10xf32>
    %cst_17 = arith.constant dense<0.000000e+00> : vector<2x10xf32>
    %20 = tpu.matmul %18, %19, %cst_17 {dimension_numbers = #tpu.dot_dimension_numbers<[1], [0], [0], [1], [0, 0, 1, 1], [], []>} : vector<2x84xf32>, vector<84x10xf32>, vector<2x10xf32> -> vector<2x10xf32>
    %c0_18 = arith.constant 0 : index
    %c0_19 = arith.constant 0 : index
    %21 = vector.load %arg6[%c0_18, %c0_19] : memref<1x10xf32, #tpu.memory_space<vmem>>, vector<1x10xf32>
    %22 = vector.broadcast %21 : vector<1x10xf32> to vector<2x10xf32>
    %23 = arith.addf %20, %22 : vector<2x10xf32>
    %c0_20 = arith.constant 0 : index
    %c0_21 = arith.constant 0 : index
    %24 = vector.load %arg8[%c0_20, %c0_21] : memref<2x10xf32, #tpu.memory_space<vmem>>, vector<2x10xf32>
    tpu.vector_store %arg8[%c0_20, %c0_21], %23 {strides = array<i32>} : memref<2x10xf32, #tpu.memory_space<vmem>>, vector<2x10xf32>,
    return
  }
}

</mosaic_0001>

<bundles_post_ra>
// kernel: lenet5_forward.5
= control target key start
LH: loop header
LB: loop body
LE: loop exit
PB: predicated region body
PF: predicated region fallthrough
CT: control target
= control target key end

     0   :  { %vm810_vm0 = vcmask 1040384   ;;  %vm221_vm1 = vcmask 203776   ;;  %vm2055_vm2 = vcmask 48128   ;;  %s4771_s1 = inlined_call_operand.vmem [shape: f32[25,6], index: 1, kind: input, shape index: {}]   ;;  %s4772_s0 = inlined_call_operand.vmem [shape: f32[1568,25], index: 0, kind: input, shape index: {}]   ;;  %s4773_s2 = inlined_call_operand.vmem [shape: f32[1,6], index: 2, kind: input, shape index: {}]   ;;  %s4774_s3 = inlined_call_operand.vmem [shape: f32[1568,6], index: 3, kind: output, shape index: {}]  }
   0x1   :  { %v213_v0 = vld [vmem:[%s4771_s1 + $0x18] sm:$0x1]  ;;  %v212_v1 = vld [vmem:[%s4771_s1 + $0x10] sm:$0xff]  ;;  %v211_v2 = vld [vmem:[%s4771_s1 + $0x8] sm:$0xff] }
   0x2   :  { %2654 = vmatprep.subr.msk.mxu0 %vm810_vm0, %v213_v0  ;;  %2956 = vmatprep.subr.msk.mxu1 %vm810_vm0, %v213_v0  ;;  %v210_v3 = vld [vmem:[%s4771_s1] sm:$0xff]  ;;  %v112_v5 = vld [vmem:[%s4772_s0 + $0x310] sm:$0xff]  ;;  %v15_v6 = vld [vmem:[%s4772_s0 + $0x8] sm:$0xff] }
   0x3   :  { %2655 = vmatpush3.msk.msra.mxu0 %vm810_vm0, %v213_v0  ;;  %2960 = vmatpush3.msk.msra.mxu1 %vm810_vm0, %v213_v0  ;;  %v14_v4 = vld [vmem:[%s4772_s0] sm:$0xff]  ;;  %v113_v7 = vld [vmem:[%s4772_s0 + $0x318] sm:$0xff]  ;;  %v16_v8 = vld [vmem:[%s4772_s0 + $0x10] sm:$0xff] }
   0x4   :  { %2656 = vmatprep.subr.mxu0 %v212_v1  ;;  %2957 = vmatprep.subr.mxu1 %v212_v1  ;;  %v114_v9 = vld [vmem:[%s4772_s0 + $0x320] sm:$0xff]  ;;  %v17_v10 = vld [vmem:[%s4772_s0 + $0x18] sm:$0xff]  ;;  %v115_v11 = vld [vmem:[%s4772_s0 + $0x328] sm:$0xff] }
   0x5   :  { %2657 = vmatpush3.msra.mxu0 %v212_v1  ;;  %2961 = vmatpush3.msra.mxu1 %v212_v1  ;;  %v18_v12 = vld [vmem:[%s4772_s0 + $0x20] sm:$0xff]  ;;  %v116_v13 = vld [vmem:[%s4772_s0 + $0x330] sm:$0xff]  ;;  %v19_v14 = vld [vmem:[%s4772_s0 + $0x28] sm:$0xff] }
   0x6   :  { %2658 = vmatprep.subr.mxu0 %v211_v2  ;;  %2958 = vmatprep.subr.mxu1 %v211_v2  ;;  %v117_v15 = vld [vmem:[%s4772_s0 + $0x338] sm:$0xff]  ;;  %v20_v16 = vld [vmem:[%s4772_s0 + $0x30] sm:$0xff]  ;;  %v118_v17 = vld [vmem:[%s4772_s0 + $0x340] sm:$0xff] }
   0x7   :  { %2659 = vmatpush3.msra.mxu0 %v211_v2  ;;  %2962 = vmatpush3.msra.mxu1 %v211_v2  ;;  %v21_v18 = vld [vmem:[%s4772_s0 + $0x38] sm:$0xff]  ;;  %v119_v19 = vld [vmem:[%s4772_s0 + $0x348] sm:$0xff]  ;;  %v22_v20 = vld [vmem:[%s4772_s0 + $0x40] sm:$0xff] }
   0x8   :  { %2660 = vmatprep.subr.mxu0 %v210_v3  ;;  %2959 = vmatprep.subr.mxu1 %v210_v3  ;;  %v120_v21 = vld [vmem:[%s4772_s0 + $0x350] sm:$0xff]  ;;  %v23_v22 = vld [vmem:[%s4772_s0 + $0x48] sm:$0xff]  ;;  %v121_v23 = vld [vmem:[%s4772_s0 + $0x358] sm:$0xff] }
   0x9   :  { %2661 = vmatpush3.msra.mxu0 %v210_v3  ;;  %2963 = vmatpush3.msra.mxu1 %v210_v3  ;;  %v24_v24 = vld [vmem:[%s4772_s0 + $0x50] sm:$0xff]  ;;  %v122_v25 = vld [vmem:[%s4772_s0 + $0x360] sm:$0xff]  ;;  %v25_v26 = vld [vmem:[%s4772_s0 + $0x58] sm:$0xff] }
   0xa   :  { %2662 = vmatprep.mubr.msk.f32.mxu0 %vm221_vm1, %v14_v4  ;;  %2809 = vmatprep.mubr.msk.f32.mxu1 %vm221_vm1, %v112_v5  ;;  %v123_v27 = vld [vmem:[%s4772_s0 + $0x368] sm:$0xff]  ;;  %v26_v28 = vld [vmem:[%s4772_s0 + $0x60] sm:$0xff]  ;;  %v124_v29 = vld [vmem:[%s4772_s0 + $0x370] sm:$0xff] }
   0xb   :  { %2663 = vmatmul.mubr.msk.f32.vlgmr.msra.gmra.mxu0 %vm221_vm1, %v15_v6  ;;  %2810 = vmatmul.mubr.msk.f32.vlgmr.msra.gmra.mxu1 %vm221_vm1, %v113_v7  ;;  %v27_v30 = vld [vmem:[%s4772_s0 + $0x68] sm:$0xff]  ;;  %v125_v31 = vld [vmem:[%s4772_s0 + $0x378] sm:$0xff]  ;;  %v28_v32 = vld [vmem:[%s4772_s0 + $0x70] sm:$0xff] }
   0xc   :  { %2665 = vmatprep.mubr.msk.f32.mxu0 %vm221_vm1, %v16_v8  ;;  %2812 = vmatprep.mubr.msk.f32.mxu1 %vm221_vm1, %v114_v9  ;;  %v126_v33 = vld [vmem:[%s4772_s0 + $0x380] sm:$0xff]  ;;  %v29_v34 = vld [vmem:[%s4772_s0 + $0x78] sm:$0xff]  ;;  %v127_v35 = vld [vmem:[%s4772_s0 + $0x388] sm:$0xff] }
   0xd   :  { %v30_v36 = vld [vmem:[%s4772_s0 + $0x80] sm:$0xff]  ;;  %v128_v37 = vld [vmem:[%s4772_s0 + $0x390] sm:$0xff]  ;;  %v31_v38 = vld [vmem:[%s4772_s0 + $0x88] sm:$0xff] }
   0xe   :  { %v129_v39 = vld [vmem:[%s4772_s0 + $0x398] sm:$0xff]  ;;  %v32_v40 = vld [vmem:[%s4772_s0 + $0x90] sm:$0xff]  ;;  %v130_v41 = vld [vmem:[%s4772_s0 + $0x3a0] sm:$0xff] }
   0xf   :  { %2666 = vmatmul.mubr.msk.f32.gmra.mxu0 %vm221_vm1, %v17_v10  ;;  %2813 = vmatmul.mubr.msk.f32.gmra.mxu1 %vm221_vm1, %v115_v11  ;;  %v33_v42 = vld [vmem:[%s4772_s0 + $0x98] sm:$0xff]  ;;  %v131_v43 = vld [vmem:[%s4772_s0 + $0x3a8] sm:$0xff]  ;;  %v34_v44 = vld [vmem:[%s4772_s0 + $0xa0] sm:$0xff] }
  0x10   :  { %2668 = vmatprep.mubr.msk.f32.mxu0 %vm221_vm1, %v18_v12  ;;  %2815 = vmatprep.mubr.msk.f32.mxu1 %vm221_vm1, %v116_v13  ;;  %v132_v45 = vld [vmem:[%s4772_s0 + $0x3b0] sm:$0xff]  ;;  %v35_v46 = vld [vmem:[%s4772_s0 + $0xa8] sm:$0xff]  ;;  %v133_v47 = vld [vmem:[%s4772_s0 + $0x3b8] sm:$0xff] }
  0x11   :  { %v36_v48 = vld [vmem:[%s4772_s0 + $0xb0] sm:$0xff]  ;;  %v134_v49 = vld [vmem:[%s4772_s0 + $0x3c0] sm:$0xff]  ;;  %v37_v50 = vld [vmem:[%s4772_s0 + $0xb8] sm:$0xff] }
  0x12   :  { %v135_v51 = vld [vmem:[%s4772_s0 + $0x3c8] sm:$0xff]  ;;  %v38_v52 = vld [vmem:[%s4772_s0 + $0xc0] sm:$0xff]  ;;  %v136_v53 = vld [vmem:[%s4772_s0 + $0x3d0] sm:$0xff] }
  0x13   :  { %2669 = vmatmul.mubr.msk.f32.gmra.mxu0 %vm221_vm1, %v19_v14  ;;  %2816 = vmatmul.mubr.msk.f32.gmra.mxu1 %vm221_vm1, %v117_v15  ;;  %v39_v54 = vld [vmem:[%s4772_s0 + $0xc8] sm:$0xff]  ;;  %v137_v55 = vld [vmem:[%s4772_s0 + $0x3d8] sm:$0xff]  ;;  %v40_v56 = vld [vmem:[%s4772_s0 + $0xd0] sm:$0xff] }
  0x14   :  { %2671 = vmatprep.mubr.msk.f32.mxu0 %vm221_vm1, %v20_v16  ;;  %2818 = vmatprep.mubr.msk.f32.mxu1 %vm221_vm1, %v118_v17  ;;  %v138_v57 = vld [vmem:[%s4772_s0 + $0x3e0] sm:$0xff]  ;;  %v41_v58 = vld [vmem:[%s4772_s0 + $0xd8] sm:$0xff]  ;;  %v139_v59 = vld [vmem:[%s4772_s0 + $0x3e8] sm:$0xff] }
  0x15   :  { %v42_v60 = vld [vmem:[%s4772_s0 + $0xe0] sm:$0xff]  ;;  %v140_v61 = vld [vmem:[%s4772_s0 + $0x3f0] sm:$0xff]  ;;  %v43_v62 = vld [vmem:[%s4772_s0 + $0xe8] sm:$0xff] }
  0x16   :  { %v141_v63 = vld [vmem:[%s4772_s0 + $0x3f8] sm:$0xff]  ;;  %v44_v0 = vld [vmem:[%s4772_s0 + $0xf0] sm:$0xff]  ;;  %v142_v1 = vld [vmem:[%s4772_s0 + $0x400] sm:$0xff] }
  0x17   :  { %2672 = vmatmul.mubr.msk.f32.gmra.mxu0 %vm221_vm1, %v21_v18  ;;  %2819 = vmatmul.mubr.msk.f32.gmra.mxu1 %vm221_vm1, %v119_v19  ;;  %v45_v2 = vld [vmem:[%s4772_s0 + $0xf8] sm:$0xff]  ;;  %v143_v3 = vld [vmem:[%s4772_s0 + $0x408] sm:$0xff]  ;;  %v46_v4 = vld [vmem:[%s4772_s0 + $0x100] sm:$0xff] }
  0x18   :  { %2674 = vmatprep.mubr.msk.f32.mxu0 %vm221_vm1, %v22_v20  ;;  %2821 = vmatprep.mubr.msk.f32.mxu1 %vm221_vm1, %v120_v21  ;;  %v144_v5 = vld [vmem:[%s4772_s0 + $0x410] sm:$0xff]  ;;  %v47_v6 = vld [vmem:[%s4772_s0 + $0x108] sm:$0xff]  ;;  %v145_v7 = vld [vmem:[%s4772_s0 + $0x418] sm:$0xff] }
  0x19   :  { %v48_v8 = vld [vmem:[%s4772_s0 + $0x110] sm:$0xff]  ;;  %v146_v9 = vld [vmem:[%s4772_s0 + $0x420] sm:$0xff]  ;;  %v49_v10 = vld [vmem:[%s4772_s0 + $0x118] sm:$0xff] }
  0x1a   :  { %v147_v11 = vld [vmem:[%s4772_s0 + $0x428] sm:$0xff]  ;;  %v50_v12 = vld [vmem:[%s4772_s0 + $0x120] sm:$0xff]  ;;  %v148_v13 = vld [vmem:[%s4772_s0 + $0x430] sm:$0xff] }
  0x1b   :  { %2675 = vmatmul.mubr.msk.f32.gmra.mxu0 %vm221_vm1, %v23_v22  ;;  %2822 = vmatmul.mubr.msk.f32.gmra.mxu1 %vm221_vm1, %v121_v23  ;;  %v51_v14 = vld [vmem:[%s4772_s0 + $0x128] sm:$0xff]  ;;  %v149_v15 = vld [vmem:[%s4772_s0 + $0x438] sm:$0xff]  ;;  %v52_v16 = vld [vmem:[%s4772_s0 + $0x130] sm:$0xff] }
  0x1c   :  { %2677 = vmatprep.mubr.msk.f32.mxu0 %vm221_vm1, %v24_v24  ;;  %2824 = vmatprep.mubr.msk.f32.mxu1 %vm221_vm1, %v122_v25  ;;  %v150_v17 = vld [vmem:[%s4772_s0 + $0x440] sm:$0xff]  ;;  %v53_v18 = vld [vmem:[%s4772_s0 + $0x138] sm:$0xff]  ;;  %v151_v19 = vld [vmem:[%s4772_s0 + $0x448] sm:$0xff] }
  0x1d   :  { %v54_v20 = vld [vmem:[%s4772_s0 + $0x140] sm:$0xff]  ;;  %v152_v21 = vld [vmem:[%s4772_s0 + $0x450] sm:$0xff]  ;;  %v55_v22 = vld [vmem:[%s4772_s0 + $0x148] sm:$0xff] }
  0x1e   :  { %v153_v23 = vld [vmem:[%s4772_s0 + $0x458] sm:$0xff]  ;;  %v56_v24 = vld [vmem:[%s4772_s0 + $0x150] sm:$0xff]  ;;  %v154_v25 = vld [vmem:[%s4772_s0 + $0x460] sm:$0xff] }
  0x1f   :  { %2678 = vmatmul.mubr.msk.f32.gmra.mxu0 %vm221_vm1, %v25_v26  ;;  %2825 = vmatmul.mubr.msk.f32.gmra.mxu1 %vm221_vm1, %v123_v27  ;;  %v57_v26 = vld [vmem:[%s4772_s0 + $0x158] sm:$0xff]  ;;  %v155_v27 = vld [vmem:[%s4772_s0 + $0x468] sm:$0xff] }
  0x20   :  { %2680 = vmatprep.mubr.msk.f32.mxu0 %vm221_vm1, %v26_v28  ;;  %2827 = vmatprep.mubr.msk.f32.mxu1 %vm221_vm1, %v124_v29  ;;  %v58_v28 = vld [vmem:[%s4772_s0 + $0x160] sm:$0xff]  ;;  %v156_v29 = vld [vmem:[%s4772_s0 + $0x470] sm:$0xff] }
  0x23   :  { %2681 = vmatmul.mubr.msk.f32.gmra.mxu0 %vm221_vm1, %v27_v30  ;;  %2828 = vmatmul.mubr.msk.f32.gmra.mxu1 %vm221_vm1, %v125_v31  ;;  %v59_v30 = vld [vmem:[%s4772_s0 + $0x168] sm:$0xff]  ;;  %v157_v31 = vld [vmem:[%s4772_s0 + $0x478] sm:$0xff] }
  0x24   :  { %2683 = vmatprep.mubr.msk.f32.mxu0 %vm221_vm1, %v28_v32  ;;  %2830 = vmatprep.mubr.msk.f32.mxu1 %vm221_vm1, %v126_v33  ;;  %v60_v32 = vld [vmem:[%s4772_s0 + $0x170] sm:$0xff]  ;;  %v158_v33 = vld [vmem:[%s4772_s0 + $0x480] sm:$0xff] }
  0x27   :  { %2684 = vmatmul.mubr.msk.f32.gmra.mxu0 %vm221_vm1, %v29_v34  ;;  %2831 = vmatmul.mubr.msk.f32.gmra.mxu1 %vm221_vm1, %v127_v35  ;;  %v61_v34 = vld [vmem:[%s4772_s0 + $0x178] sm:$0xff]  ;;  %v159_v35 = vld [vmem:[%s4772_s0 + $0x488] sm:$0xff] }
  0x28   :  { %2686 = vmatprep.mubr.msk.f32.mxu0 %vm221_vm1, %v30_v36  ;;  %2833 = vmatprep.mubr.msk.f32.mxu1 %vm221_vm1, %v128_v37  ;;  %v62_v36 = vld [vmem:[%s4772_s0 + $0x180] sm:$0xff]  ;;  %v160_v37 = vld [vmem:[%s4772_s0 + $0x490] sm:$0xff] }
  0x2b   :  { %2687 = vmatmul.mubr.msk.f32.gmra.mxu0 %vm221_vm1, %v31_v38  ;;  %2834 = vmatmul.mubr.msk.f32.gmra.mxu1 %vm221_vm1, %v129_v39  ;;  %v63_v38 = vld [vmem:[%s4772_s0 + $0x188] sm:$0xff]  ;;  %v161_v39 = vld [vmem:[%s4772_s0 + $0x498] sm:$0xff] }
  0x2c   :  { %2689 = vmatprep.mubr.msk.f32.mxu0 %vm221_vm1, %v32_v40  ;;  %2836 = vmatprep.mubr.msk.f32.mxu1 %vm221_vm1, %v130_v41  ;;  %v64_v40 = vld [vmem:[%s4772_s0 + $0x190] sm:$0xff]  ;;  %v162_v41 = vld [vmem:[%s4772_s0 + $0x4a0] sm:$0xff] }
  0x2f   :  { %2690 = vmatmul.mubr.msk.f32.gmra.mxu0 %vm221_vm1, %v33_v42  ;;  %2837 = vmatmul.mubr.msk.f32.gmra.mxu1 %vm221_vm1, %v131_v43  ;;  %v65_v42 = vld [vmem:[%s4772_s0 + $0x198] sm:$0xff]  ;;  %v163_v43 = vld [vmem:[%s4772_s0 + $0x4a8] sm:$0xff] }
  0x30   :  { %2692 = vmatprep.mubr.msk.f32.mxu0 %vm221_vm1, %v34_v44  ;;  %2839 = vmatprep.mubr.msk.f32.mxu1 %vm221_vm1, %v132_v45  ;;  %v66_v44 = vld [vmem:[%s4772_s0 + $0x1a0] sm:$0xff]  ;;  %v164_v45 = vld [vmem:[%s4772_s0 + $0x4b0] sm:$0xff] }
  0x33   :  { %2693 = vmatmul.mubr.msk.f32.gmra.mxu0 %vm221_vm1, %v35_v46  ;;  %2840 = vmatmul.mubr.msk.f32.gmra.mxu1 %vm221_vm1, %v133_v47  ;;  %v67_v46 = vld [vmem:[%s4772_s0 + $0x1a8] sm:$0xff]  ;;  %v165_v47 = vld [vmem:[%s4772_s0 + $0x4b8] sm:$0xff] }
  0x34   :  { %2695 = vmatprep.mubr.msk.f32.mxu0 %vm221_vm1, %v36_v48  ;;  %2842 = vmatprep.mubr.msk.f32.mxu1 %vm221_vm1, %v134_v49  ;;  %v68_v48 = vld [vmem:[%s4772_s0 + $0x1b0] sm:$0xff]  ;;  %v166_v49 = vld [vmem:[%s4772_s0 + $0x4c0] sm:$0xff] }
  0x37   :  { %2696 = vmatmul.mubr.msk.f32.gmra.mxu0 %vm221_vm1, %v37_v50  ;;  %2843 = vmatmul.mubr.msk.f32.gmra.mxu1 %vm221_vm1, %v135_v51  ;;  %v69_v50 = vld [vmem:[%s4772_s0 + $0x1b8] sm:$0xff]  ;;  %v167_v51 = vld [vmem:[%s4772_s0 + $0x4c8] sm:$0xff] }
  0x38   :  { %2698 = vmatprep.mubr.msk.f32.mxu0 %vm221_vm1, %v38_v52  ;;  %2845 = vmatprep.mubr.msk.f32.mxu1 %vm221_vm1, %v136_v53  ;;  %v70_v52 = vld [vmem:[%s4772_s0 + $0x1c0] sm:$0xff]  ;;  %v168_v53 = vld [vmem:[%s4772_s0 + $0x4d0] sm:$0xff] }
  0x3b   :  { %2699 = vmatmul.mubr.msk.f32.gmra.mxu0 %vm221_vm1, %v39_v54  ;;  %2846 = vmatmul.mubr.msk.f32.gmra.mxu1 %vm221_vm1, %v137_v55  ;;  %v71_v54 = vld [vmem:[%s4772_s0 + $0x1c8] sm:$0xff]  ;;  %v169_v55 = vld [vmem:[%s4772_s0 + $0x4d8] sm:$0xff] }
  0x3c   :  { %2701 = vmatprep.mubr.msk.f32.mxu0 %vm221_vm1, %v40_v56  ;;  %2848 = vmatprep.mubr.msk.f32.mxu1 %vm221_vm1, %v138_v57  ;;  %v72_v56 = vld [vmem:[%s4772_s0 + $0x1d0] sm:$0xff]  ;;  %v170_v57 = vld [vmem:[%s4772_s0 + $0x4e0] sm:$0xff] }
  0x3f   :  { %2702 = vmatmul.mubr.msk.f32.gmra.mxu0 %vm221_vm1, %v41_v58  ;;  %2849 = vmatmul.mubr.msk.f32.gmra.mxu1 %vm221_vm1, %v139_v59  ;;  %v73_v58 = vld [vmem:[%s4772_s0 + $0x1d8] sm:$0xff]  ;;  %v171_v59 = vld [vmem:[%s4772_s0 + $0x4e8] sm:$0xff] }
  0x40   :  { %2704 = vmatprep.mubr.msk.f32.mxu0 %vm221_vm1, %v42_v60  ;;  %2851 = vmatprep.mubr.msk.f32.mxu1 %vm221_vm1, %v140_v61  ;;  %v74_v60 = vld [vmem:[%s4772_s0 + $0x1e0] sm:$0xff]  ;;  %v172_v61 = vld [vmem:[%s4772_s0 + $0x4f0] sm:$0xff] }
  0x43   :  { %2705 = vmatmul.mubr.msk.f32.gmra.mxu0 %vm221_vm1, %v43_v62  ;;  %2852 = vmatmul.mubr.msk.f32.gmra.mxu1 %vm221_vm1, %v141_v63  ;;  %v75_v62 = vld [vmem:[%s4772_s0 + $0x1e8] sm:$0xff]  ;;  %v173_v63 = vld [vmem:[%s4772_s0 + $0x4f8] sm:$0xff] }
  0x44   :  { %2707 = vmatprep.mubr.msk.f32.mxu0 %vm221_vm1, %v44_v0  ;;  %2854 = vmatprep.mubr.msk.f32.mxu1 %vm221_vm1, %v142_v1  ;;  %v76_v0 = vld [vmem:[%s4772_s0 + $0x1f0] sm:$0xff]  ;;  %v174_v1 = vld [vmem:[%s4772_s0 + $0x500] sm:$0xff] }
  0x47   :  { %2708 = vmatmul.mubr.msk.f32.gmra.mxu0 %vm221_vm1, %v45_v2  ;;  %2855 = vmatmul.mubr.msk.f32.gmra.mxu1 %vm221_vm1, %v143_v3  ;;  %v77_v2 = vld [vmem:[%s4772_s0 + $0x1f8] sm:$0xff]  ;;  %v175_v3 = vld [vmem:[%s4772_s0 + $0x508] sm:$0xff] }
  0x48   :  { %2710 = vmatprep.mubr.msk.f32.mxu0 %vm221_vm1, %v46_v4  ;;  %2857 = vmatprep.mubr.msk.f32.mxu1 %vm221_vm1, %v144_v5  ;;  %v78_v4 = vld [vmem:[%s4772_s0 + $0x200] sm:$0xff]  ;;  %v176_v5 = vld [vmem:[%s4772_s0 + $0x510] sm:$0xff] }
  0x4b   :  { %2711 = vmatmul.mubr.msk.f32.gmra.mxu0 %vm221_vm1, %v47_v6  ;;  %2858 = vmatmul.mubr.msk.f32.gmra.mxu1 %vm221_vm1, %v145_v7  ;;  %v79_v6 = vld [vmem:[%s4772_s0 + $0x208] sm:$0xff]  ;;  %v177_v7 = vld [vmem:[%s4772_s0 + $0x518] sm:$0xff] }
  0x4c   :  { %2713 = vmatprep.mubr.msk.f32.mxu0 %vm221_vm1, %v48_v8  ;;  %2860 = vmatprep.mubr.msk.f32.mxu1 %vm221_vm1, %v146_v9  ;;  %v80_v8 = vld [vmem:[%s4772_s0 + $0x210] sm:$0xff]  ;;  %v178_v9 = vld [vmem:[%s4772_s0 + $0x520] sm:$0xff] }
  0x4f   :  { %2714 = vmatmul.mubr.msk.f32.gmra.mxu0 %vm221_vm1, %v49_v10  ;;  %2861 = vmatmul.mubr.msk.f32.gmra.mxu1 %vm221_vm1, %v147_v11  ;;  %v81_v10 = vld [vmem:[%s4772_s0 + $0x218] sm:$0xff]  ;;  %v179_v11 = vld [vmem:[%s4772_s0 + $0x528] sm:$0xff] }
  0x50   :  { %2716 = vmatprep.mubr.msk.f32.mxu0 %vm221_vm1, %v50_v12  ;;  %2863 = vmatprep.mubr.msk.f32.mxu1 %vm221_vm1, %v148_v13  ;;  %v82_v12 = vld [vmem:[%s4772_s0 + $0x220] sm:$0xff]  ;;  %v180_v13 = vld [vmem:[%s4772_s0 + $0x530] sm:$0xff] }
  0x53   :  { %2717 = vmatmul.mubr.msk.f32.gmra.mxu0 %vm221_vm1, %v51_v14  ;;  %2864 = vmatmul.mubr.msk.f32.gmra.mxu1 %vm221_vm1, %v149_v15  ;;  %v83_v14 = vld [vmem:[%s4772_s0 + $0x228] sm:$0xff]  ;;  %v181_v15 = vld [vmem:[%s4772_s0 + $0x538] sm:$0xff] }
  0x54   :  { %2719 = vmatprep.mubr.msk.f32.mxu0 %vm221_vm1, %v52_v16  ;;  %2866 = vmatprep.mubr.msk.f32.mxu1 %vm221_vm1, %v150_v17  ;;  %v84_v16 = vld [vmem:[%s4772_s0 + $0x230] sm:$0xff]  ;;  %v182_v17 = vld [vmem:[%s4772_s0 + $0x540] sm:$0xff] }
  0x57   :  { %2720 = vmatmul.mubr.msk.f32.gmra.mxu0 %vm221_vm1, %v53_v18  ;;  %2867 = vmatmul.mubr.msk.f32.gmra.mxu1 %vm221_vm1, %v151_v19  ;;  %v85_v18 = vld [vmem:[%s4772_s0 + $0x238] sm:$0xff]  ;;  %v183_v19 = vld [vmem:[%s4772_s0 + $0x548] sm:$0xff] }
  0x58   :  { %2722 = vmatprep.mubr.msk.f32.mxu0 %vm221_vm1, %v54_v20  ;;  %2869 = vmatprep.mubr.msk.f32.mxu1 %vm221_vm1, %v152_v21  ;;  %v86_v20 = vld [vmem:[%s4772_s0 + $0x240] sm:$0xff]  ;;  %v184_v21 = vld [vmem:[%s4772_s0 + $0x550] sm:$0xff] }
  0x5b   :  { %2723 = vmatmul.mubr.msk.f32.gmra.mxu0 %vm221_vm1, %v55_v22  ;;  %2870 = vmatmul.mubr.msk.f32.gmra.mxu1 %vm221_vm1, %v153_v23  ;;  %v87_v22 = vld [vmem:[%s4772_s0 + $0x248] sm:$0xff]  ;;  %v185_v23 = vld [vmem:[%s4772_s0 + $0x558] sm:$0xff] }
  0x5c   :  { %2725 = vmatprep.mubr.msk.f32.mxu0 %vm221_vm1, %v56_v24  ;;  %2872 = vmatprep.mubr.msk.f32.mxu1 %vm221_vm1, %v154_v25  ;;  %v88_v24 = vld [vmem:[%s4772_s0 + $0x250] sm:$0xff]  ;;  %v186_v25 = vld [vmem:[%s4772_s0 + $0x560] sm:$0xff] }
  0x5f   :  { %2726 = vmatmul.mubr.msk.f32.gmra.mxu0 %vm221_vm1, %v57_v26  ;;  %2873 = vmatmul.mubr.msk.f32.gmra.mxu1 %vm221_vm1, %v155_v27  ;;  %v89_v26 = vld [vmem:[%s4772_s0 + $0x258] sm:$0xff]  ;;  %v187_v27 = vld [vmem:[%s4772_s0 + $0x568] sm:$0xff] }
  0x60   :  { %2728 = vmatprep.mubr.msk.f32.mxu0 %vm221_vm1, %v58_v28  ;;  %2875 = vmatprep.mubr.msk.f32.mxu1 %vm221_vm1, %v156_v29  ;;  %v90_v28 = vld [vmem:[%s4772_s0 + $0x260] sm:$0xff]  ;;  %v188_v29 = vld [vmem:[%s4772_s0 + $0x570] sm:$0xff] }
  0x63   :  { %2729 = vmatmul.mubr.msk.f32.gmra.mxu0 %vm221_vm1, %v59_v30  ;;  %2876 = vmatmul.mubr.msk.f32.gmra.mxu1 %vm221_vm1, %v157_v31  ;;  %v91_v30 = vld [vmem:[%s4772_s0 + $0x268] sm:$0xff]  ;;  %v189_v31 = vld [vmem:[%s4772_s0 + $0x578] sm:$0xff] }
  0x64   :  { %2731 = vmatprep.mubr.msk.f32.mxu0 %vm221_vm1, %v60_v32  ;;  %2878 = vmatprep.mubr.msk.f32.mxu1 %vm221_vm1, %v158_v33  ;;  %v92_v32 = vld [vmem:[%s4772_s0 + $0x270] sm:$0xff]  ;;  %v190_v33 = vld [vmem:[%s4772_s0 + $0x580] sm:$0xff] }
  0x67   :  { %2732 = vmatmul.mubr.msk.f32.gmra.mxu0 %vm221_vm1, %v61_v34  ;;  %2879 = vmatmul.mubr.msk.f32.gmra.mxu1 %vm221_vm1, %v159_v35  ;;  %v93_v34 = vld [vmem:[%s4772_s0 + $0x278] sm:$0xff]  ;;  %v191_v35 = vld [vmem:[%s4772_s0 + $0x588] sm:$0xff] }
  0x68   :  { %2734 = vmatprep.mubr.msk.f32.mxu0 %vm221_vm1, %v62_v36  ;;  %2881 = vmatprep.mubr.msk.f32.mxu1 %vm221_vm1, %v160_v37  ;;  %v94_v36 = vld [vmem:[%s4772_s0 + $0x280] sm:$0xff]  ;;  %v192_v37 = vld [vmem:[%s4772_s0 + $0x590] sm:$0xff] }
  0x6b   :  { %2735 = vmatmul.mubr.msk.f32.gmra.mxu0 %vm221_vm1, %v63_v38  ;;  %2882 = vmatmul.mubr.msk.f32.gmra.mxu1 %vm221_vm1, %v161_v39  ;;  %v95_v38 = vld [vmem:[%s4772_s0 + $0x288] sm:$0xff]  ;;  %v193_v39 = vld [vmem:[%s4772_s0 + $0x598] sm:$0xff] }
  0x6c   :  { %2737 = vmatprep.mubr.msk.f32.mxu0 %vm221_vm1, %v64_v40  ;;  %2884 = vmatprep.mubr.msk.f32.mxu1 %vm221_vm1, %v162_v41  ;;  %v96_v40 = vld [vmem:[%s4772_s0 + $0x290] sm:$0xff]  ;;  %v194_v41 = vld [vmem:[%s4772_s0 + $0x5a0] sm:$0xff] }
  0x6f   :  { %2738 = vmatmul.mubr.msk.f32.gmra.mxu0 %vm221_vm1, %v65_v42  ;;  %2885 = vmatmul.mubr.msk.f32.gmra.mxu1 %vm221_vm1, %v163_v43  ;;  %v97_v42 = vld [vmem:[%s4772_s0 + $0x298] sm:$0xff]  ;;  %v195_v43 = vld [vmem:[%s4772_s0 + $0x5a8] sm:$0xff] }
  0x70   :  { %2740 = vmatprep.mubr.msk.f32.mxu0 %vm221_vm1, %v66_v44  ;;  %2887 = vmatprep.mubr.msk.f32.mxu1 %vm221_vm1, %v164_v45  ;;  %v98_v44 = vld [vmem:[%s4772_s0 + $0x2a0] sm:$0xff]  ;;  %v196_v45 = vld [vmem:[%s4772_s0 + $0x5b0] sm:$0xff] }
  0x73   :  { %2741 = vmatmul.mubr.msk.f32.gmra.mxu0 %vm221_vm1, %v67_v46  ;;  %2888 = vmatmul.mubr.msk.f32.gmra.mxu1 %vm221_vm1, %v165_v47  ;;  %v99_v46 = vld [vmem:[%s4772_s0 + $0x2a8] sm:$0xff]  ;;  %v197_v47 = vld [vmem:[%s4772_s0 + $0x5b8] sm:$0xff] }
  0x74   :  { %2743 = vmatprep.mubr.msk.f32.mxu0 %vm221_vm1, %v68_v48  ;;  %2890 = vmatprep.mubr.msk.f32.mxu1 %vm221_vm1, %v166_v49  ;;  %v100_v48 = vld [vmem:[%s4772_s0 + $0x2b0] sm:$0xff]  ;;  %v198_v49 = vld [vmem:[%s4772_s0 + $0x5c0] sm:$0xff] }
  0x77   :  { %2744 = vmatmul.mubr.msk.f32.gmra.mxu0 %vm221_vm1, %v69_v50  ;;  %2891 = vmatmul.mubr.msk.f32.gmra.mxu1 %vm221_vm1, %v167_v51  ;;  %v101_v50 = vld [vmem:[%s4772_s0 + $0x2b8] sm:$0xff]  ;;  %v199_v51 = vld [vmem:[%s4772_s0 + $0x5c8] sm:$0xff] }
  0x78   :  { %2746 = vmatprep.mubr.msk.f32.mxu0 %vm221_vm1, %v70_v52  ;;  %2893 = vmatprep.mubr.msk.f32.mxu1 %vm221_vm1, %v168_v53  ;;  %v102_v52 = vld [vmem:[%s4772_s0 + $0x2c0] sm:$0xff]  ;;  %v200_v53 = vld [vmem:[%s4772_s0 + $0x5d0] sm:$0xff] }
  0x7b   :  { %2747 = vmatmul.mubr.msk.f32.gmra.mxu0 %vm221_vm1, %v71_v54  ;;  %2894 = vmatmul.mubr.msk.f32.gmra.mxu1 %vm221_vm1, %v169_v55  ;;  %v103_v54 = vld [vmem:[%s4772_s0 + $0x2c8] sm:$0xff]  ;;  %v201_v55 = vld [vmem:[%s4772_s0 + $0x5d8] sm:$0xff] }
  0x7c   :  { %2749 = vmatprep.mubr.msk.f32.mxu0 %vm221_vm1, %v72_v56  ;;  %2896 = vmatprep.mubr.msk.f32.mxu1 %vm221_vm1, %v170_v57  ;;  %v104_v56 = vld [vmem:[%s4772_s0 + $0x2d0] sm:$0xff]  ;;  %v202_v57 = vld [vmem:[%s4772_s0 + $0x5e0] sm:$0xff] }
  0x7f   :  { %2750 = vmatmul.mubr.msk.f32.gmra.mxu0 %vm221_vm1, %v73_v58  ;;  %2897 = vmatmul.mubr.msk.f32.gmra.mxu1 %vm221_vm1, %v171_v59  ;;  %v105_v58 = vld [vmem:[%s4772_s0 + $0x2d8] sm:$0xff]  ;;  %v203_v59 = vld [vmem:[%s4772_s0 + $0x5e8] sm:$0xff] }
  0x80   :  { %2752 = vmatprep.mubr.msk.f32.mxu0 %vm221_vm1, %v74_v60  ;;  %2899 = vmatprep.mubr.msk.f32.mxu1 %vm221_vm1, %v172_v61  ;;  %v106_v60 = vld [vmem:[%s4772_s0 + $0x2e0] sm:$0xff]  ;;  %v204_v61 = vld [vmem:[%s4772_s0 + $0x5f0] sm:$0xff] }
  0x83   :  { %2753 = vmatmul.mubr.msk.f32.gmra.mxu0 %vm221_vm1, %v75_v62  ;;  %2900 = vmatmul.mubr.msk.f32.gmra.mxu1 %vm221_vm1, %v173_v63  ;;  %v107_v62 = vld [vmem:[%s4772_s0 + $0x2e8] sm:$0xff]  ;;  %v205_v63 = vld [vmem:[%s4772_s0 + $0x5f8] sm:$0xff] }
  0x84   :  { %2755 = vmatprep.mubr.msk.f32.mxu0 %vm221_vm1, %v76_v0  ;;  %2902 = vmatprep.mubr.msk.f32.mxu1 %vm221_vm1, %v174_v1  ;;  %v108_v0 = vld [vmem:[%s4772_s0 + $0x2f0] sm:$0xff]  ;;  %v206_v1 = vld [vmem:[%s4772_s0 + $0x600] sm:$0xff] }
  0x87   :  { %2756 = vmatmul.mubr.msk.f32.gmra.mxu0 %vm221_vm1, %v77_v2  ;;  %2903 = vmatmul.mubr.msk.f32.gmra.mxu1 %vm221_vm1, %v175_v3  ;;  %v109_v2 = vld [vmem:[%s4772_s0 + $0x2f8] sm:$0xff]  ;;  %v207_v3 = vld [vmem:[%s4772_s0 + $0x608] sm:$0xff] }
  0x88   :  { %2758 = vmatprep.mubr.msk.f32.mxu0 %vm221_vm1, %v78_v4  ;;  %2905 = vmatprep.mubr.msk.f32.mxu1 %vm221_vm1, %v176_v5  ;;  %v110_v4 = vld [vmem:[%s4772_s0 + $0x300] sm:$0xff]  ;;  %v208_v5 = vld [vmem:[%s4772_s0 + $0x610] sm:$0xff] }
  0x8b   :  { %2759 = vmatmul.mubr.msk.f32.gmra.mxu0 %vm221_vm1, %v79_v6  ;;  %2906 = vmatmul.mubr.msk.f32.gmra.mxu1 %vm221_vm1, %v177_v7  ;;  %v111_v6 = vld [vmem:[%s4772_s0 + $0x308] sm:$0xff]  ;;  %v209_v7 = vld [vmem:[%s4772_s0 + $0x618] sm:$0xff] }
  0x8c   :  { %2761 = vmatprep.mubr.msk.f32.mxu0 %vm221_vm1, %v80_v8  ;;  %2908 = vmatprep.mubr.msk.f32.mxu1 %vm221_vm1, %v178_v9  ;;  %v3782_v8 = vld [vmem:[%s4773_s2] ss:$0 sm:$0xff] }
  0x8f   :  { %2762 = vmatmul.mubr.msk.f32.gmra.mxu0 %vm221_vm1, %v81_v10  ;;  %2909 = vmatmul.mubr.msk.f32.gmra.mxu1 %vm221_vm1, %v179_v11 }
  0x90   :  { %2764 = vmatprep.mubr.msk.f32.mxu0 %vm221_vm1, %v82_v12  ;;  %2911 = vmatprep.mubr.msk.f32.mxu1 %vm221_vm1, %v180_v13 }
  0x93   :  { %2765 = vmatmul.mubr.msk.f32.gmra.mxu0 %vm221_vm1, %v83_v14  ;;  %2912 = vmatmul.mubr.msk.f32.gmra.mxu1 %vm221_vm1, %v181_v15 }
  0x94   :  { %2767 = vmatprep.mubr.msk.f32.mxu0 %vm221_vm1, %v84_v16  ;;  %2914 = vmatprep.mubr.msk.f32.mxu1 %vm221_vm1, %v182_v17 }
  0x97   :  { %2768 = vmatmul.mubr.msk.f32.gmra.mxu0 %vm221_vm1, %v85_v18  ;;  %2915 = vmatmul.mubr.msk.f32.gmra.mxu1 %vm221_vm1, %v183_v19 }
  0x98   :  { %2770 = vmatprep.mubr.msk.f32.mxu0 %vm221_vm1, %v86_v20  ;;  %2917 = vmatprep.mubr.msk.f32.mxu1 %vm221_vm1, %v184_v21 }
  0x9b   :  { %2771 = vmatmul.mubr.msk.f32.gmra.mxu0 %vm221_vm1, %v87_v22  ;;  %2918 = vmatmul.mubr.msk.f32.gmra.mxu1 %vm221_vm1, %v185_v23 }
  0x9c   :  { %2773 = vmatprep.mubr.msk.f32.mxu0 %vm221_vm1, %v88_v24  ;;  %2920 = vmatprep.mubr.msk.f32.mxu1 %vm221_vm1, %v186_v25 }
  0x9f   :  { %2774 = vmatmul.mubr.msk.f32.gmra.mxu0 %vm221_vm1, %v89_v26  ;;  %2921 = vmatmul.mubr.msk.f32.gmra.mxu1 %vm221_vm1, %v187_v27 }
  0xa0   :  { %2776 = vmatprep.mubr.msk.f32.mxu0 %vm221_vm1, %v90_v28  ;;  %2923 = vmatprep.mubr.msk.f32.mxu1 %vm221_vm1, %v188_v29 }
  0xa3   :  { %2777 = vmatmul.mubr.msk.f32.gmra.mxu0 %vm221_vm1, %v91_v30  ;;  %2924 = vmatmul.mubr.msk.f32.gmra.mxu1 %vm221_vm1, %v189_v31 }
  0xa4   :  { %2779 = vmatprep.mubr.msk.f32.mxu0 %vm221_vm1, %v92_v32  ;;  %2926 = vmatprep.mubr.msk.f32.mxu1 %vm221_vm1, %v190_v33 }
  0xa7   :  { %2780 = vmatmul.mubr.msk.f32.gmra.mxu0 %vm221_vm1, %v93_v34  ;;  %2927 = vmatmul.mubr.msk.f32.gmra.mxu1 %vm221_vm1, %v191_v35 }
  0xa8   :  { %2782 = vmatprep.mubr.msk.f32.mxu0 %vm221_vm1, %v94_v36  ;;  %2929 = vmatprep.mubr.msk.f32.mxu1 %vm221_vm1, %v192_v37 }
  0xab   :  { %2783 = vmatmul.mubr.msk.f32.gmra.mxu0 %vm221_vm1, %v95_v38  ;;  %2930 = vmatmul.mubr.msk.f32.gmra.mxu1 %vm221_vm1, %v193_v39 }
  0xac   :  { %2785 = vmatprep.mubr.msk.f32.mxu0 %vm221_vm1, %v96_v40  ;;  %2932 = vmatprep.mubr.msk.f32.mxu1 %vm221_vm1, %v194_v41 }
  0xaf   :  { %2786 = vmatmul.mubr.msk.f32.gmra.mxu0 %vm221_vm1, %v97_v42  ;;  %2933 = vmatmul.mubr.msk.f32.gmra.mxu1 %vm221_vm1, %v195_v43 }
  0xb0   :  { %2788 = vmatprep.mubr.msk.f32.mxu0 %vm221_vm1, %v98_v44  ;;  %2935 = vmatprep.mubr.msk.f32.mxu1 %vm221_vm1, %v196_v45 }
  0xb3   :  { %2789 = vmatmul.mubr.msk.f32.gmra.mxu0 %vm221_vm1, %v99_v46  ;;  %2936 = vmatmul.mubr.msk.f32.gmra.mxu1 %vm221_vm1, %v197_v47 }
  0xb4   :  { %2791 = vmatprep.mubr.msk.f32.mxu0 %vm221_vm1, %v100_v48  ;;  %2938 = vmatprep.mubr.msk.f32.mxu1 %vm221_vm1, %v198_v49 }
  0xb7   :  { %2792 = vmatmul.mubr.msk.f32.gmra.mxu0 %vm221_vm1, %v101_v50  ;;  %2939 = vmatmul.mubr.msk.f32.gmra.mxu1 %vm221_vm1, %v199_v51 }
  0xb8   :  { %2794 = vmatprep.mubr.msk.f32.mxu0 %vm221_vm1, %v102_v52  ;;  %2941 = vmatprep.mubr.msk.f32.mxu1 %vm221_vm1, %v200_v53 }
  0xbb   :  { %2795 = vmatmul.mubr.msk.f32.gmra.mxu0 %vm221_vm1, %v103_v54  ;;  %2942 = vmatmul.mubr.msk.f32.gmra.mxu1 %vm221_vm1, %v201_v55 }
  0xbc   :  { %2797 = vmatprep.mubr.msk.f32.mxu0 %vm221_vm1, %v104_v56  ;;  %2944 = vmatprep.mubr.msk.f32.mxu1 %vm221_vm1, %v202_v57 }
  0xbf   :  { %2798 = vmatmul.mubr.msk.f32.gmra.mxu0 %vm221_vm1, %v105_v58  ;;  %2945 = vmatmul.mubr.msk.f32.gmra.mxu1 %vm221_vm1, %v203_v59 }
  0xc0   :  { %2800 = vmatprep.mubr.msk.f32.mxu0 %vm221_vm1, %v106_v60  ;;  %2947 = vmatprep.mubr.msk.f32.mxu1 %vm221_vm1, %v204_v61 }
  0xc3   :  { %2801 = vmatmul.mubr.msk.f32.gmra.mxu0 %vm221_vm1, %v107_v62  ;;  %2948 = vmatmul.mubr.msk.f32.gmra.mxu1 %vm221_vm1, %v205_v63 }
  0xc4   :  { %2803 = vmatprep.mubr.msk.f32.mxu0 %vm221_vm1, %v108_v0  ;;  %2950 = vmatprep.mubr.msk.f32.mxu1 %vm221_vm1, %v206_v1 }
  0xc7   :  { %2804 = vmatmul.mubr.msk.f32.gmra.mxu0 %vm221_vm1, %v109_v2  ;;  %2951 = vmatmul.mubr.msk.f32.gmra.mxu1 %vm221_vm1, %v207_v3 }
  0xc8   :  { %2806 = vmatprep.mubr.msk.f32.mxu0 %vm221_vm1, %v110_v4  ;;  %2953 = vmatprep.mubr.msk.f32.mxu1 %vm221_vm1, %v208_v5 }
  0xcb   :  { %v2664_v9 = vpop.f32.mrf.mxu0  ;;  %2807 = vmatmul.mubr.msk.f32.gmra.mxu0 %vm221_vm1, %v111_v6  ;;  %v2811_v10 = vpop.f32.mrf.mxu1  ;;  %2954 = vmatmul.mubr.msk.f32.gmra.mxu1 %vm221_vm1, %v209_v7 }
  0xcc   :  { %v886_v11 = vadd.f32 %v2664_v9, %v3782_v8  ;;  %v1376_v12 = vadd.f32 %v2811_v10, %v3782_v8 }
  0xcd   :  { %v880_v13 = vpop.f32.mrf.mxu0  ;;  %v1370_v14 = vpop.f32.mrf.mxu1 }
  0xce   :  { %v1860_v15 = vmax.f32 %v886_v11, 0.0  ;;  %v1958_v16 = vmax.f32 %v1376_v12, 0.0  ;;  %v881_v17 = vadd.f32 %v3782_v8, %v880_v13  ;;  %v1371_v18 = vadd.f32 %v3782_v8, %v1370_v14 }
  0xcf   :  { %v2667_v19 = vpop.f32.mrf.mxu0  ;;  %v2814_v20 = vpop.f32.mrf.mxu1 }
  0xd0   :  { %2057 = vst.msk [vmem:[%s4774_s3 + $0x8] sm:$0xff] %vm2055_vm2, %v1860_v15  ;;  %2155 = vst.msk [vmem:[%s4774_s3 + $0x318] sm:$0xff] %vm2055_vm2, %v1958_v16  ;;  %v1859_v21 = vmax.f32 %v881_v17, 0.0  ;;  %v1957_v22 = vmax.f32 %v1371_v18, 0.0  ;;  %v896_v23 = vadd.f32 %v2667_v19, %v3782_v8  ;;  %v1386_v24 = vadd.f32 %v2814_v20, %v3782_v8 }
  0xd1   :  { %v890_v25 = vpop.f32.mrf.mxu0  ;;  %v1380_v26 = vpop.f32.mrf.mxu1 }
  0xd2   :  { %2056 = vst.msk [vmem:[%s4774_s3] sm:$0xff] %vm2055_vm2, %v1859_v21  ;;  %2154 = vst.msk [vmem:[%s4774_s3 + $0x310] sm:$0xff] %vm2055_vm2, %v1957_v22  ;;  %v1862_v27 = vmax.f32 %v896_v23, 0.0  ;;  %v1960_v28 = vmax.f32 %v1386_v24, 0.0  ;;  %v891_v29 = vadd.f32 %v3782_v8, %v890_v25  ;;  %v1381_v30 = vadd.f32 %v3782_v8, %v1380_v26 }
  0xd3   :  { %v2670_v31 = vpop.f32.mrf.mxu0  ;;  %v2817_v32 = vpop.f32.mrf.mxu1 }
  0xd4   :  { %2059 = vst.msk [vmem:[%s4774_s3 + $0x18] sm:$0xff] %vm2055_vm2, %v1862_v27  ;;  %2157 = vst.msk [vmem:[%s4774_s3 + $0x328] sm:$0xff] %vm2055_vm2, %v1960_v28  ;;  %v1861_v33 = vmax.f32 %v891_v29, 0.0  ;;  %v1959_v34 = vmax.f32 %v1381_v30, 0.0  ;;  %v906_v35 = vadd.f32 %v2670_v31, %v3782_v8  ;;  %v1396_v36 = vadd.f32 %v2817_v32, %v3782_v8 }
  0xd5   :  { %v900_v37 = vpop.f32.mrf.mxu0  ;;  %v1390_v38 = vpop.f32.mrf.mxu1 }
  0xd6   :  { %2058 = vst.msk [vmem:[%s4774_s3 + $0x10] sm:$0xff] %vm2055_vm2, %v1861_v33  ;;  %2156 = vst.msk [vmem:[%s4774_s3 + $0x320] sm:$0xff] %vm2055_vm2, %v1959_v34  ;;  %v1864_v39 = vmax.f32 %v906_v35, 0.0  ;;  %v1962_v40 = vmax.f32 %v1396_v36, 0.0  ;;  %v901_v41 = vadd.f32 %v3782_v8, %v900_v37  ;;  %v1391_v42 = vadd.f32 %v3782_v8, %v1390_v38 }
  0xd7   :  { %v2673_v43 = vpop.f32.mrf.mxu0  ;;  %v2820_v44 = vpop.f32.mrf.mxu1 }
  0xd8   :  { %2061 = vst.msk [vmem:[%s4774_s3 + $0x28] sm:$0xff] %vm2055_vm2, %v1864_v39  ;;  %2159 = vst.msk [vmem:[%s4774_s3 + $0x338] sm:$0xff] %vm2055_vm2, %v1962_v40  ;;  %v1863_v45 = vmax.f32 %v901_v41, 0.0  ;;  %v1961_v46 = vmax.f32 %v1391_v42, 0.0  ;;  %v916_v47 = vadd.f32 %v2673_v43, %v3782_v8  ;;  %v1406_v48 = vadd.f32 %v2820_v44, %v3782_v8 }
  0xd9   :  { %v910_v49 = vpop.f32.mrf.mxu0  ;;  %v1400_v50 = vpop.f32.mrf.mxu1 }
  0xda   :  { %2060 = vst.msk [vmem:[%s4774_s3 + $0x20] sm:$0xff] %vm2055_vm2, %v1863_v45  ;;  %2158 = vst.msk [vmem:[%s4774_s3 + $0x330] sm:$0xff] %vm2055_vm2, %v1961_v46  ;;  %v1866_v51 = vmax.f32 %v916_v47, 0.0  ;;  %v1964_v52 = vmax.f32 %v1406_v48, 0.0  ;;  %v911_v53 = vadd.f32 %v3782_v8, %v910_v49  ;;  %v1401_v54 = vadd.f32 %v3782_v8, %v1400_v50 }
  0xdb   :  { %v2676_v55 = vpop.f32.mrf.mxu0  ;;  %v2823_v56 = vpop.f32.mrf.mxu1 }
  0xdc   :  { %2063 = vst.msk [vmem:[%s4774_s3 + $0x38] sm:$0xff] %vm2055_vm2, %v1866_v51  ;;  %2161 = vst.msk [vmem:[%s4774_s3 + $0x348] sm:$0xff] %vm2055_vm2, %v1964_v52  ;;  %v1865_v57 = vmax.f32 %v911_v53, 0.0  ;;  %v1963_v58 = vmax.f32 %v1401_v54, 0.0  ;;  %v926_v59 = vadd.f32 %v2676_v55, %v3782_v8  ;;  %v1416_v60 = vadd.f32 %v2823_v56, %v3782_v8 }
  0xdd   :  { %v920_v61 = vpop.f32.mrf.mxu0  ;;  %v1410_v62 = vpop.f32.mrf.mxu1 }
  0xde   :  { %2062 = vst.msk [vmem:[%s4774_s3 + $0x30] sm:$0xff] %vm2055_vm2, %v1865_v57  ;;  %2160 = vst.msk [vmem:[%s4774_s3 + $0x340] sm:$0xff] %vm2055_vm2, %v1963_v58  ;;  %v1868_v63 = vmax.f32 %v926_v59, 0.0  ;;  %v1966_v0 = vmax.f32 %v1416_v60, 0.0  ;;  %v921_v1 = vadd.f32 %v3782_v8, %v920_v61  ;;  %v1411_v2 = vadd.f32 %v3782_v8, %v1410_v62 }
  0xdf   :  { %v2679_v3 = vpop.f32.mrf.mxu0  ;;  %v2826_v4 = vpop.f32.mrf.mxu1 }
  0xe0   :  { %2065 = vst.msk [vmem:[%s4774_s3 + $0x48] sm:$0xff] %vm2055_vm2, %v1868_v63  ;;  %2163 = vst.msk [vmem:[%s4774_s3 + $0x358] sm:$0xff] %vm2055_vm2, %v1966_v0  ;;  %v1867_v5 = vmax.f32 %v921_v1, 0.0  ;;  %v1965_v6 = vmax.f32 %v1411_v2, 0.0  ;;  %v936_v7 = vadd.f32 %v2679_v3, %v3782_v8  ;;  %v1426_v9 = vadd.f32 %v2826_v4, %v3782_v8 }
  0xe1   :  { %v930_v10 = vpop.f32.mrf.mxu0  ;;  %v1420_v11 = vpop.f32.mrf.mxu1 }
  0xe2   :  { %2064 = vst.msk [vmem:[%s4774_s3 + $0x40] sm:$0xff] %vm2055_vm2, %v1867_v5  ;;  %2162 = vst.msk [vmem:[%s4774_s3 + $0x350] sm:$0xff] %vm2055_vm2, %v1965_v6  ;;  %v1870_v12 = vmax.f32 %v936_v7, 0.0  ;;  %v1968_v13 = vmax.f32 %v1426_v9, 0.0  ;;  %v931_v14 = vadd.f32 %v3782_v8, %v930_v10  ;;  %v1421_v15 = vadd.f32 %v3782_v8, %v1420_v11 }
  0xe3   :  { %v2682_v16 = vpop.f32.mrf.mxu0  ;;  %v2829_v17 = vpop.f32.mrf.mxu1 }
  0xe4   :  { %2067 = vst.msk [vmem:[%s4774_s3 + $0x58] sm:$0xff] %vm2055_vm2, %v1870_v12  ;;  %2165 = vst.msk [vmem:[%s4774_s3 + $0x368] sm:$0xff] %vm2055_vm2, %v1968_v13  ;;  %v1869_v18 = vmax.f32 %v931_v14, 0.0  ;;  %v1967_v19 = vmax.f32 %v1421_v15, 0.0  ;;  %v946_v20 = vadd.f32 %v2682_v16, %v3782_v8  ;;  %v1436_v21 = vadd.f32 %v2829_v17, %v3782_v8 }
  0xe5   :  { %v940_v22 = vpop.f32.mrf.mxu0  ;;  %v1430_v23 = vpop.f32.mrf.mxu1 }
  0xe6   :  { %2066 = vst.msk [vmem:[%s4774_s3 + $0x50] sm:$0xff] %vm2055_vm2, %v1869_v18  ;;  %2164 = vst.msk [vmem:[%s4774_s3 + $0x360] sm:$0xff] %vm2055_vm2, %v1967_v19  ;;  %v1872_v24 = vmax.f32 %v946_v20, 0.0  ;;  %v1970_v25 = vmax.f32 %v1436_v21, 0.0  ;;  %v941_v26 = vadd.f32 %v3782_v8, %v940_v22  ;;  %v1431_v27 = vadd.f32 %v3782_v8, %v1430_v23 }
  0xe7   :  { %v2685_v28 = vpop.f32.mrf.mxu0  ;;  %v2832_v29 = vpop.f32.mrf.mxu1 }
  0xe8   :  { %2069 = vst.msk [vmem:[%s4774_s3 + $0x68] sm:$0xff] %vm2055_vm2, %v1872_v24  ;;  %2167 = vst.msk [vmem:[%s4774_s3 + $0x378] sm:$0xff] %vm2055_vm2, %v1970_v25  ;;  %v1871_v30 = vmax.f32 %v941_v26, 0.0  ;;  %v1969_v31 = vmax.f32 %v1431_v27, 0.0  ;;  %v956_v32 = vadd.f32 %v2685_v28, %v3782_v8  ;;  %v1446_v33 = vadd.f32 %v2832_v29, %v3782_v8 }
  0xe9   :  { %v950_v34 = vpop.f32.mrf.mxu0  ;;  %v1440_v35 = vpop.f32.mrf.mxu1 }
  0xea   :  { %2068 = vst.msk [vmem:[%s4774_s3 + $0x60] sm:$0xff] %vm2055_vm2, %v1871_v30  ;;  %2166 = vst.msk [vmem:[%s4774_s3 + $0x370] sm:$0xff] %vm2055_vm2, %v1969_v31  ;;  %v1874_v36 = vmax.f32 %v956_v32, 0.0  ;;  %v1972_v37 = vmax.f32 %v1446_v33, 0.0  ;;  %v951_v38 = vadd.f32 %v3782_v8, %v950_v34  ;;  %v1441_v39 = vadd.f32 %v3782_v8, %v1440_v35 }
  0xeb   :  { %v2688_v40 = vpop.f32.mrf.mxu0  ;;  %v2835_v41 = vpop.f32.mrf.mxu1 }
  0xec   :  { %2071 = vst.msk [vmem:[%s4774_s3 + $0x78] sm:$0xff] %vm2055_vm2, %v1874_v36  ;;  %2169 = vst.msk [vmem:[%s4774_s3 + $0x388] sm:$0xff] %vm2055_vm2, %v1972_v37  ;;  %v1873_v42 = vmax.f32 %v951_v38, 0.0  ;;  %v1971_v43 = vmax.f32 %v1441_v39, 0.0  ;;  %v966_v44 = vadd.f32 %v2688_v40, %v3782_v8  ;;  %v1456_v45 = vadd.f32 %v2835_v41, %v3782_v8 }
  0xed   :  { %v960_v46 = vpop.f32.mrf.mxu0  ;;  %v1450_v47 = vpop.f32.mrf.mxu1 }
  0xee   :  { %2070 = vst.msk [vmem:[%s4774_s3 + $0x70] sm:$0xff] %vm2055_vm2, %v1873_v42  ;;  %2168 = vst.msk [vmem:[%s4774_s3 + $0x380] sm:$0xff] %vm2055_vm2, %v1971_v43  ;;  %v1876_v48 = vmax.f32 %v966_v44, 0.0  ;;  %v1974_v49 = vmax.f32 %v1456_v45, 0.0  ;;  %v961_v50 = vadd.f32 %v3782_v8, %v960_v46  ;;  %v1451_v51 = vadd.f32 %v3782_v8, %v1450_v47 }
  0xef   :  { %v2691_v52 = vpop.f32.mrf.mxu0  ;;  %v2838_v53 = vpop.f32.mrf.mxu1 }
  0xf0   :  { %2073 = vst.msk [vmem:[%s4774_s3 + $0x88] sm:$0xff] %vm2055_vm2, %v1876_v48  ;;  %2171 = vst.msk [vmem:[%s4774_s3 + $0x398] sm:$0xff] %vm2055_vm2, %v1974_v49  ;;  %v1875_v54 = vmax.f32 %v961_v50, 0.0  ;;  %v1973_v55 = vmax.f32 %v1451_v51, 0.0  ;;  %v976_v56 = vadd.f32 %v2691_v52, %v3782_v8  ;;  %v1466_v57 = vadd.f32 %v2838_v53, %v3782_v8 }
  0xf1   :  { %v970_v58 = vpop.f32.mrf.mxu0  ;;  %v1460_v59 = vpop.f32.mrf.mxu1 }
  0xf2   :  { %2072 = vst.msk [vmem:[%s4774_s3 + $0x80] sm:$0xff] %vm2055_vm2, %v1875_v54  ;;  %2170 = vst.msk [vmem:[%s4774_s3 + $0x390] sm:$0xff] %vm2055_vm2, %v1973_v55  ;;  %v1878_v60 = vmax.f32 %v976_v56, 0.0  ;;  %v1976_v61 = vmax.f32 %v1466_v57, 0.0  ;;  %v971_v62 = vadd.f32 %v3782_v8, %v970_v58  ;;  %v1461_v63 = vadd.f32 %v3782_v8, %v1460_v59 }
  0xf3   :  { %v2694_v0 = vpop.f32.mrf.mxu0  ;;  %v2841_v1 = vpop.f32.mrf.mxu1 }
  0xf4   :  { %2075 = vst.msk [vmem:[%s4774_s3 + $0x98] sm:$0xff] %vm2055_vm2, %v1878_v60  ;;  %2173 = vst.msk [vmem:[%s4774_s3 + $0x3a8] sm:$0xff] %vm2055_vm2, %v1976_v61  ;;  %v1877_v2 = vmax.f32 %v971_v62, 0.0  ;;  %v1975_v3 = vmax.f32 %v1461_v63, 0.0  ;;  %v986_v4 = vadd.f32 %v2694_v0, %v3782_v8  ;;  %v1476_v5 = vadd.f32 %v2841_v1, %v3782_v8 }
  0xf5   :  { %v980_v6 = vpop.f32.mrf.mxu0  ;;  %v1470_v7 = vpop.f32.mrf.mxu1 }
  0xf6   :  { %2074 = vst.msk [vmem:[%s4774_s3 + $0x90] sm:$0xff] %vm2055_vm2, %v1877_v2  ;;  %2172 = vst.msk [vmem:[%s4774_s3 + $0x3a0] sm:$0xff] %vm2055_vm2, %v1975_v3  ;;  %v1880_v9 = vmax.f32 %v986_v4, 0.0  ;;  %v1978_v10 = vmax.f32 %v1476_v5, 0.0  ;;  %v981_v11 = vadd.f32 %v3782_v8, %v980_v6  ;;  %v1471_v12 = vadd.f32 %v3782_v8, %v1470_v7 }
  0xf7   :  { %v2697_v13 = vpop.f32.mrf.mxu0  ;;  %v2844_v14 = vpop.f32.mrf.mxu1 }
  0xf8   :  { %2077 = vst.msk [vmem:[%s4774_s3 + $0xa8] sm:$0xff] %vm2055_vm2, %v1880_v9  ;;  %2175 = vst.msk [vmem:[%s4774_s3 + $0x3b8] sm:$0xff] %vm2055_vm2, %v1978_v10  ;;  %v1879_v15 = vmax.f32 %v981_v11, 0.0  ;;  %v1977_v16 = vmax.f32 %v1471_v12, 0.0  ;;  %v996_v17 = vadd.f32 %v2697_v13, %v3782_v8  ;;  %v1486_v18 = vadd.f32 %v2844_v14, %v3782_v8 }
  0xf9   :  { %v990_v19 = vpop.f32.mrf.mxu0  ;;  %v1480_v20 = vpop.f32.mrf.mxu1 }
  0xfa   :  { %2076 = vst.msk [vmem:[%s4774_s3 + $0xa0] sm:$0xff] %vm2055_vm2, %v1879_v15  ;;  %2174 = vst.msk [vmem:[%s4774_s3 + $0x3b0] sm:$0xff] %vm2055_vm2, %v1977_v16  ;;  %v1882_v21 = vmax.f32 %v996_v17, 0.0  ;;  %v1980_v22 = vmax.f32 %v1486_v18, 0.0  ;;  %v991_v23 = vadd.f32 %v3782_v8, %v990_v19  ;;  %v1481_v24 = vadd.f32 %v3782_v8, %v1480_v20 }
  0xfb   :  { %v2700_v25 = vpop.f32.mrf.mxu0  ;;  %v2847_v26 = vpop.f32.mrf.mxu1 }
  0xfc   :  { %2079 = vst.msk [vmem:[%s4774_s3 + $0xb8] sm:$0xff] %vm2055_vm2, %v1882_v21  ;;  %2177 = vst.msk [vmem:[%s4774_s3 + $0x3c8] sm:$0xff] %vm2055_vm2, %v1980_v22  ;;  %v1881_v27 = vmax.f32 %v991_v23, 0.0  ;;  %v1979_v28 = vmax.f32 %v1481_v24, 0.0  ;;  %v1006_v29 = vadd.f32 %v2700_v25, %v3782_v8  ;;  %v1496_v30 = vadd.f32 %v2847_v26, %v3782_v8 }
  0xfd   :  { %v1000_v31 = vpop.f32.mrf.mxu0  ;;  %v1490_v32 = vpop.f32.mrf.mxu1 }
  0xfe   :  { %2078 = vst.msk [vmem:[%s4774_s3 + $0xb0] sm:$0xff] %vm2055_vm2, %v1881_v27  ;;  %2176 = vst.msk [vmem:[%s4774_s3 + $0x3c0] sm:$0xff] %vm2055_vm2, %v1979_v28  ;;  %v1884_v33 = vmax.f32 %v1006_v29, 0.0  ;;  %v1982_v34 = vmax.f32 %v1496_v30, 0.0  ;;  %v1001_v35 = vadd.f32 %v3782_v8, %v1000_v31  ;;  %v1491_v36 = vadd.f32 %v3782_v8, %v1490_v32 }
  0xff   :  { %v2703_v37 = vpop.f32.mrf.mxu0  ;;  %v2850_v38 = vpop.f32.mrf.mxu1 }
 0x100   :  { %2081 = vst.msk [vmem:[%s4774_s3 + $0xc8] sm:$0xff] %vm2055_vm2, %v1884_v33  ;;  %2179 = vst.msk [vmem:[%s4774_s3 + $0x3d8] sm:$0xff] %vm2055_vm2, %v1982_v34  ;;  %v1883_v39 = vmax.f32 %v1001_v35, 0.0  ;;  %v1981_v40 = vmax.f32 %v1491_v36, 0.0  ;;  %v1016_v41 = vadd.f32 %v2703_v37, %v3782_v8  ;;  %v1506_v42 = vadd.f32 %v2850_v38, %v3782_v8 }
 0x101   :  { %v1010_v43 = vpop.f32.mrf.mxu0  ;;  %v1500_v44 = vpop.f32.mrf.mxu1 }
 0x102   :  { %2080 = vst.msk [vmem:[%s4774_s3 + $0xc0] sm:$0xff] %vm2055_vm2, %v1883_v39  ;;  %2178 = vst.msk [vmem:[%s4774_s3 + $0x3d0] sm:$0xff] %vm2055_vm2, %v1981_v40  ;;  %v1886_v45 = vmax.f32 %v1016_v41, 0.0  ;;  %v1984_v46 = vmax.f32 %v1506_v42, 0.0  ;;  %v1011_v47 = vadd.f32 %v3782_v8, %v1010_v43  ;;  %v1501_v48 = vadd.f32 %v3782_v8, %v1500_v44 }
 0x103   :  { %v2706_v49 = vpop.f32.mrf.mxu0  ;;  %v2853_v50 = vpop.f32.mrf.mxu1 }
 0x104   :  { %2083 = vst.msk [vmem:[%s4774_s3 + $0xd8] sm:$0xff] %vm2055_vm2, %v1886_v45  ;;  %2181 = vst.msk [vmem:[%s4774_s3 + $0x3e8] sm:$0xff] %vm2055_vm2, %v1984_v46  ;;  %v1885_v51 = vmax.f32 %v1011_v47, 0.0  ;;  %v1983_v52 = vmax.f32 %v1501_v48, 0.0  ;;  %v1026_v53 = vadd.f32 %v2706_v49, %v3782_v8  ;;  %v1516_v54 = vadd.f32 %v2853_v50, %v3782_v8 }
 0x105   :  { %v1020_v55 = vpop.f32.mrf.mxu0  ;;  %v1510_v56 = vpop.f32.mrf.mxu1 }
 0x106   :  { %2082 = vst.msk [vmem:[%s4774_s3 + $0xd0] sm:$0xff] %vm2055_vm2, %v1885_v51  ;;  %2180 = vst.msk [vmem:[%s4774_s3 + $0x3e0] sm:$0xff] %vm2055_vm2, %v1983_v52  ;;  %v1888_v57 = vmax.f32 %v1026_v53, 0.0  ;;  %v1986_v58 = vmax.f32 %v1516_v54, 0.0  ;;  %v1021_v59 = vadd.f32 %v3782_v8, %v1020_v55  ;;  %v1511_v60 = vadd.f32 %v3782_v8, %v1510_v56 }
 0x107   :  { %v2709_v61 = vpop.f32.mrf.mxu0  ;;  %v2856_v62 = vpop.f32.mrf.mxu1 }
 0x108   :  { %2085 = vst.msk [vmem:[%s4774_s3 + $0xe8] sm:$0xff] %vm2055_vm2, %v1888_v57  ;;  %2183 = vst.msk [vmem:[%s4774_s3 + $0x3f8] sm:$0xff] %vm2055_vm2, %v1986_v58  ;;  %v1887_v63 = vmax.f32 %v1021_v59, 0.0  ;;  %v1985_v0 = vmax.f32 %v1511_v60, 0.0  ;;  %v1036_v1 = vadd.f32 %v2709_v61, %v3782_v8  ;;  %v1526_v2 = vadd.f32 %v2856_v62, %v3782_v8 }
 0x109   :  { %v1030_v3 = vpop.f32.mrf.mxu0  ;;  %v1520_v4 = vpop.f32.mrf.mxu1 }
 0x10a   :  { %2084 = vst.msk [vmem:[%s4774_s3 + $0xe0] sm:$0xff] %vm2055_vm2, %v1887_v63  ;;  %2182 = vst.msk [vmem:[%s4774_s3 + $0x3f0] sm:$0xff] %vm2055_vm2, %v1985_v0  ;;  %v1890_v5 = vmax.f32 %v1036_v1, 0.0  ;;  %v1988_v6 = vmax.f32 %v1526_v2, 0.0  ;;  %v1031_v7 = vadd.f32 %v3782_v8, %v1030_v3  ;;  %v1521_v9 = vadd.f32 %v3782_v8, %v1520_v4 }
 0x10b   :  { %v2712_v10 = vpop.f32.mrf.mxu0  ;;  %v2859_v11 = vpop.f32.mrf.mxu1 }
 0x10c   :  { %2087 = vst.msk [vmem:[%s4774_s3 + $0xf8] sm:$0xff] %vm2055_vm2, %v1890_v5  ;;  %2185 = vst.msk [vmem:[%s4774_s3 + $0x408] sm:$0xff] %vm2055_vm2, %v1988_v6  ;;  %v1889_v12 = vmax.f32 %v1031_v7, 0.0  ;;  %v1987_v13 = vmax.f32 %v1521_v9, 0.0  ;;  %v1046_v14 = vadd.f32 %v2712_v10, %v3782_v8  ;;  %v1536_v15 = vadd.f32 %v2859_v11, %v3782_v8 }
 0x10d   :  { %v1040_v16 = vpop.f32.mrf.mxu0  ;;  %v1530_v17 = vpop.f32.mrf.mxu1 }
 0x10e   :  { %2086 = vst.msk [vmem:[%s4774_s3 + $0xf0] sm:$0xff] %vm2055_vm2, %v1889_v12  ;;  %2184 = vst.msk [vmem:[%s4774_s3 + $0x400] sm:$0xff] %vm2055_vm2, %v1987_v13  ;;  %v1892_v18 = vmax.f32 %v1046_v14, 0.0  ;;  %v1990_v19 = vmax.f32 %v1536_v15, 0.0  ;;  %v1041_v20 = vadd.f32 %v3782_v8, %v1040_v16  ;;  %v1531_v21 = vadd.f32 %v3782_v8, %v1530_v17 }
 0x10f   :  { %v2715_v22 = vpop.f32.mrf.mxu0  ;;  %v2862_v23 = vpop.f32.mrf.mxu1 }
 0x110   :  { %2089 = vst.msk [vmem:[%s4774_s3 + $0x108] sm:$0xff] %vm2055_vm2, %v1892_v18  ;;  %2187 = vst.msk [vmem:[%s4774_s3 + $0x418] sm:$0xff] %vm2055_vm2, %v1990_v19  ;;  %v1891_v24 = vmax.f32 %v1041_v20, 0.0  ;;  %v1989_v25 = vmax.f32 %v1531_v21, 0.0  ;;  %v1056_v26 = vadd.f32 %v2715_v22, %v3782_v8  ;;  %v1546_v27 = vadd.f32 %v2862_v23, %v3782_v8 }
 0x111   :  { %v1050_v28 = vpop.f32.mrf.mxu0  ;;  %v1540_v29 = vpop.f32.mrf.mxu1 }
 0x112   :  { %2088 = vst.msk [vmem:[%s4774_s3 + $0x100] sm:$0xff] %vm2055_vm2, %v1891_v24  ;;  %2186 = vst.msk [vmem:[%s4774_s3 + $0x410] sm:$0xff] %vm2055_vm2, %v1989_v25  ;;  %v1894_v30 = vmax.f32 %v1056_v26, 0.0  ;;  %v1992_v31 = vmax.f32 %v1546_v27, 0.0  ;;  %v1051_v32 = vadd.f32 %v3782_v8, %v1050_v28  ;;  %v1541_v33 = vadd.f32 %v3782_v8, %v1540_v29 }
 0x113   :  { %v2718_v34 = vpop.f32.mrf.mxu0  ;;  %v2865_v35 = vpop.f32.mrf.mxu1 }
 0x114   :  { %2091 = vst.msk [vmem:[%s4774_s3 + $0x118] sm:$0xff] %vm2055_vm2, %v1894_v30  ;;  %2189 = vst.msk [vmem:[%s4774_s3 + $0x428] sm:$0xff] %vm2055_vm2, %v1992_v31  ;;  %v1893_v36 = vmax.f32 %v1051_v32, 0.0  ;;  %v1991_v37 = vmax.f32 %v1541_v33, 0.0  ;;  %v1066_v38 = vadd.f32 %v2718_v34, %v3782_v8  ;;  %v1556_v39 = vadd.f32 %v2865_v35, %v3782_v8 }
 0x115   :  { %v1060_v40 = vpop.f32.mrf.mxu0  ;;  %v1550_v41 = vpop.f32.mrf.mxu1 }
 0x116   :  { %2090 = vst.msk [vmem:[%s4774_s3 + $0x110] sm:$0xff] %vm2055_vm2, %v1893_v36  ;;  %2188 = vst.msk [vmem:[%s4774_s3 + $0x420] sm:$0xff] %vm2055_vm2, %v1991_v37  ;;  %v1896_v42 = vmax.f32 %v1066_v38, 0.0  ;;  %v1994_v43 = vmax.f32 %v1556_v39, 0.0  ;;  %v1061_v44 = vadd.f32 %v3782_v8, %v1060_v40  ;;  %v1551_v45 = vadd.f32 %v3782_v8, %v1550_v41 }
 0x117   :  { %v2721_v46 = vpop.f32.mrf.mxu0  ;;  %v2868_v47 = vpop.f32.mrf.mxu1 }
 0x118   :  { %2093 = vst.msk [vmem:[%s4774_s3 + $0x128] sm:$0xff] %vm2055_vm2, %v1896_v42  ;;  %2191 = vst.msk [vmem:[%s4774_s3 + $0x438] sm:$0xff] %vm2055_vm2, %v1994_v43  ;;  %v1895_v48 = vmax.f32 %v1061_v44, 0.0  ;;  %v1993_v49 = vmax.f32 %v1551_v45, 0.0  ;;  %v1076_v50 = vadd.f32 %v2721_v46, %v3782_v8  ;;  %v1566_v51 = vadd.f32 %v2868_v47, %v3782_v8 }
 0x119   :  { %v1070_v52 = vpop.f32.mrf.mxu0  ;;  %v1560_v53 = vpop.f32.mrf.mxu1 }
 0x11a   :  { %2092 = vst.msk [vmem:[%s4774_s3 + $0x120] sm:$0xff] %vm2055_vm2, %v1895_v48  ;;  %2190 = vst.msk [vmem:[%s4774_s3 + $0x430] sm:$0xff] %vm2055_vm2, %v1993_v49  ;;  %v1898_v54 = vmax.f32 %v1076_v50, 0.0  ;;  %v1996_v55 = vmax.f32 %v1566_v51, 0.0  ;;  %v1071_v56 = vadd.f32 %v3782_v8, %v1070_v52  ;;  %v1561_v57 = vadd.f32 %v3782_v8, %v1560_v53 }
 0x11b   :  { %v2724_v58 = vpop.f32.mrf.mxu0  ;;  %v2871_v59 = vpop.f32.mrf.mxu1 }
 0x11c   :  { %2095 = vst.msk [vmem:[%s4774_s3 + $0x138] sm:$0xff] %vm2055_vm2, %v1898_v54  ;;  %2193 = vst.msk [vmem:[%s4774_s3 + $0x448] sm:$0xff] %vm2055_vm2, %v1996_v55  ;;  %v1897_v60 = vmax.f32 %v1071_v56, 0.0  ;;  %v1995_v61 = vmax.f32 %v1561_v57, 0.0  ;;  %v1086_v62 = vadd.f32 %v2724_v58, %v3782_v8  ;;  %v1576_v63 = vadd.f32 %v2871_v59, %v3782_v8 }
 0x11d   :  { %v1080_v0 = vpop.f32.mrf.mxu0  ;;  %v1570_v1 = vpop.f32.mrf.mxu1 }
 0x11e   :  { %2094 = vst.msk [vmem:[%s4774_s3 + $0x130] sm:$0xff] %vm2055_vm2, %v1897_v60  ;;  %2192 = vst.msk [vmem:[%s4774_s3 + $0x440] sm:$0xff] %vm2055_vm2, %v1995_v61  ;;  %v1900_v2 = vmax.f32 %v1086_v62, 0.0  ;;  %v1998_v3 = vmax.f32 %v1576_v63, 0.0  ;;  %v1081_v4 = vadd.f32 %v3782_v8, %v1080_v0  ;;  %v1571_v5 = vadd.f32 %v3782_v8, %v1570_v1 }
 0x11f   :  { %v2727_v6 = vpop.f32.mrf.mxu0  ;;  %v2874_v7 = vpop.f32.mrf.mxu1 }
 0x120   :  { %2097 = vst.msk [vmem:[%s4774_s3 + $0x148] sm:$0xff] %vm2055_vm2, %v1900_v2  ;;  %2195 = vst.msk [vmem:[%s4774_s3 + $0x458] sm:$0xff] %vm2055_vm2, %v1998_v3  ;;  %v1899_v9 = vmax.f32 %v1081_v4, 0.0  ;;  %v1997_v10 = vmax.f32 %v1571_v5, 0.0  ;;  %v1096_v11 = vadd.f32 %v2727_v6, %v3782_v8  ;;  %v1586_v12 = vadd.f32 %v2874_v7, %v3782_v8 }
 0x121   :  { %v1090_v13 = vpop.f32.mrf.mxu0  ;;  %v1580_v14 = vpop.f32.mrf.mxu1 }
 0x122   :  { %2096 = vst.msk [vmem:[%s4774_s3 + $0x140] sm:$0xff] %vm2055_vm2, %v1899_v9  ;;  %2194 = vst.msk [vmem:[%s4774_s3 + $0x450] sm:$0xff] %vm2055_vm2, %v1997_v10  ;;  %v1902_v15 = vmax.f32 %v1096_v11, 0.0  ;;  %v2000_v16 = vmax.f32 %v1586_v12, 0.0  ;;  %v1091_v17 = vadd.f32 %v3782_v8, %v1090_v13  ;;  %v1581_v18 = vadd.f32 %v3782_v8, %v1580_v14 }
 0x123   :  { %v2730_v19 = vpop.f32.mrf.mxu0  ;;  %v2877_v20 = vpop.f32.mrf.mxu1 }
 0x124   :  { %2099 = vst.msk [vmem:[%s4774_s3 + $0x158] sm:$0xff] %vm2055_vm2, %v1902_v15  ;;  %2197 = vst.msk [vmem:[%s4774_s3 + $0x468] sm:$0xff] %vm2055_vm2, %v2000_v16  ;;  %v1901_v21 = vmax.f32 %v1091_v17, 0.0  ;;  %v1999_v22 = vmax.f32 %v1581_v18, 0.0  ;;  %v1106_v23 = vadd.f32 %v2730_v19, %v3782_v8  ;;  %v1596_v24 = vadd.f32 %v2877_v20, %v3782_v8 }
 0x125   :  { %v1100_v25 = vpop.f32.mrf.mxu0  ;;  %v1590_v26 = vpop.f32.mrf.mxu1 }
 0x126   :  { %2098 = vst.msk [vmem:[%s4774_s3 + $0x150] sm:$0xff] %vm2055_vm2, %v1901_v21  ;;  %2196 = vst.msk [vmem:[%s4774_s3 + $0x460] sm:$0xff] %vm2055_vm2, %v1999_v22  ;;  %v1904_v27 = vmax.f32 %v1106_v23, 0.0  ;;  %v2002_v28 = vmax.f32 %v1596_v24, 0.0  ;;  %v1101_v29 = vadd.f32 %v3782_v8, %v1100_v25  ;;  %v1591_v30 = vadd.f32 %v3782_v8, %v1590_v26 }
 0x127   :  { %v2733_v31 = vpop.f32.mrf.mxu0  ;;  %v2880_v32 = vpop.f32.mrf.mxu1 }
 0x128   :  { %2101 = vst.msk [vmem:[%s4774_s3 + $0x168] sm:$0xff] %vm2055_vm2, %v1904_v27  ;;  %2199 = vst.msk [vmem:[%s4774_s3 + $0x478] sm:$0xff] %vm2055_vm2, %v2002_v28  ;;  %v1903_v33 = vmax.f32 %v1101_v29, 0.0  ;;  %v2001_v34 = vmax.f32 %v1591_v30, 0.0  ;;  %v1116_v35 = vadd.f32 %v2733_v31, %v3782_v8  ;;  %v1606_v36 = vadd.f32 %v2880_v32, %v3782_v8 }
 0x129   :  { %v1110_v37 = vpop.f32.mrf.mxu0  ;;  %v1600_v38 = vpop.f32.mrf.mxu1 }
 0x12a   :  { %2100 = vst.msk [vmem:[%s4774_s3 + $0x160] sm:$0xff] %vm2055_vm2, %v1903_v33  ;;  %2198 = vst.msk [vmem:[%s4774_s3 + $0x470] sm:$0xff] %vm2055_vm2, %v2001_v34  ;;  %v1906_v39 = vmax.f32 %v1116_v35, 0.0  ;;  %v2004_v40 = vmax.f32 %v1606_v36, 0.0  ;;  %v1111_v41 = vadd.f32 %v3782_v8, %v1110_v37  ;;  %v1601_v42 = vadd.f32 %v3782_v8, %v1600_v38 }
 0x12b   :  { %v2736_v43 = vpop.f32.mrf.mxu0  ;;  %v2883_v44 = vpop.f32.mrf.mxu1 }
 0x12c   :  { %2103 = vst.msk [vmem:[%s4774_s3 + $0x178] sm:$0xff] %vm2055_vm2, %v1906_v39  ;;  %2201 = vst.msk [vmem:[%s4774_s3 + $0x488] sm:$0xff] %vm2055_vm2, %v2004_v40  ;;  %v1905_v45 = vmax.f32 %v1111_v41, 0.0  ;;  %v2003_v46 = vmax.f32 %v1601_v42, 0.0  ;;  %v1126_v47 = vadd.f32 %v2736_v43, %v3782_v8  ;;  %v1616_v48 = vadd.f32 %v2883_v44, %v3782_v8 }
 0x12d   :  { %v1120_v49 = vpop.f32.mrf.mxu0  ;;  %v1610_v50 = vpop.f32.mrf.mxu1 }
 0x12e   :  { %2102 = vst.msk [vmem:[%s4774_s3 + $0x170] sm:$0xff] %vm2055_vm2, %v1905_v45  ;;  %2200 = vst.msk [vmem:[%s4774_s3 + $0x480] sm:$0xff] %vm2055_vm2, %v2003_v46  ;;  %v1908_v51 = vmax.f32 %v1126_v47, 0.0  ;;  %v2006_v52 = vmax.f32 %v1616_v48, 0.0  ;;  %v1121_v53 = vadd.f32 %v3782_v8, %v1120_v49  ;;  %v1611_v54 = vadd.f32 %v3782_v8, %v1610_v50 }
 0x12f   :  { %v2739_v55 = vpop.f32.mrf.mxu0  ;;  %v2886_v56 = vpop.f32.mrf.mxu1 }
 0x130   :  { %2105 = vst.msk [vmem:[%s4774_s3 + $0x188] sm:$0xff] %vm2055_vm2, %v1908_v51  ;;  %2203 = vst.msk [vmem:[%s4774_s3 + $0x498] sm:$0xff] %vm2055_vm2, %v2006_v52  ;;  %v1907_v57 = vmax.f32 %v1121_v53, 0.0  ;;  %v2005_v58 = vmax.f32 %v1611_v54, 0.0  ;;  %v1136_v59 = vadd.f32 %v2739_v55, %v3782_v8  ;;  %v1626_v60 = vadd.f32 %v2886_v56, %v3782_v8 }
 0x131   :  { %v1130_v61 = vpop.f32.mrf.mxu0  ;;  %v1620_v62 = vpop.f32.mrf.mxu1 }
 0x132   :  { %2104 = vst.msk [vmem:[%s4774_s3 + $0x180] sm:$0xff] %vm2055_vm2, %v1907_v57  ;;  %2202 = vst.msk [vmem:[%s4774_s3 + $0x490] sm:$0xff] %vm2055_vm2, %v2005_v58  ;;  %v1910_v63 = vmax.f32 %v1136_v59, 0.0  ;;  %v2008_v0 = vmax.f32 %v1626_v60, 0.0  ;;  %v1131_v1 = vadd.f32 %v3782_v8, %v1130_v61  ;;  %v1621_v2 = vadd.f32 %v3782_v8, %v1620_v62 }
 0x133   :  { %v2742_v3 = vpop.f32.mrf.mxu0  ;;  %v2889_v4 = vpop.f32.mrf.mxu1 }
 0x134   :  { %2107 = vst.msk [vmem:[%s4774_s3 + $0x198] sm:$0xff] %vm2055_vm2, %v1910_v63  ;;  %2205 = vst.msk [vmem:[%s4774_s3 + $0x4a8] sm:$0xff] %vm2055_vm2, %v2008_v0  ;;  %v1909_v5 = vmax.f32 %v1131_v1, 0.0  ;;  %v2007_v6 = vmax.f32 %v1621_v2, 0.0  ;;  %v1146_v7 = vadd.f32 %v2742_v3, %v3782_v8  ;;  %v1636_v9 = vadd.f32 %v2889_v4, %v3782_v8 }
 0x135   :  { %v1140_v10 = vpop.f32.mrf.mxu0  ;;  %v1630_v11 = vpop.f32.mrf.mxu1 }
 0x136   :  { %2106 = vst.msk [vmem:[%s4774_s3 + $0x190] sm:$0xff] %vm2055_vm2, %v1909_v5  ;;  %2204 = vst.msk [vmem:[%s4774_s3 + $0x4a0] sm:$0xff] %vm2055_vm2, %v2007_v6  ;;  %v1912_v12 = vmax.f32 %v1146_v7, 0.0  ;;  %v2010_v13 = vmax.f32 %v1636_v9, 0.0  ;;  %v1141_v14 = vadd.f32 %v3782_v8, %v1140_v10  ;;  %v1631_v15 = vadd.f32 %v3782_v8, %v1630_v11 }
 0x137   :  { %v2745_v16 = vpop.f32.mrf.mxu0  ;;  %v2892_v17 = vpop.f32.mrf.mxu1 }
 0x138   :  { %2109 = vst.msk [vmem:[%s4774_s3 + $0x1a8] sm:$0xff] %vm2055_vm2, %v1912_v12  ;;  %2207 = vst.msk [vmem:[%s4774_s3 + $0x4b8] sm:$0xff] %vm2055_vm2, %v2010_v13  ;;  %v1911_v18 = vmax.f32 %v1141_v14, 0.0  ;;  %v2009_v19 = vmax.f32 %v1631_v15, 0.0  ;;  %v1156_v20 = vadd.f32 %v2745_v16, %v3782_v8  ;;  %v1646_v21 = vadd.f32 %v2892_v17, %v3782_v8  ;;  %v4421_v17 = vld [vmem:[%s4773_s2] ss:$0 sm:$0xff] }
 0x139   :  { %v1150_v22 = vpop.f32.mrf.mxu0  ;;  %v1640_v23 = vpop.f32.mrf.mxu1 }
 0x13a   :  { %2108 = vst.msk [vmem:[%s4774_s3 + $0x1a0] sm:$0xff] %vm2055_vm2, %v1911_v18  ;;  %2206 = vst.msk [vmem:[%s4774_s3 + $0x4b0] sm:$0xff] %vm2055_vm2, %v2009_v19  ;;  %v1914_v24 = vmax.f32 %v1156_v20, 0.0  ;;  %v2012_v25 = vmax.f32 %v1646_v21, 0.0  ;;  %v1151_v26 = vadd.f32 %v3782_v8, %v1150_v22  ;;  %v1641_v27 = vadd.f32 %v3782_v8, %v1640_v23 }
 0x13b   :  { %v2748_v28 = vpop.f32.mrf.mxu0  ;;  %v2895_v29 = vpop.f32.mrf.mxu1 }
 0x13c   :  { %2111 = vst.msk [vmem:[%s4774_s3 + $0x1b8] sm:$0xff] %vm2055_vm2, %v1914_v24  ;;  %2209 = vst.msk [vmem:[%s4774_s3 + $0x4c8] sm:$0xff] %vm2055_vm2, %v2012_v25  ;;  %v1913_v30 = vmax.f32 %v1151_v26, 0.0  ;;  %v2011_v31 = vmax.f32 %v1641_v27, 0.0  ;;  %v1166_v32 = vadd.f32 %v2748_v28, %v3782_v8  ;;  %v1656_v33 = vadd.f32 %v2895_v29, %v3782_v8 }
 0x13d   :  { %v1160_v34 = vpop.f32.mrf.mxu0  ;;  %v1650_v35 = vpop.f32.mrf.mxu1 }
 0x13e   :  { %2110 = vst.msk [vmem:[%s4774_s3 + $0x1b0] sm:$0xff] %vm2055_vm2, %v1913_v30  ;;  %2208 = vst.msk [vmem:[%s4774_s3 + $0x4c0] sm:$0xff] %vm2055_vm2, %v2011_v31  ;;  %v1916_v36 = vmax.f32 %v1166_v32, 0.0  ;;  %v2014_v37 = vmax.f32 %v1656_v33, 0.0  ;;  %v1161_v38 = vadd.f32 %v3782_v8, %v1160_v34  ;;  %v1651_v39 = vadd.f32 %v3782_v8, %v1650_v35 }
 0x13f   :  { %v2751_v40 = vpop.f32.mrf.mxu0  ;;  %v2898_v41 = vpop.f32.mrf.mxu1 }
 0x140   :  { %2113 = vst.msk [vmem:[%s4774_s3 + $0x1c8] sm:$0xff] %vm2055_vm2, %v1916_v36  ;;  %2211 = vst.msk [vmem:[%s4774_s3 + $0x4d8] sm:$0xff] %vm2055_vm2, %v2014_v37  ;;  %v1915_v42 = vmax.f32 %v1161_v38, 0.0  ;;  %v2013_v43 = vmax.f32 %v1651_v39, 0.0  ;;  %v1176_v44 = vadd.f32 %v2751_v40, %v3782_v8  ;;  %v1666_v45 = vadd.f32 %v2898_v41, %v3782_v8 }
 0x141   :  { %v1170_v46 = vpop.f32.mrf.mxu0  ;;  %v1660_v47 = vpop.f32.mrf.mxu1 }
 0x142   :  { %2112 = vst.msk [vmem:[%s4774_s3 + $0x1c0] sm:$0xff] %vm2055_vm2, %v1915_v42  ;;  %2210 = vst.msk [vmem:[%s4774_s3 + $0x4d0] sm:$0xff] %vm2055_vm2, %v2013_v43  ;;  %v1918_v48 = vmax.f32 %v1176_v44, 0.0  ;;  %v2016_v49 = vmax.f32 %v1666_v45, 0.0  ;;  %v1171_v50 = vadd.f32 %v3782_v8, %v1170_v46  ;;  %v1661_v51 = vadd.f32 %v3782_v8, %v1660_v47 }
 0x143   :  { %v2754_v52 = vpop.f32.mrf.mxu0  ;;  %v2901_v53 = vpop.f32.mrf.mxu1 }
 0x144   :  { %2115 = vst.msk [vmem:[%s4774_s3 + $0x1d8] sm:$0xff] %vm2055_vm2, %v1918_v48  ;;  %2213 = vst.msk [vmem:[%s4774_s3 + $0x4e8] sm:$0xff] %vm2055_vm2, %v2016_v49  ;;  %v1917_v54 = vmax.f32 %v1171_v50, 0.0  ;;  %v2015_v55 = vmax.f32 %v1661_v51, 0.0  ;;  %v1186_v56 = vadd.f32 %v2754_v52, %v3782_v8  ;;  %v1676_v57 = vadd.f32 %v2901_v53, %v3782_v8 }
 0x145   :  { %v1180_v58 = vpop.f32.mrf.mxu0  ;;  %v1670_v59 = vpop.f32.mrf.mxu1 }
 0x146   :  { %2114 = vst.msk [vmem:[%s4774_s3 + $0x1d0] sm:$0xff] %vm2055_vm2, %v1917_v54  ;;  %2212 = vst.msk [vmem:[%s4774_s3 + $0x4e0] sm:$0xff] %vm2055_vm2, %v2015_v55  ;;  %v1920_v60 = vmax.f32 %v1186_v56, 0.0  ;;  %v2018_v61 = vmax.f32 %v1676_v57, 0.0  ;;  %v1181_v62 = vadd.f32 %v3782_v8, %v1180_v58  ;;  %v1671_v63 = vadd.f32 %v3782_v8, %v1670_v59 }
 0x147   :  { %v2757_v0 = vpop.f32.mrf.mxu0  ;;  %v2904_v1 = vpop.f32.mrf.mxu1 }
 0x148   :  { %2117 = vst.msk [vmem:[%s4774_s3 + $0x1e8] sm:$0xff] %vm2055_vm2, %v1920_v60  ;;  %2215 = vst.msk [vmem:[%s4774_s3 + $0x4f8] sm:$0xff] %vm2055_vm2, %v2018_v61  ;;  %v1919_v2 = vmax.f32 %v1181_v62, 0.0  ;;  %v2017_v3 = vmax.f32 %v1671_v63, 0.0  ;;  %v1196_v4 = vadd.f32 %v2757_v0, %v3782_v8  ;;  %v1686_v5 = vadd.f32 %v2904_v1, %v3782_v8 }
 0x149   :  { %v1190_v6 = vpop.f32.mrf.mxu0  ;;  %v1680_v7 = vpop.f32.mrf.mxu1 }
 0x14a   :  { %2116 = vst.msk [vmem:[%s4774_s3 + $0x1e0] sm:$0xff] %vm2055_vm2, %v1919_v2  ;;  %2214 = vst.msk [vmem:[%s4774_s3 + $0x4f0] sm:$0xff] %vm2055_vm2, %v2017_v3  ;;  %v1922_v9 = vmax.f32 %v1196_v4, 0.0  ;;  %v2020_v10 = vmax.f32 %v1686_v5, 0.0  ;;  %v1191_v11 = vadd.f32 %v3782_v8, %v1190_v6  ;;  %v1681_v12 = vadd.f32 %v3782_v8, %v1680_v7 }
 0x14b   :  { %v2760_v13 = vpop.f32.mrf.mxu0  ;;  %v2907_v14 = vpop.f32.mrf.mxu1 }
 0x14c   :  { %2119 = vst.msk [vmem:[%s4774_s3 + $0x1f8] sm:$0xff] %vm2055_vm2, %v1922_v9  ;;  %2217 = vst.msk [vmem:[%s4774_s3 + $0x508] sm:$0xff] %vm2055_vm2, %v2020_v10  ;;  %v1921_v15 = vmax.f32 %v1191_v11, 0.0  ;;  %v2019_v16 = vmax.f32 %v1681_v12, 0.0  ;;  %v1206_v8 = vadd.f32 %v4421_v17, %v2760_v13  ;;  %v1696_v18 = vadd.f32 %v4421_v17, %v2907_v14 }
 0x14d   :  { %v1200_v19 = vpop.f32.mrf.mxu0  ;;  %v1690_v20 = vpop.f32.mrf.mxu1 }
 0x14e   :  { %2118 = vst.msk [vmem:[%s4774_s3 + $0x1f0] sm:$0xff] %vm2055_vm2, %v1921_v15  ;;  %2216 = vst.msk [vmem:[%s4774_s3 + $0x500] sm:$0xff] %vm2055_vm2, %v2019_v16  ;;  %v1924_v21 = vmax.f32 %v1206_v8, 0.0  ;;  %v2022_v22 = vmax.f32 %v1696_v18, 0.0  ;;  %v1201_v23 = vadd.f32 %v4421_v17, %v1200_v19  ;;  %v1691_v24 = vadd.f32 %v4421_v17, %v1690_v20 }
 0x14f   :  { %v2763_v25 = vpop.f32.mrf.mxu0  ;;  %v2910_v26 = vpop.f32.mrf.mxu1 }
 0x150   :  { %2121 = vst.msk [vmem:[%s4774_s3 + $0x208] sm:$0xff] %vm2055_vm2, %v1924_v21  ;;  %2219 = vst.msk [vmem:[%s4774_s3 + $0x518] sm:$0xff] %vm2055_vm2, %v2022_v22  ;;  %v1923_v27 = vmax.f32 %v1201_v23, 0.0  ;;  %v2021_v28 = vmax.f32 %v1691_v24, 0.0  ;;  %v1216_v29 = vadd.f32 %v4421_v17, %v2763_v25  ;;  %v1706_v30 = vadd.f32 %v4421_v17, %v2910_v26 }
 0x151   :  { %v1210_v31 = vpop.f32.mrf.mxu0  ;;  %v1700_v32 = vpop.f32.mrf.mxu1 }
 0x152   :  { %2120 = vst.msk [vmem:[%s4774_s3 + $0x200] sm:$0xff] %vm2055_vm2, %v1923_v27  ;;  %2218 = vst.msk [vmem:[%s4774_s3 + $0x510] sm:$0xff] %vm2055_vm2, %v2021_v28  ;;  %v1926_v33 = vmax.f32 %v1216_v29, 0.0  ;;  %v2024_v34 = vmax.f32 %v1706_v30, 0.0  ;;  %v1211_v35 = vadd.f32 %v4421_v17, %v1210_v31  ;;  %v1701_v36 = vadd.f32 %v4421_v17, %v1700_v32 }
 0x153   :  { %v2766_v37 = vpop.f32.mrf.mxu0  ;;  %v2913_v38 = vpop.f32.mrf.mxu1 }
 0x154   :  { %2123 = vst.msk [vmem:[%s4774_s3 + $0x218] sm:$0xff] %vm2055_vm2, %v1926_v33  ;;  %2221 = vst.msk [vmem:[%s4774_s3 + $0x528] sm:$0xff] %vm2055_vm2, %v2024_v34  ;;  %v1925_v39 = vmax.f32 %v1211_v35, 0.0  ;;  %v2023_v40 = vmax.f32 %v1701_v36, 0.0  ;;  %v1226_v41 = vadd.f32 %v4421_v17, %v2766_v37  ;;  %v1716_v42 = vadd.f32 %v4421_v17, %v2913_v38 }
 0x155   :  { %v1220_v43 = vpop.f32.mrf.mxu0  ;;  %v1710_v44 = vpop.f32.mrf.mxu1 }
 0x156   :  { %2122 = vst.msk [vmem:[%s4774_s3 + $0x210] sm:$0xff] %vm2055_vm2, %v1925_v39  ;;  %2220 = vst.msk [vmem:[%s4774_s3 + $0x520] sm:$0xff] %vm2055_vm2, %v2023_v40  ;;  %v1928_v45 = vmax.f32 %v1226_v41, 0.0  ;;  %v2026_v46 = vmax.f32 %v1716_v42, 0.0  ;;  %v1221_v47 = vadd.f32 %v4421_v17, %v1220_v43  ;;  %v1711_v48 = vadd.f32 %v4421_v17, %v1710_v44 }
 0x157   :  { %v2769_v49 = vpop.f32.mrf.mxu0  ;;  %v2916_v50 = vpop.f32.mrf.mxu1 }
 0x158   :  { %2125 = vst.msk [vmem:[%s4774_s3 + $0x228] sm:$0xff] %vm2055_vm2, %v1928_v45  ;;  %2223 = vst.msk [vmem:[%s4774_s3 + $0x538] sm:$0xff] %vm2055_vm2, %v2026_v46  ;;  %v1927_v51 = vmax.f32 %v1221_v47, 0.0  ;;  %v2025_v52 = vmax.f32 %v1711_v48, 0.0  ;;  %v1236_v53 = vadd.f32 %v4421_v17, %v2769_v49  ;;  %v1726_v54 = vadd.f32 %v4421_v17, %v2916_v50 }
 0x159   :  { %v1230_v55 = vpop.f32.mrf.mxu0  ;;  %v1720_v56 = vpop.f32.mrf.mxu1 }
 0x15a   :  { %2124 = vst.msk [vmem:[%s4774_s3 + $0x220] sm:$0xff] %vm2055_vm2, %v1927_v51  ;;  %2222 = vst.msk [vmem:[%s4774_s3 + $0x530] sm:$0xff] %vm2055_vm2, %v2025_v52  ;;  %v1930_v57 = vmax.f32 %v1236_v53, 0.0  ;;  %v2028_v58 = vmax.f32 %v1726_v54, 0.0  ;;  %v1231_v59 = vadd.f32 %v4421_v17, %v1230_v55  ;;  %v1721_v60 = vadd.f32 %v4421_v17, %v1720_v56 }
 0x15b   :  { %v2772_v61 = vpop.f32.mrf.mxu0  ;;  %v2919_v62 = vpop.f32.mrf.mxu1 }
 0x15c   :  { %2127 = vst.msk [vmem:[%s4774_s3 + $0x238] sm:$0xff] %vm2055_vm2, %v1930_v57  ;;  %2225 = vst.msk [vmem:[%s4774_s3 + $0x548] sm:$0xff] %vm2055_vm2, %v2028_v58  ;;  %v1929_v63 = vmax.f32 %v1231_v59, 0.0  ;;  %v2027_v0 = vmax.f32 %v1721_v60, 0.0  ;;  %v1246_v1 = vadd.f32 %v4421_v17, %v2772_v61  ;;  %v1736_v2 = vadd.f32 %v4421_v17, %v2919_v62 }
 0x15d   :  { %v1240_v3 = vpop.f32.mrf.mxu0  ;;  %v1730_v4 = vpop.f32.mrf.mxu1 }
 0x15e   :  { %2126 = vst.msk [vmem:[%s4774_s3 + $0x230] sm:$0xff] %vm2055_vm2, %v1929_v63  ;;  %2224 = vst.msk [vmem:[%s4774_s3 + $0x540] sm:$0xff] %vm2055_vm2, %v2027_v0  ;;  %v1932_v5 = vmax.f32 %v1246_v1, 0.0  ;;  %v2030_v6 = vmax.f32 %v1736_v2, 0.0  ;;  %v1241_v7 = vadd.f32 %v4421_v17, %v1240_v3  ;;  %v1731_v9 = vadd.f32 %v4421_v17, %v1730_v4 }
 0x15f   :  { %v2775_v10 = vpop.f32.mrf.mxu0  ;;  %v2922_v11 = vpop.f32.mrf.mxu1 }
 0x160   :  { %2129 = vst.msk [vmem:[%s4774_s3 + $0x248] sm:$0xff] %vm2055_vm2, %v1932_v5  ;;  %2227 = vst.msk [vmem:[%s4774_s3 + $0x558] sm:$0xff] %vm2055_vm2, %v2030_v6  ;;  %v1931_v12 = vmax.f32 %v1241_v7, 0.0  ;;  %v2029_v13 = vmax.f32 %v1731_v9, 0.0  ;;  %v1256_v14 = vadd.f32 %v4421_v17, %v2775_v10  ;;  %v1746_v15 = vadd.f32 %v4421_v17, %v2922_v11 }
 0x161   :  { %v1250_v16 = vpop.f32.mrf.mxu0  ;;  %v1740_v8 = vpop.f32.mrf.mxu1 }
 0x162   :  { %2128 = vst.msk [vmem:[%s4774_s3 + $0x240] sm:$0xff] %vm2055_vm2, %v1931_v12  ;;  %2226 = vst.msk [vmem:[%s4774_s3 + $0x550] sm:$0xff] %vm2055_vm2, %v2029_v13  ;;  %v1934_v18 = vmax.f32 %v1256_v14, 0.0  ;;  %v2032_v19 = vmax.f32 %v1746_v15, 0.0  ;;  %v1251_v20 = vadd.f32 %v4421_v17, %v1250_v16  ;;  %v1741_v21 = vadd.f32 %v4421_v17, %v1740_v8 }
 0x163   :  { %v2778_v22 = vpop.f32.mrf.mxu0  ;;  %v2925_v23 = vpop.f32.mrf.mxu1 }
 0x164   :  { %2131 = vst.msk [vmem:[%s4774_s3 + $0x258] sm:$0xff] %vm2055_vm2, %v1934_v18  ;;  %2229 = vst.msk [vmem:[%s4774_s3 + $0x568] sm:$0xff] %vm2055_vm2, %v2032_v19  ;;  %v1933_v24 = vmax.f32 %v1251_v20, 0.0  ;;  %v2031_v25 = vmax.f32 %v1741_v21, 0.0  ;;  %v1266_v26 = vadd.f32 %v4421_v17, %v2778_v22  ;;  %v1756_v27 = vadd.f32 %v4421_v17, %v2925_v23 }
 0x165   :  { %v1260_v28 = vpop.f32.mrf.mxu0  ;;  %v1750_v29 = vpop.f32.mrf.mxu1 }
 0x166   :  { %2130 = vst.msk [vmem:[%s4774_s3 + $0x250] sm:$0xff] %vm2055_vm2, %v1933_v24  ;;  %2228 = vst.msk [vmem:[%s4774_s3 + $0x560] sm:$0xff] %vm2055_vm2, %v2031_v25  ;;  %v1936_v30 = vmax.f32 %v1266_v26, 0.0  ;;  %v2034_v31 = vmax.f32 %v1756_v27, 0.0  ;;  %v1261_v32 = vadd.f32 %v4421_v17, %v1260_v28  ;;  %v1751_v33 = vadd.f32 %v4421_v17, %v1750_v29 }
 0x167   :  { %v2781_v34 = vpop.f32.mrf.mxu0  ;;  %v2928_v35 = vpop.f32.mrf.mxu1 }
 0x168   :  { %2133 = vst.msk [vmem:[%s4774_s3 + $0x268] sm:$0xff] %vm2055_vm2, %v1936_v30  ;;  %2231 = vst.msk [vmem:[%s4774_s3 + $0x578] sm:$0xff] %vm2055_vm2, %v2034_v31  ;;  %v1935_v36 = vmax.f32 %v1261_v32, 0.0  ;;  %v2033_v37 = vmax.f32 %v1751_v33, 0.0  ;;  %v1276_v38 = vadd.f32 %v4421_v17, %v2781_v34  ;;  %v1766_v39 = vadd.f32 %v4421_v17, %v2928_v35 }
 0x169   :  { %v1270_v40 = vpop.f32.mrf.mxu0  ;;  %v1760_v41 = vpop.f32.mrf.mxu1 }
 0x16a   :  { %2132 = vst.msk [vmem:[%s4774_s3 + $0x260] sm:$0xff] %vm2055_vm2, %v1935_v36  ;;  %2230 = vst.msk [vmem:[%s4774_s3 + $0x570] sm:$0xff] %vm2055_vm2, %v2033_v37  ;;  %v1938_v42 = vmax.f32 %v1276_v38, 0.0  ;;  %v2036_v43 = vmax.f32 %v1766_v39, 0.0  ;;  %v1271_v44 = vadd.f32 %v4421_v17, %v1270_v40  ;;  %v1761_v45 = vadd.f32 %v4421_v17, %v1760_v41 }
 0x16b   :  { %v2784_v46 = vpop.f32.mrf.mxu0  ;;  %v2931_v47 = vpop.f32.mrf.mxu1 }
 0x16c   :  { %2135 = vst.msk [vmem:[%s4774_s3 + $0x278] sm:$0xff] %vm2055_vm2, %v1938_v42  ;;  %2233 = vst.msk [vmem:[%s4774_s3 + $0x588] sm:$0xff] %vm2055_vm2, %v2036_v43  ;;  %v1937_v48 = vmax.f32 %v1271_v44, 0.0  ;;  %v2035_v49 = vmax.f32 %v1761_v45, 0.0  ;;  %v1286_v50 = vadd.f32 %v4421_v17, %v2784_v46  ;;  %v1776_v51 = vadd.f32 %v4421_v17, %v2931_v47 }
 0x16d   :  { %v1280_v52 = vpop.f32.mrf.mxu0  ;;  %v1770_v53 = vpop.f32.mrf.mxu1 }
 0x16e   :  { %2134 = vst.msk [vmem:[%s4774_s3 + $0x270] sm:$0xff] %vm2055_vm2, %v1937_v48  ;;  %2232 = vst.msk [vmem:[%s4774_s3 + $0x580] sm:$0xff] %vm2055_vm2, %v2035_v49  ;;  %v1940_v54 = vmax.f32 %v1286_v50, 0.0  ;;  %v2038_v55 = vmax.f32 %v1776_v51, 0.0  ;;  %v1281_v56 = vadd.f32 %v4421_v17, %v1280_v52  ;;  %v1771_v57 = vadd.f32 %v4421_v17, %v1770_v53 }
 0x16f   :  { %v2787_v58 = vpop.f32.mrf.mxu0  ;;  %v2934_v59 = vpop.f32.mrf.mxu1 }
 0x170   :  { %2137 = vst.msk [vmem:[%s4774_s3 + $0x288] sm:$0xff] %vm2055_vm2, %v1940_v54  ;;  %2235 = vst.msk [vmem:[%s4774_s3 + $0x598] sm:$0xff] %vm2055_vm2, %v2038_v55  ;;  %v1939_v60 = vmax.f32 %v1281_v56, 0.0  ;;  %v2037_v61 = vmax.f32 %v1771_v57, 0.0  ;;  %v1296_v62 = vadd.f32 %v4421_v17, %v2787_v58  ;;  %v1786_v63 = vadd.f32 %v4421_v17, %v2934_v59 }
 0x171   :  { %v1290_v0 = vpop.f32.mrf.mxu0  ;;  %v1780_v1 = vpop.f32.mrf.mxu1 }
 0x172   :  { %2136 = vst.msk [vmem:[%s4774_s3 + $0x280] sm:$0xff] %vm2055_vm2, %v1939_v60  ;;  %2234 = vst.msk [vmem:[%s4774_s3 + $0x590] sm:$0xff] %vm2055_vm2, %v2037_v61  ;;  %v1942_v2 = vmax.f32 %v1296_v62, 0.0  ;;  %v2040_v3 = vmax.f32 %v1786_v63, 0.0  ;;  %v1291_v4 = vadd.f32 %v4421_v17, %v1290_v0  ;;  %v1781_v5 = vadd.f32 %v4421_v17, %v1780_v1 }
 0x173   :  { %v2790_v6 = vpop.f32.mrf.mxu0  ;;  %v2937_v7 = vpop.f32.mrf.mxu1 }
 0x174   :  { %2139 = vst.msk [vmem:[%s4774_s3 + $0x298] sm:$0xff] %vm2055_vm2, %v1942_v2  ;;  %2237 = vst.msk [vmem:[%s4774_s3 + $0x5a8] sm:$0xff] %vm2055_vm2, %v2040_v3  ;;  %v1941_v9 = vmax.f32 %v1291_v4, 0.0  ;;  %v2039_v10 = vmax.f32 %v1781_v5, 0.0  ;;  %v1306_v11 = vadd.f32 %v4421_v17, %v2790_v6  ;;  %v1796_v12 = vadd.f32 %v4421_v17, %v2937_v7 }
 0x175   :  { %v1300_v13 = vpop.f32.mrf.mxu0  ;;  %v1790_v14 = vpop.f32.mrf.mxu1 }
 0x176   :  { %2138 = vst.msk [vmem:[%s4774_s3 + $0x290] sm:$0xff] %vm2055_vm2, %v1941_v9  ;;  %2236 = vst.msk [vmem:[%s4774_s3 + $0x5a0] sm:$0xff] %vm2055_vm2, %v2039_v10  ;;  %v1944_v15 = vmax.f32 %v1306_v11, 0.0  ;;  %v2042_v16 = vmax.f32 %v1796_v12, 0.0  ;;  %v1301_v8 = vadd.f32 %v4421_v17, %v1300_v13  ;;  %v1791_v18 = vadd.f32 %v4421_v17, %v1790_v14 }
 0x177   :  { %v2793_v19 = vpop.f32.mrf.mxu0  ;;  %v2940_v20 = vpop.f32.mrf.mxu1 }
 0x178   :  { %2141 = vst.msk [vmem:[%s4774_s3 + $0x2a8] sm:$0xff] %vm2055_vm2, %v1944_v15  ;;  %2239 = vst.msk [vmem:[%s4774_s3 + $0x5b8] sm:$0xff] %vm2055_vm2, %v2042_v16  ;;  %v1943_v21 = vmax.f32 %v1301_v8, 0.0  ;;  %v2041_v22 = vmax.f32 %v1791_v18, 0.0  ;;  %v1316_v23 = vadd.f32 %v4421_v17, %v2793_v19  ;;  %v1806_v24 = vadd.f32 %v4421_v17, %v2940_v20 }
 0x179   :  { %v1310_v25 = vpop.f32.mrf.mxu0  ;;  %v1800_v26 = vpop.f32.mrf.mxu1 }
 0x17a   :  { %2140 = vst.msk [vmem:[%s4774_s3 + $0x2a0] sm:$0xff] %vm2055_vm2, %v1943_v21  ;;  %2238 = vst.msk [vmem:[%s4774_s3 + $0x5b0] sm:$0xff] %vm2055_vm2, %v2041_v22  ;;  %v1946_v27 = vmax.f32 %v1316_v23, 0.0  ;;  %v2044_v28 = vmax.f32 %v1806_v24, 0.0  ;;  %v1311_v29 = vadd.f32 %v4421_v17, %v1310_v25  ;;  %v1801_v30 = vadd.f32 %v4421_v17, %v1800_v26 }
 0x17b   :  { %v2796_v31 = vpop.f32.mrf.mxu0  ;;  %v2943_v32 = vpop.f32.mrf.mxu1 }
 0x17c   :  { %2143 = vst.msk [vmem:[%s4774_s3 + $0x2b8] sm:$0xff] %vm2055_vm2, %v1946_v27  ;;  %2241 = vst.msk [vmem:[%s4774_s3 + $0x5c8] sm:$0xff] %vm2055_vm2, %v2044_v28  ;;  %v1945_v33 = vmax.f32 %v1311_v29, 0.0  ;;  %v2043_v34 = vmax.f32 %v1801_v30, 0.0  ;;  %v1326_v35 = vadd.f32 %v4421_v17, %v2796_v31  ;;  %v1816_v36 = vadd.f32 %v4421_v17, %v2943_v32 }
 0x17d   :  { %v1320_v37 = vpop.f32.mrf.mxu0  ;;  %v1810_v38 = vpop.f32.mrf.mxu1 }
 0x17e   :  { %2142 = vst.msk [vmem:[%s4774_s3 + $0x2b0] sm:$0xff] %vm2055_vm2, %v1945_v33  ;;  %2240 = vst.msk [vmem:[%s4774_s3 + $0x5c0] sm:$0xff] %vm2055_vm2, %v2043_v34  ;;  %v1948_v39 = vmax.f32 %v1326_v35, 0.0  ;;  %v2046_v40 = vmax.f32 %v1816_v36, 0.0  ;;  %v1321_v41 = vadd.f32 %v4421_v17, %v1320_v37  ;;  %v1811_v42 = vadd.f32 %v4421_v17, %v1810_v38 }
 0x17f   :  { %v2799_v43 = vpop.f32.mrf.mxu0  ;;  %v2946_v44 = vpop.f32.mrf.mxu1 }
 0x180   :  { %2145 = vst.msk [vmem:[%s4774_s3 + $0x2c8] sm:$0xff] %vm2055_vm2, %v1948_v39  ;;  %2243 = vst.msk [vmem:[%s4774_s3 + $0x5d8] sm:$0xff] %vm2055_vm2, %v2046_v40  ;;  %v1947_v45 = vmax.f32 %v1321_v41, 0.0  ;;  %v2045_v46 = vmax.f32 %v1811_v42, 0.0  ;;  %v1336_v47 = vadd.f32 %v4421_v17, %v2799_v43  ;;  %v1826_v48 = vadd.f32 %v4421_v17, %v2946_v44 }
 0x181   :  { %v1330_v49 = vpop.f32.mrf.mxu0  ;;  %v1820_v50 = vpop.f32.mrf.mxu1 }
 0x182   :  { %2144 = vst.msk [vmem:[%s4774_s3 + $0x2c0] sm:$0xff] %vm2055_vm2, %v1947_v45  ;;  %2242 = vst.msk [vmem:[%s4774_s3 + $0x5d0] sm:$0xff] %vm2055_vm2, %v2045_v46  ;;  %v1950_v51 = vmax.f32 %v1336_v47, 0.0  ;;  %v2048_v52 = vmax.f32 %v1826_v48, 0.0  ;;  %v1331_v53 = vadd.f32 %v4421_v17, %v1330_v49  ;;  %v1821_v54 = vadd.f32 %v4421_v17, %v1820_v50 }
 0x183   :  { %v2802_v55 = vpop.f32.mrf.mxu0  ;;  %v2949_v56 = vpop.f32.mrf.mxu1 }
 0x184   :  { %2147 = vst.msk [vmem:[%s4774_s3 + $0x2d8] sm:$0xff] %vm2055_vm2, %v1950_v51  ;;  %2245 = vst.msk [vmem:[%s4774_s3 + $0x5e8] sm:$0xff] %vm2055_vm2, %v2048_v52  ;;  %v1949_v57 = vmax.f32 %v1331_v53, 0.0  ;;  %v2047_v58 = vmax.f32 %v1821_v54, 0.0  ;;  %v1346_v59 = vadd.f32 %v4421_v17, %v2802_v55  ;;  %v1836_v60 = vadd.f32 %v4421_v17, %v2949_v56 }
 0x185   :  { %v1340_v61 = vpop.f32.mrf.mxu0  ;;  %v1830_v62 = vpop.f32.mrf.mxu1 }
 0x186   :  { %2146 = vst.msk [vmem:[%s4774_s3 + $0x2d0] sm:$0xff] %vm2055_vm2, %v1949_v57  ;;  %2244 = vst.msk [vmem:[%s4774_s3 + $0x5e0] sm:$0xff] %vm2055_vm2, %v2047_v58  ;;  %v1952_v63 = vmax.f32 %v1346_v59, 0.0  ;;  %v2050_v0 = vmax.f32 %v1836_v60, 0.0  ;;  %v1341_v1 = vadd.f32 %v4421_v17, %v1340_v61  ;;  %v1831_v2 = vadd.f32 %v4421_v17, %v1830_v62 }
 0x187   :  { %v2805_v3 = vpop.f32.mrf.mxu0  ;;  %v2952_v4 = vpop.f32.mrf.mxu1 }
 0x188   :  { %2149 = vst.msk [vmem:[%s4774_s3 + $0x2e8] sm:$0xff] %vm2055_vm2, %v1952_v63  ;;  %2247 = vst.msk [vmem:[%s4774_s3 + $0x5f8] sm:$0xff] %vm2055_vm2, %v2050_v0  ;;  %v1951_v5 = vmax.f32 %v1341_v1, 0.0  ;;  %v2049_v6 = vmax.f32 %v1831_v2, 0.0  ;;  %v1356_v7 = vadd.f32 %v4421_v17, %v2805_v3  ;;  %v1846_v9 = vadd.f32 %v4421_v17, %v2952_v4 }
 0x189   :  { %v1350_v10 = vpop.f32.mrf.mxu0  ;;  %v1840_v11 = vpop.f32.mrf.mxu1 }
 0x18a   :  { %2148 = vst.msk [vmem:[%s4774_s3 + $0x2e0] sm:$0xff] %vm2055_vm2, %v1951_v5  ;;  %2246 = vst.msk [vmem:[%s4774_s3 + $0x5f0] sm:$0xff] %vm2055_vm2, %v2049_v6  ;;  %v1954_v12 = vmax.f32 %v1356_v7, 0.0  ;;  %v2052_v13 = vmax.f32 %v1846_v9, 0.0  ;;  %v1351_v14 = vadd.f32 %v4421_v17, %v1350_v10  ;;  %v1841_v15 = vadd.f32 %v4421_v17, %v1840_v11 }
 0x18b   :  { %v2808_v16 = vpop.f32.mrf.mxu0  ;;  %v2955_v8 = vpop.f32.mrf.mxu1 }
 0x18c   :  { %2151 = vst.msk [vmem:[%s4774_s3 + $0x2f8] sm:$0xff] %vm2055_vm2, %v1954_v12  ;;  %2249 = vst.msk [vmem:[%s4774_s3 + $0x608] sm:$0xff] %vm2055_vm2, %v2052_v13  ;;  %v1953_v18 = vmax.f32 %v1351_v14, 0.0  ;;  %v2051_v19 = vmax.f32 %v1841_v15, 0.0  ;;  %v1366_v20 = vadd.f32 %v4421_v17, %v2808_v16  ;;  %v1856_v21 = vadd.f32 %v4421_v17, %v2955_v8 }
 0x18d   :  { %v1360_v22 = vpop.f32.mrf.mxu0  ;;  %v1850_v23 = vpop.f32.mrf.mxu1 }
 0x18e   :  { %2150 = vst.msk [vmem:[%s4774_s3 + $0x2f0] sm:$0xff] %vm2055_vm2, %v1953_v18  ;;  %2248 = vst.msk [vmem:[%s4774_s3 + $0x600] sm:$0xff] %vm2055_vm2, %v2051_v19  ;;  %v1956_v24 = vmax.f32 %v1366_v20, 0.0  ;;  %v2054_v25 = vmax.f32 %v1856_v21, 0.0  ;;  %v1361_v26 = vadd.f32 %v4421_v17, %v1360_v22  ;;  %v1851_v27 = vadd.f32 %v4421_v17, %v1850_v23 }
 0x190   :  { %2153 = vst.msk [vmem:[%s4774_s3 + $0x308] sm:$0xff] %vm2055_vm2, %v1956_v24  ;;  %2251 = vst.msk [vmem:[%s4774_s3 + $0x618] sm:$0xff] %vm2055_vm2, %v2054_v25  ;;  %v1955_v28 = vmax.f32 %v1361_v26, 0.0  ;;  %v2053_v29 = vmax.f32 %v1851_v27, 0.0 }
 0x192   :  { %2152 = vst.msk [vmem:[%s4774_s3 + $0x300] sm:$0xff] %vm2055_vm2, %v1955_v28  ;;  %2250 = vst.msk [vmem:[%s4774_s3 + $0x610] sm:$0xff] %vm2055_vm2, %v2053_v29 }

// kernel: lenet5_forward.6
= control target key start
LH: loop header
LB: loop body
LE: loop exit
PB: predicated region body
PF: predicated region fallthrough
CT: control target
= control target key end

     0   :  { %v1335_v0 = vmov 0.0   ;;  %vm1336_vm0 = vmmov 0   ;;  %vm88_vm1 = vcmask 785408   ;;  %vm546_vm2 = vcmask 48128   ;;  %s2594_s1 = inlined_call_operand.vmem [shape: f32[96,6], index: 1, kind: input, shape index: {}]   ;;  %s2595_s0 = inlined_call_operand.vmem [shape: f32[392,96], index: 0, kind: input, shape index: {}]   ;;  %s2596_s2 = inlined_call_operand.vmem [shape: f32[1,6], index: 2, kind: input, shape index: {}]   ;;  %s2597_s3 = inlined_call_operand.vmem [shape: f32[1,6], index: 3, kind: input, shape index: {}]   ;;  %s2598_s4 = inlined_call_operand.vmem [shape: f32[1,6], index: 4, kind: input, shape index: {}]   ;;  %s2599_s5 = inlined_call_operand.vmem [shape: f32[392,6], index: 5, kind: output, shape index: {}]  }
   0x1   :  { %1136 = vmatprep.subr.mxu0 %v1335_v0  ;;  %v80_v1 = vld [vmem:[%s2594_s1 + $0x58] sm:$0xff]  ;;  %v79_v2 = vld [vmem:[%s2594_s1 + $0x50] sm:$0xff]  ;;  %1160 = vmatprep.mubr.msk.f32.mxu0 %vm1336_vm0, %v1335_v0  ;;  %v78_v3 = vld [vmem:[%s2594_s1 + $0x48] sm:$0xff] }
   0x2   :  { %1137 = vmatpush3.msra.mxu0 %v80_v1  ;;  %1307 = vmatprep.subr.mxu1 %v1335_v0  ;;  %v77_v4 = vld [vmem:[%s2594_s1 + $0x40] sm:$0xff]  ;;  %v76_v5 = vld [vmem:[%s2594_s1 + $0x38] sm:$0xff]  ;;  %v75_v6 = vld [vmem:[%s2594_s1 + $0x30] sm:$0xff] }
   0x3   :  { %1138 = vmatprep.subr.mxu0 %v1335_v0  ;;  %1319 = vmatpush3.msra.mxu1 %v80_v1  ;;  %v74_v7 = vld [vmem:[%s2594_s1 + $0x28] sm:$0xff]  ;;  %v73_v8 = vld [vmem:[%s2594_s1 + $0x20] sm:$0xff]  ;;  %v72_v9 = vld [vmem:[%s2594_s1 + $0x18] sm:$0xff] }
   0x4   :  { %1139 = vmatpush3.msra.mxu0 %v79_v2  ;;  %1308 = vmatprep.subr.mxu1 %v1335_v0  ;;  %v71_v10 = vld [vmem:[%s2594_s1 + $0x10] sm:$0xff]  ;;  %v70_v11 = vld [vmem:[%s2594_s1 + $0x8] sm:$0xff]  ;;  %v69_v12 = vld [vmem:[%s2594_s1] sm:$0xff] }
   0x5   :  { %1140 = vmatprep.subr.mxu0 %v1335_v0  ;;  %1320 = vmatpush3.msra.mxu1 %v79_v2  ;;  %v20_v13 = vld [vmem:[%s2595_s0] sm:$0xff]  ;;  %v45_v14 = vld [vmem:[%s2595_s0 + $0xc8] sm:$0xff]  ;;  %v46_v16 = vld [vmem:[%s2595_s0 + $0xd0] sm:$0xff] }
   0x6   :  { %1141 = vmatpush3.msra.mxu0 %v78_v3  ;;  %1309 = vmatprep.subr.mxu1 %v1335_v0  ;;  %v21_v15 = vld [vmem:[%s2595_s0 + $0x8] sm:$0xff]  ;;  %v22_v17 = vld [vmem:[%s2595_s0 + $0x10] sm:$0xff]  ;;  %v47_v18 = vld [vmem:[%s2595_s0 + $0xd8] sm:$0xff] }
   0x7   :  { %1142 = vmatprep.subr.mxu0 %v1335_v0  ;;  %1321 = vmatpush3.msra.mxu1 %v78_v3  ;;  %v23_v19 = vld [vmem:[%s2595_s0 + $0x18] sm:$0xff]  ;;  %v48_v20 = vld [vmem:[%s2595_s0 + $0xe0] sm:$0xff]  ;;  %v49_v22 = vld [vmem:[%s2595_s0 + $0xe8] sm:$0xff] }
   0x8   :  { %1143 = vmatpush3.msra.mxu0 %v77_v4  ;;  %1310 = vmatprep.subr.mxu1 %v1335_v0  ;;  %v24_v21 = vld [vmem:[%s2595_s0 + $0x20] sm:$0xff]  ;;  %v25_v23 = vld [vmem:[%s2595_s0 + $0x28] sm:$0xff]  ;;  %v50_v24 = vld [vmem:[%s2595_s0 + $0xf0] sm:$0xff] }
   0x9   :  { %1144 = vmatprep.subr.mxu0 %v1335_v0  ;;  %1322 = vmatpush3.msra.mxu1 %v77_v4  ;;  %v26_v25 = vld [vmem:[%s2595_s0 + $0x30] sm:$0xff]  ;;  %v51_v26 = vld [vmem:[%s2595_s0 + $0xf8] sm:$0xff]  ;;  %v52_v28 = vld [vmem:[%s2595_s0 + $0x100] sm:$0xff] }
   0xa   :  { %1145 = vmatpush3.msra.mxu0 %v76_v5  ;;  %1311 = vmatprep.subr.mxu1 %v1335_v0  ;;  %v27_v27 = vld [vmem:[%s2595_s0 + $0x38] sm:$0xff]  ;;  %v28_v29 = vld [vmem:[%s2595_s0 + $0x40] sm:$0xff]  ;;  %v53_v30 = vld [vmem:[%s2595_s0 + $0x108] sm:$0xff] }
   0xb   :  { %1146 = vmatprep.subr.mxu0 %v1335_v0  ;;  %1323 = vmatpush3.msra.mxu1 %v76_v5  ;;  %v29_v31 = vld [vmem:[%s2595_s0 + $0x48] sm:$0xff]  ;;  %v54_v32 = vld [vmem:[%s2595_s0 + $0x110] sm:$0xff]  ;;  %v55_v34 = vld [vmem:[%s2595_s0 + $0x118] sm:$0xff] }
   0xc   :  { %1147 = vmatpush3.msra.mxu0 %v75_v6  ;;  %1312 = vmatprep.subr.mxu1 %v1335_v0  ;;  %v30_v33 = vld [vmem:[%s2595_s0 + $0x50] sm:$0xff]  ;;  %v31_v35 = vld [vmem:[%s2595_s0 + $0x58] sm:$0xff]  ;;  %v56_v36 = vld [vmem:[%s2595_s0 + $0x120] sm:$0xff] }
   0xd   :  { %1148 = vmatprep.subr.mxu0 %v1335_v0  ;;  %1324 = vmatpush3.msra.mxu1 %v75_v6  ;;  %v32_v37 = vld [vmem:[%s2595_s0 + $0x60] sm:$0xff]  ;;  %v57_v38 = vld [vmem:[%s2595_s0 + $0x128] sm:$0xff]  ;;  %v58_v40 = vld [vmem:[%s2595_s0 + $0x130] sm:$0xff] }
   0xe   :  { %1149 = vmatpush3.msra.mxu0 %v74_v7  ;;  %1313 = vmatprep.subr.mxu1 %v1335_v0  ;;  %v33_v39 = vld [vmem:[%s2595_s0 + $0x68] sm:$0xff]  ;;  %v34_v41 = vld [vmem:[%s2595_s0 + $0x70] sm:$0xff]  ;;  %v59_v42 = vld [vmem:[%s2595_s0 + $0x138] sm:$0xff] }
   0xf   :  { %1150 = vmatprep.subr.mxu0 %v1335_v0  ;;  %1325 = vmatpush3.msra.mxu1 %v74_v7  ;;  %v35_v43 = vld [vmem:[%s2595_s0 + $0x78] sm:$0xff]  ;;  %v60_v44 = vld [vmem:[%s2595_s0 + $0x140] sm:$0xff]  ;;  %v61_v46 = vld [vmem:[%s2595_s0 + $0x148] sm:$0xff] }
  0x10   :  { %1151 = vmatpush3.msra.mxu0 %v73_v8  ;;  %1314 = vmatprep.subr.mxu1 %v1335_v0  ;;  %v36_v45 = vld [vmem:[%s2595_s0 + $0x80] sm:$0xff]  ;;  %v37_v47 = vld [vmem:[%s2595_s0 + $0x88] sm:$0xff]  ;;  %v62_v48 = vld [vmem:[%s2595_s0 + $0x150] sm:$0xff] }
  0x11   :  { %1152 = vmatprep.subr.mxu0 %v1335_v0  ;;  %1326 = vmatpush3.msra.mxu1 %v73_v8  ;;  %v38_v49 = vld [vmem:[%s2595_s0 + $0x90] sm:$0xff]  ;;  %v63_v50 = vld [vmem:[%s2595_s0 + $0x158] sm:$0xff]  ;;  %v64_v52 = vld [vmem:[%s2595_s0 + $0x160] sm:$0xff] }
  0x12   :  { %1153 = vmatpush3.msra.mxu0 %v72_v9  ;;  %1315 = vmatprep.subr.mxu1 %v1335_v0  ;;  %v39_v51 = vld [vmem:[%s2595_s0 + $0x98] sm:$0xff]  ;;  %v40_v53 = vld [vmem:[%s2595_s0 + $0xa0] sm:$0xff]  ;;  %v65_v54 = vld [vmem:[%s2595_s0 + $0x168] sm:$0xff] }
  0x13   :  { %1154 = vmatprep.subr.mxu0 %v1335_v0  ;;  %1327 = vmatpush3.msra.mxu1 %v72_v9  ;;  %v41_v55 = vld [vmem:[%s2595_s0 + $0xa8] sm:$0xff]  ;;  %v66_v56 = vld [vmem:[%s2595_s0 + $0x170] sm:$0xff]  ;;  %v67_v58 = vld [vmem:[%s2595_s0 + $0x178] sm:$0xff] }
  0x14   :  { %1155 = vmatpush3.msra.mxu0 %v71_v10  ;;  %1316 = vmatprep.subr.mxu1 %v1335_v0  ;;  %v42_v57 = vld [vmem:[%s2595_s0 + $0xb0] sm:$0xff]  ;;  %v43_v59 = vld [vmem:[%s2595_s0 + $0xb8] sm:$0xff]  ;;  %v68_v60 = vld [vmem:[%s2595_s0 + $0x180] sm:$0xff] }
  0x15   :  { %1156 = vmatprep.subr.mxu0 %v1335_v0  ;;  %1328 = vmatpush3.msra.mxu1 %v71_v10  ;;  %v44_v61 = vld [vmem:[%s2595_s0 + $0xc0] sm:$0xff] }
  0x16   :  { %1157 = vmatpush3.msra.mxu0 %v70_v11  ;;  %1317 = vmatprep.subr.mxu1 %v1335_v0 }
  0x17   :  { %1158 = vmatprep.subr.mxu0 %v1335_v0  ;;  %1329 = vmatpush3.msra.mxu1 %v70_v11 }
  0x18   :  { %1159 = vmatpush3.msra.mxu0 %v69_v12  ;;  %1318 = vmatprep.subr.mxu1 %v1335_v0 }
  0x19   :  { %1161 = vmatmul.mubr.msk.f32.vlgmr.msra.gmra.mxu0 %vm88_vm1, %v20_v13  ;;  %1330 = vmatpush3.msra.mxu1 %v69_v12 }
  0x1a   :  { %1163 = vmatprep.mubr.msk.f32.mxu0 %vm1336_vm0, %v1335_v0  ;;  %1235 = vmatprep.mubr.msk.f32.mxu1 %vm1336_vm0, %v1335_v0 }
  0x1b   :  { %1236 = vmatmul.mubr.msk.f32.vlgmr.msra.gmra.mxu1 %vm88_vm1, %v45_v14 }
  0x1c   :  { %1238 = vmatprep.mubr.msk.f32.mxu1 %vm1336_vm0, %v1335_v0 }
  0x1d   :  { %1164 = vmatmul.mubr.msk.f32.gmra.mxu0 %vm88_vm1, %v21_v15 }
  0x1e   :  { %1166 = vmatprep.mubr.msk.f32.mxu0 %vm1336_vm0, %v1335_v0 }
  0x1f   :  { %1239 = vmatmul.mubr.msk.f32.gmra.mxu1 %vm88_vm1, %v46_v16 }
  0x20   :  { %1241 = vmatprep.mubr.msk.f32.mxu1 %vm1336_vm0, %v1335_v0 }
  0x21   :  { %1167 = vmatmul.mubr.msk.f32.gmra.mxu0 %vm88_vm1, %v22_v17 }
  0x22   :  { %1169 = vmatprep.mubr.msk.f32.mxu0 %vm1336_vm0, %v1335_v0 }
  0x23   :  { %1242 = vmatmul.mubr.msk.f32.gmra.mxu1 %vm88_vm1, %v47_v18 }
  0x24   :  { %1244 = vmatprep.mubr.msk.f32.mxu1 %vm1336_vm0, %v1335_v0 }
  0x25   :  { %1170 = vmatmul.mubr.msk.f32.gmra.mxu0 %vm88_vm1, %v23_v19 }
  0x26   :  { %1172 = vmatprep.mubr.msk.f32.mxu0 %vm1336_vm0, %v1335_v0 }
  0x27   :  { %1245 = vmatmul.mubr.msk.f32.gmra.mxu1 %vm88_vm1, %v48_v20 }
  0x28   :  { %1247 = vmatprep.mubr.msk.f32.mxu1 %vm1336_vm0, %v1335_v0 }
  0x29   :  { %1173 = vmatmul.mubr.msk.f32.gmra.mxu0 %vm88_vm1, %v24_v21 }
  0x2a   :  { %1175 = vmatprep.mubr.msk.f32.mxu0 %vm1336_vm0, %v1335_v0 }
  0x2b   :  { %1248 = vmatmul.mubr.msk.f32.gmra.mxu1 %vm88_vm1, %v49_v22 }
  0x2c   :  { %1250 = vmatprep.mubr.msk.f32.mxu1 %vm1336_vm0, %v1335_v0 }
  0x2d   :  { %1176 = vmatmul.mubr.msk.f32.gmra.mxu0 %vm88_vm1, %v25_v23 }
  0x2e   :  { %1178 = vmatprep.mubr.msk.f32.mxu0 %vm1336_vm0, %v1335_v0 }
  0x2f   :  { %1251 = vmatmul.mubr.msk.f32.gmra.mxu1 %vm88_vm1, %v50_v24 }
  0x30   :  { %1253 = vmatprep.mubr.msk.f32.mxu1 %vm1336_vm0, %v1335_v0 }
  0x31   :  { %1179 = vmatmul.mubr.msk.f32.gmra.mxu0 %vm88_vm1, %v26_v25 }
  0x32   :  { %1181 = vmatprep.mubr.msk.f32.mxu0 %vm1336_vm0, %v1335_v0 }
  0x33   :  { %1254 = vmatmul.mubr.msk.f32.gmra.mxu1 %vm88_vm1, %v51_v26 }
  0x34   :  { %1256 = vmatprep.mubr.msk.f32.mxu1 %vm1336_vm0, %v1335_v0 }
  0x35   :  { %1182 = vmatmul.mubr.msk.f32.gmra.mxu0 %vm88_vm1, %v27_v27 }
  0x36   :  { %1184 = vmatprep.mubr.msk.f32.mxu0 %vm1336_vm0, %v1335_v0 }
  0x37   :  { %1257 = vmatmul.mubr.msk.f32.gmra.mxu1 %vm88_vm1, %v52_v28 }
  0x38   :  { %1259 = vmatprep.mubr.msk.f32.mxu1 %vm1336_vm0, %v1335_v0 }
  0x39   :  { %1185 = vmatmul.mubr.msk.f32.gmra.mxu0 %vm88_vm1, %v28_v29 }
  0x3a   :  { %1187 = vmatprep.mubr.msk.f32.mxu0 %vm1336_vm0, %v1335_v0 }
  0x3b   :  { %1260 = vmatmul.mubr.msk.f32.gmra.mxu1 %vm88_vm1, %v53_v30 }
  0x3c   :  { %1262 = vmatprep.mubr.msk.f32.mxu1 %vm1336_vm0, %v1335_v0 }
  0x3d   :  { %1188 = vmatmul.mubr.msk.f32.gmra.mxu0 %vm88_vm1, %v29_v31 }
  0x3e   :  { %1190 = vmatprep.mubr.msk.f32.mxu0 %vm1336_vm0, %v1335_v0 }
  0x3f   :  { %1263 = vmatmul.mubr.msk.f32.gmra.mxu1 %vm88_vm1, %v54_v32 }
  0x40   :  { %1265 = vmatprep.mubr.msk.f32.mxu1 %vm1336_vm0, %v1335_v0 }
  0x41   :  { %1191 = vmatmul.mubr.msk.f32.gmra.mxu0 %vm88_vm1, %v30_v33 }
  0x42   :  { %1193 = vmatprep.mubr.msk.f32.mxu0 %vm1336_vm0, %v1335_v0 }
  0x43   :  { %1266 = vmatmul.mubr.msk.f32.gmra.mxu1 %vm88_vm1, %v55_v34 }
  0x44   :  { %1268 = vmatprep.mubr.msk.f32.mxu1 %vm1336_vm0, %v1335_v0 }
  0x45   :  { %1194 = vmatmul.mubr.msk.f32.gmra.mxu0 %vm88_vm1, %v31_v35 }
  0x46   :  { %1196 = vmatprep.mubr.msk.f32.mxu0 %vm1336_vm0, %v1335_v0 }
  0x47   :  { %1269 = vmatmul.mubr.msk.f32.gmra.mxu1 %vm88_vm1, %v56_v36 }
  0x48   :  { %1271 = vmatprep.mubr.msk.f32.mxu1 %vm1336_vm0, %v1335_v0 }
  0x49   :  { %1197 = vmatmul.mubr.msk.f32.gmra.mxu0 %vm88_vm1, %v32_v37 }
  0x4a   :  { %1199 = vmatprep.mubr.msk.f32.mxu0 %vm1336_vm0, %v1335_v0 }
  0x4b   :  { %1272 = vmatmul.mubr.msk.f32.gmra.mxu1 %vm88_vm1, %v57_v38 }
  0x4c   :  { %1274 = vmatprep.mubr.msk.f32.mxu1 %vm1336_vm0, %v1335_v0 }
  0x4d   :  { %1200 = vmatmul.mubr.msk.f32.gmra.mxu0 %vm88_vm1, %v33_v39 }
  0x4e   :  { %1202 = vmatprep.mubr.msk.f32.mxu0 %vm1336_vm0, %v1335_v0 }
  0x4f   :  { %1275 = vmatmul.mubr.msk.f32.gmra.mxu1 %vm88_vm1, %v58_v40 }
  0x50   :  { %1277 = vmatprep.mubr.msk.f32.mxu1 %vm1336_vm0, %v1335_v0 }
  0x51   :  { %1203 = vmatmul.mubr.msk.f32.gmra.mxu0 %vm88_vm1, %v34_v41  ;;  %v1750_v41 = vld [vmem:[%s2596_s2] ss:$0 sm:$0xff] }
  0x52   :  { %1205 = vmatprep.mubr.msk.f32.mxu0 %vm1336_vm0, %v1335_v0 }
  0x53   :  { %1278 = vmatmul.mubr.msk.f32.gmra.mxu1 %vm88_vm1, %v59_v42 }
  0x54   :  { %1280 = vmatprep.mubr.msk.f32.mxu1 %vm1336_vm0, %v1335_v0 }
  0x55   :  { %1206 = vmatmul.mubr.msk.f32.gmra.mxu0 %vm88_vm1, %v35_v43 }
  0x56   :  { %1208 = vmatprep.mubr.msk.f32.mxu0 %vm1336_vm0, %v1335_v0 }
  0x57   :  { %1281 = vmatmul.mubr.msk.f32.gmra.mxu1 %vm88_vm1, %v60_v44 }
  0x58   :  { %1283 = vmatprep.mubr.msk.f32.mxu1 %vm1336_vm0, %v1335_v0 }
  0x59   :  { %1209 = vmatmul.mubr.msk.f32.gmra.mxu0 %vm88_vm1, %v36_v45 }
  0x5a   :  { %1211 = vmatprep.mubr.msk.f32.mxu0 %vm1336_vm0, %v1335_v0 }
  0x5b   :  { %1284 = vmatmul.mubr.msk.f32.gmra.mxu1 %vm88_vm1, %v61_v46 }
  0x5c   :  { %1286 = vmatprep.mubr.msk.f32.mxu1 %vm1336_vm0, %v1335_v0 }
  0x5d   :  { %1212 = vmatmul.mubr.msk.f32.gmra.mxu0 %vm88_vm1, %v37_v47 }
  0x5e   :  { %1214 = vmatprep.mubr.msk.f32.mxu0 %vm1336_vm0, %v1335_v0 }
  0x5f   :  { %1287 = vmatmul.mubr.msk.f32.gmra.mxu1 %vm88_vm1, %v62_v48 }
  0x60   :  { %1289 = vmatprep.mubr.msk.f32.mxu1 %vm1336_vm0, %v1335_v0 }
  0x61   :  { %1215 = vmatmul.mubr.msk.f32.gmra.mxu0 %vm88_vm1, %v38_v49 }
  0x62   :  { %1217 = vmatprep.mubr.msk.f32.mxu0 %vm1336_vm0, %v1335_v0 }
  0x63   :  { %1290 = vmatmul.mubr.msk.f32.gmra.mxu1 %vm88_vm1, %v63_v50 }
  0x64   :  { %1292 = vmatprep.mubr.msk.f32.mxu1 %vm1336_vm0, %v1335_v0 }
  0x65   :  { %1218 = vmatmul.mubr.msk.f32.gmra.mxu0 %vm88_vm1, %v39_v51 }
  0x66   :  { %1220 = vmatprep.mubr.msk.f32.mxu0 %vm1336_vm0, %v1335_v0 }
  0x67   :  { %1293 = vmatmul.mubr.msk.f32.gmra.mxu1 %vm88_vm1, %v64_v52 }
  0x68   :  { %1295 = vmatprep.mubr.msk.f32.mxu1 %vm1336_vm0, %v1335_v0 }
  0x69   :  { %1221 = vmatmul.mubr.msk.f32.gmra.mxu0 %vm88_vm1, %v40_v53 }
  0x6a   :  { %1223 = vmatprep.mubr.msk.f32.mxu0 %vm1336_vm0, %v1335_v0 }
  0x6b   :  { %1296 = vmatmul.mubr.msk.f32.gmra.mxu1 %vm88_vm1, %v65_v54 }
  0x6c   :  { %1298 = vmatprep.mubr.msk.f32.mxu1 %vm1336_vm0, %v1335_v0 }
  0x6d   :  { %1224 = vmatmul.mubr.msk.f32.gmra.mxu0 %vm88_vm1, %v41_v55 }
  0x6e   :  { %1226 = vmatprep.mubr.msk.f32.mxu0 %vm1336_vm0, %v1335_v0 }
  0x6f   :  { %1299 = vmatmul.mubr.msk.f32.gmra.mxu1 %vm88_vm1, %v66_v56 }
  0x70   :  { %1301 = vmatprep.mubr.msk.f32.mxu1 %vm1336_vm0, %v1335_v0 }
  0x71   :  { %1227 = vmatmul.mubr.msk.f32.gmra.mxu0 %vm88_vm1, %v42_v57 }
  0x72   :  { %1229 = vmatprep.mubr.msk.f32.mxu0 %vm1336_vm0, %v1335_v0 }
  0x73   :  { %1302 = vmatmul.mubr.msk.f32.gmra.mxu1 %vm88_vm1, %v67_v58 }
  0x74   :  { %1304 = vmatprep.mubr.msk.f32.mxu1 %vm1336_vm0, %v1335_v0 }
  0x75   :  { %1230 = vmatmul.mubr.msk.f32.gmra.mxu0 %vm88_vm1, %v43_v59 }
  0x76   :  { %1232 = vmatprep.mubr.msk.f32.mxu0 %vm1336_vm0, %v1335_v0 }
  0x77   :  { %1305 = vmatmul.mubr.msk.f32.gmra.mxu1 %vm88_vm1, %v68_v60 }
  0x79   :  { %1233 = vmatmul.mubr.msk.f32.gmra.mxu0 %vm88_vm1, %v44_v61 }
  0xd9   :  { %v302_v62 = vpop.f32.mrf.mxu0 }
  0xda   :  { %v1758_v45 = vadd.f32 %v1750_v41, %v302_v62 }
  0xdb   :  { %v1162_v63 = vpop.f32.mrf.mxu0  ;;  %v1721_v1 = vpop.f32.mrf.mxu1 }
  0xdc   :  { %v651_v53 = vmul.f32 %v1758_v45, %v1758_v45  ;;  %v547_v59 = vsel %vm546_vm2, %v1758_v45, 0.0 }
  0xdd   :  { %v307_v2 = vpop.f32.mrf.mxu0  ;;  %v1237_v3 = vpop.f32.mrf.mxu1 }
  0xde   :  { %v1755_v44 = vadd.f32 %v1750_v41, %v307_v2 }
  0xdf   :  { %v1165_v4 = vpop.f32.mrf.mxu0  ;;  %v1723_v5 = vpop.f32.mrf.mxu1 }
  0xe0   :  { %v652_v51 = vmul.f32 %v1755_v44, %v1755_v44  ;;  %v548_v56 = vsel %vm546_vm2, %v1755_v44, 0.0  ;;  %v700_v4 = vsel %vm546_vm2, %v651_v53, 0.0 }
  0xe1   :  { %v312_v6 = vpop.f32.mrf.mxu0  ;;  %v1240_v7 = vpop.f32.mrf.mxu1 }
  0xe2   :  { %v1763_v48 = vadd.f32 %v1750_v41, %v312_v6  ;;  %v701_v62 = vsel %vm546_vm2, %v652_v51, 0.0  ;;  %v549_v6 = vadd.f32 %v548_v56, %v547_v59 }
  0xe3   :  { %v1168_v0 = vpop.f32.mrf.mxu0  ;;  %v1725_v8 = vpop.f32.mrf.mxu1 }
  0xe4   :  { %v653_v57 = vmul.f32 %v1763_v48, %v1763_v48  ;;  %v550_v63 = vsel %vm546_vm2, %v1763_v48, 0.0 }
  0xe5   :  { %v317_v9 = vpop.f32.mrf.mxu0  ;;  %v1243_v10 = vpop.f32.mrf.mxu1 }
  0xe6   :  { %v1770_v52 = vadd.f32 %v1750_v41, %v317_v9  ;;  %v703_v9 = vsel %vm546_vm2, %v653_v57, 0.0 }
  0xe7   :  { %v1171_v11 = vpop.f32.mrf.mxu0  ;;  %v1727_v12 = vpop.f32.mrf.mxu1 }
  0xe8   :  { %v654_v2 = vmul.f32 %v1770_v52, %v1770_v52  ;;  %v552_v10 = vsel %vm546_vm2, %v1770_v52, 0.0 }
  0xe9   :  { %v322_v13 = vpop.f32.mrf.mxu0  ;;  %v1246_v14 = vpop.f32.mrf.mxu1 }
  0xea   :  { %v1781_v58 = vadd.f32 %v1750_v41, %v322_v13  ;;  %v702_v14 = vadd.f32 %v701_v62, %v700_v4 }
  0xeb   :  { %v1174_v15 = vpop.f32.mrf.mxu0  ;;  %v1729_v16 = vpop.f32.mrf.mxu1 }
  0xec   :  { %v655_v11 = vmul.f32 %v1781_v58, %v1781_v58  ;;  %v551_v15 = vadd.f32 %v550_v63, %v549_v6 }
  0xed   :  { %v327_v17 = vpop.f32.mrf.mxu0  ;;  %v1249_v18 = vpop.f32.mrf.mxu1 }
  0xee   :  { %v1793_v3 = vadd.f32 %v1750_v41, %v327_v17 }
  0xef   :  { %v1177_v19 = vpop.f32.mrf.mxu0  ;;  %v1731_v20 = vpop.f32.mrf.mxu1 }
  0xf0   :  { %v705_v19 = vsel %vm546_vm2, %v654_v2, 0.0 }
  0xf1   :  { %v332_v21 = vpop.f32.mrf.mxu0  ;;  %v1252_v22 = vpop.f32.mrf.mxu1 }
  0xf2   :  { %v1804_v13 = vadd.f32 %v1750_v41, %v332_v21  ;;  %v554_v22 = vsel %vm546_vm2, %v1781_v58, 0.0 }
  0xf3   :  { %v1180_v23 = vpop.f32.mrf.mxu0  ;;  %v1733_v24 = vpop.f32.mrf.mxu1 }
  0xf4   :  { %v656_v23 = vmul.f32 %v1793_v3, %v1793_v3  ;;  %v558_v53 = vsel %vm546_vm2, %v1804_v13, 0.0 }
  0xf5   :  { %v337_v25 = vpop.f32.mrf.mxu0  ;;  %v1255_v26 = vpop.f32.mrf.mxu1 }
  0xf6   :  { %v1812_v26 = vadd.f32 %v1750_v41, %v337_v25  ;;  %v709_v51 = vsel %vm546_vm2, %v656_v23, 0.0 }
  0xf7   :  { %v1183_v27 = vpop.f32.mrf.mxu0  ;;  %v1735_v28 = vpop.f32.mrf.mxu1 }
  0xf8   :  { %v704_v27 = vadd.f32 %v703_v9, %v702_v14  ;;  %v560_v63 = vsel %vm546_vm2, %v1812_v26, 0.0 }
  0xf9   :  { %v342_v29 = vpop.f32.mrf.mxu0  ;;  %v1258_v30 = vpop.f32.mrf.mxu1 }
  0xfa   :  { %v553_v30 = vadd.f32 %v552_v10, %v551_v15 }
  0xfb   :  { %v1186_v31 = vpop.f32.mrf.mxu0  ;;  %v1737_v32 = vpop.f32.mrf.mxu1 }
  0xfd   :  { %v1739_v33 = vpop.f32.mrf.mxu0  ;;  %v1261_v34 = vpop.f32.mrf.mxu1 }
  0xfe   :  { %v707_v34 = vsel %vm546_vm2, %v655_v11, 0.0  ;;  %v1831_v56 = vadd.f32 %v1750_v41, %v1739_v33 }
  0xff   :  { %v1189_v35 = vpop.f32.mrf.mxu0  ;;  %v1741_v36 = vpop.f32.mrf.mxu1 }
 0x100   :  { %v556_v35 = vsel %vm546_vm2, %v1793_v3, 0.0  ;;  %v660_v14 = vmul.f32 %v1831_v56, %v1831_v56 }
 0x101   :  { %v1743_v37 = vpop.f32.mrf.mxu0  ;;  %v1264_v38 = vpop.f32.mrf.mxu1 }
 0x102   :  { %v657_v38 = vmul.f32 %v1804_v13, %v1804_v13  ;;  %v1842_v4 = vadd.f32 %v1750_v41, %v1743_v37 }
 0x103   :  { %v1192_v39 = vpop.f32.mrf.mxu0  ;;  %v1745_v40 = vpop.f32.mrf.mxu1 }
 0x104   :  { %v1822_v39 = vadd.f32 %v1750_v41, %v342_v29  ;;  %v711_v62 = vsel %vm546_vm2, %v657_v38, 0.0 }
 0x105   :  { %v1752_v42 = vpop.f32.mrf.mxu0  ;;  %v1267_v43 = vpop.f32.mrf.mxu1 }
 0x106   :  { %v706_v43 = vadd.f32 %v705_v19, %v704_v27  ;;  %v659_v2 = vmul.f32 %v1822_v39, %v1822_v39  ;;  %v562_v11 = vsel %vm546_vm2, %v1822_v39, 0.0  ;;  %v1851_v15 = vadd.f32 %v1750_v41, %v1752_v42 }
 0x107   :  { %v1195_v46 = vpop.f32.mrf.mxu0  ;;  %v1760_v47 = vpop.f32.mrf.mxu1  ;;  %v564_v27 = vsel %vm546_vm2, %v1831_v56, 0.0 }
 0x108   :  { %v555_v46 = vadd.f32 %v554_v22, %v553_v30  ;;  %v708_v57 = vadd.f32 %v707_v34, %v706_v43  ;;  %v715_v23 = vsel %vm546_vm2, %v659_v2, 0.0  ;;  %v661_v30 = vmul.f32 %v1842_v4, %v1842_v4 }
 0x109   :  { %v1765_v49 = vpop.f32.mrf.mxu0  ;;  %v1270_v50 = vpop.f32.mrf.mxu1  ;;  %v717_v43 = vsel %vm546_vm2, %v660_v14, 0.0 }
 0x10a   :  { %v557_v59 = vadd.f32 %v556_v35, %v555_v46  ;;  %v710_v6 = vadd.f32 %v709_v51, %v708_v57  ;;  %v566_v46 = vsel %vm546_vm2, %v1842_v4, 0.0 }
 0x10b   :  { %v1198_v54 = vpop.f32.mrf.mxu0  ;;  %v1774_v55 = vpop.f32.mrf.mxu1 }
 0x10c   :  { %v658_v54 = vmul.f32 %v1812_v26, %v1812_v26  ;;  %v559_v33 = vadd.f32 %v558_v53, %v557_v59  ;;  %v719_v59 = vsel %vm546_vm2, %v661_v30, 0.0 }
 0x10d   :  { %v1785_v60 = vpop.f32.mrf.mxu0  ;;  %v1273_v61 = vpop.f32.mrf.mxu1 }
 0x10e   :  { %v713_v10 = vsel %vm546_vm2, %v658_v54, 0.0  ;;  %v561_v19 = vadd.f32 %v560_v63, %v559_v33  ;;  %v1871_v51 = vadd.f32 %v1750_v41, %v1785_v60 }
 0x10f   :  { %v1201_v7 = vpop.f32.mrf.mxu0  ;;  %v1796_v0 = vpop.f32.mrf.mxu1 }
 0x110   :  { %v563_v42 = vadd.f32 %v562_v11, %v561_v19  ;;  %v664_v11 = vmul.f32 %v1871_v51, %v1871_v51 }
 0x111   :  { %v372_v17 = vpop.f32.mrf.mxu0  ;;  %v1276_v18 = vpop.f32.mrf.mxu1 }
 0x112   :  { %v712_v18 = vadd.f32 %v711_v62, %v710_v6  ;;  %v565_v54 = vadd.f32 %v564_v27, %v563_v42  ;;  %v1881_v63 = vadd.f32 %v1750_v41, %v372_v17  ;;  %v572_v27 = vsel %vm546_vm2, %v1871_v51, 0.0 }
 0x113   :  { %v1204_v31 = vpop.f32.mrf.mxu0  ;;  %v1814_v21 = vpop.f32.mrf.mxu1 }
 0x114   :  { %v1862_v31 = vadd.f32 %v1750_v41, %v1765_v49  ;;  %v714_v34 = vadd.f32 %v713_v10, %v712_v18  ;;  %v567_v6 = vadd.f32 %v566_v46, %v565_v54  ;;  %v665_v30 = vmul.f32 %v1881_v63, %v1881_v63 }
 0x115   :  { %v377_v25 = vpop.f32.mrf.mxu0  ;;  %v1279_v50 = vpop.f32.mrf.mxu1  ;;  %v725_v46 = vsel %vm546_vm2, %v664_v11, 0.0 }
 0x116   :  { %v662_v50 = vmul.f32 %v1851_v15, %v1851_v15  ;;  %v716_v53 = vadd.f32 %v715_v23, %v714_v34  ;;  %v663_v62 = vmul.f32 %v1862_v31, %v1862_v31  ;;  %v570_v10 = vsel %vm546_vm2, %v1862_v31, 0.0 }
 0x117   :  { %v1207_v29 = vpop.f32.mrf.mxu0  ;;  %v1833_v61 = vpop.f32.mrf.mxu1  ;;  %v1889_v14 = vadd.f32 %v1750_v41, %v377_v25 }
 0x118   :  { %v568_v29 = vsel %vm546_vm2, %v1851_v15, 0.0  ;;  %v718_v2 = vadd.f32 %v717_v43, %v716_v53  ;;  %v723_v23 = vsel %vm546_vm2, %v663_v62, 0.0  ;;  %v727_v62 = vsel %vm546_vm2, %v665_v30, 0.0 }
 0x119   :  { %v382_v7 = vpop.f32.mrf.mxu0  ;;  %v1282_v9 = vpop.f32.mrf.mxu1  ;;  %v569_v19 = vadd.f32 %v568_v29, %v567_v6  ;;  %v666_v53 = vmul.f32 %v1889_v14, %v1889_v14 }
 0x11a   :  { %v721_v9 = vsel %vm546_vm2, %v662_v50, 0.0  ;;  %v720_v18 = vadd.f32 %v719_v59, %v718_v2  ;;  %v1899_v34 = vadd.f32 %v1750_v41, %v382_v7  ;;  %v574_v50 = vsel %vm546_vm2, %v1881_v63, 0.0 }
 0x11b   :  { %v1210_v37 = vpop.f32.mrf.mxu0  ;;  %v1853_v22 = vpop.f32.mrf.mxu1  ;;  %v576_v2 = vsel %vm546_vm2, %v1889_v14, 0.0 }
 0x11c   :  { %v722_v42 = vadd.f32 %v721_v9, %v720_v18  ;;  %v667_v6 = vmul.f32 %v1899_v34, %v1899_v34  ;;  %v729_v18 = vsel %vm546_vm2, %v666_v53, 0.0 }
 0x11d   :  { %v387_v35 = vpop.f32.mrf.mxu0  ;;  %v1285_v38 = vpop.f32.mrf.mxu1 }
 0x11e   :  { %v571_v38 = vadd.f32 %v570_v10, %v569_v19  ;;  %v1907_v54 = vadd.f32 %v1750_v41, %v387_v35  ;;  %v578_v19 = vsel %vm546_vm2, %v1899_v34, 0.0 }
 0x11f   :  { %v1213_v49 = vpop.f32.mrf.mxu0  ;;  %v1873_v57 = vpop.f32.mrf.mxu1 }
 0x120   :  { %v724_v49 = vadd.f32 %v723_v23, %v722_v42  ;;  %v573_v59 = vadd.f32 %v572_v27, %v571_v38  ;;  %v731_v38 = vsel %vm546_vm2, %v667_v6, 0.0 }
 0x121   :  { %v392_v60 = vpop.f32.mrf.mxu0  ;;  %v1288_v33 = vpop.f32.mrf.mxu1 }
 0x122   :  { %v1917_v33 = vadd.f32 %v1750_v41, %v392_v60  ;;  %v726_v9 = vadd.f32 %v725_v46, %v724_v49  ;;  %v575_v10 = vadd.f32 %v574_v50, %v573_v59 }
 0x123   :  { %v1216_v37 = vpop.f32.mrf.mxu0  ;;  %v1891_v17 = vpop.f32.mrf.mxu1 }
 0x124   :  { %v668_v37 = vmul.f32 %v1907_v54, %v1907_v54  ;;  %v728_v27 = vadd.f32 %v727_v62, %v726_v9  ;;  %v577_v30 = vadd.f32 %v576_v2, %v575_v10  ;;  %v669_v46 = vmul.f32 %v1917_v33, %v1917_v33 }
 0x125   :  { %v397_v25 = vpop.f32.mrf.mxu0  ;;  %v1291_v43 = vpop.f32.mrf.mxu1  ;;  %v582_v62 = vsel %vm546_vm2, %v1917_v33, 0.0 }
 0x126   :  { %v1925_v23 = vadd.f32 %v1750_v41, %v397_v25  ;;  %v580_v43 = vsel %vm546_vm2, %v1907_v54, 0.0  ;;  %v730_v53 = vadd.f32 %v729_v18, %v728_v27  ;;  %v579_v49 = vadd.f32 %v578_v19, %v577_v30 }
 0x127   :  { %v1219_v29 = vpop.f32.mrf.mxu0  ;;  %v1909_v7 = vpop.f32.mrf.mxu1  ;;  %v735_v18 = vsel %vm546_vm2, %v669_v46, 0.0 }
 0x128   :  { %2610 = vst [vmem:[#allocation2_spill] sm:$0xff] %v1925_v23  ;;  %v733_v29 = vsel %vm546_vm2, %v668_v37, 0.0  ;;  %v670_v2 = vmul.f32 %v1925_v23, %v1925_v23  ;;  %v732_v9 = vadd.f32 %v731_v38, %v730_v53  ;;  %v581_v10 = vadd.f32 %v580_v43, %v579_v49 }
 0x129   :  { %v402_v35 = vpop.f32.mrf.mxu0  ;;  %v1294_v11 = vpop.f32.mrf.mxu1  ;;  %v584_v19 = vsel %vm546_vm2, %v1925_v23, 0.0 }
 0x12a   :  { %v1935_v50 = vadd.f32 %v1750_v41, %v402_v35  ;;  %v734_v27 = vadd.f32 %v733_v29, %v732_v9  ;;  %v583_v30 = vadd.f32 %v582_v62, %v581_v10 }
 0x12b   :  { %v1222_v42 = vpop.f32.mrf.mxu0  ;;  %v1927_v60 = vpop.f32.mrf.mxu1 }
 0x12c   :  { %2611 = vst [vmem:[#allocation3_spill] sm:$0xff] %v1935_v50  ;;  %v671_v37 = vmul.f32 %v1935_v50, %v1935_v50  ;;  %v586_v38 = vsel %vm546_vm2, %v1935_v50, 0.0  ;;  %v736_v53 = vadd.f32 %v735_v18, %v734_v27  ;;  %v585_v49 = vadd.f32 %v584_v19, %v583_v30 }
 0x12d   :  { %v407_v25 = vpop.f32.mrf.mxu0  ;;  %v1297_v59 = vpop.f32.mrf.mxu1 }
 0x12e   :  { %v1943_v6 = vadd.f32 %v1750_v41, %v407_v25  ;;  %v737_v25 = vsel %vm546_vm2, %v670_v2, 0.0  ;;  %v739_v29 = vsel %vm546_vm2, %v671_v37, 0.0  ;;  %v587_v10 = vadd.f32 %v586_v38, %v585_v49 }
 0x12f   :  { %v1225_v11 = vpop.f32.mrf.mxu0  ;;  %v1945_v35 = vpop.f32.mrf.mxu1  ;;  %v738_v9 = vadd.f32 %v737_v25, %v736_v53 }
 0x130   :  { %2612 = vst [vmem:[#allocation4_spill] sm:$0xff] %v1943_v6  ;;  %v672_v43 = vmul.f32 %v1943_v6, %v1943_v6  ;;  %v588_v62 = vsel %vm546_vm2, %v1943_v6, 0.0  ;;  %v1977_v6 = vadd.f32 %v1750_v41, %v1721_v1 }
 0x131   :  { %v412_v42 = vpop.f32.mrf.mxu0  ;;  %v1300_v59 = vpop.f32.mrf.mxu1  ;;  %v740_v27 = vadd.f32 %v739_v29, %v738_v9  ;;  %v589_v37 = vadd.f32 %v588_v62, %v587_v10  ;;  %v1986_v62 = vadd.f32 %v1750_v41, %v1723_v5 }
 0x132   :  { %v1958_v46 = vadd.f32 %v1750_v41, %v412_v42  ;;  %v741_v42 = vsel %vm546_vm2, %v672_v43, 0.0 }
 0x133   :  { %v1228_v11 = vpop.f32.mrf.mxu0  ;;  %v1960_v23 = vpop.f32.mrf.mxu1  ;;  %v742_v43 = vadd.f32 %v741_v42, %v740_v27  ;;  %v1996_v42 = vadd.f32 %v1750_v41, %v1725_v8 }
 0x134   :  { %v673_v2 = vmul.f32 %v1958_v46, %v1958_v46  ;;  %v590_v18 = vsel %vm546_vm2, %v1958_v46, 0.0 }
 0x135   :  { %v417_v59 = vpop.f32.mrf.mxu0  ;;  %v1303_v50 = vpop.f32.mrf.mxu1  ;;  %v591_v53 = vadd.f32 %v590_v18, %v589_v37 }
 0x136   :  { %v1971_v19 = vadd.f32 %v1750_v41, %v417_v59  ;;  %v743_v25 = vsel %vm546_vm2, %v673_v2, 0.0 }
 0x137   :  { %v1231_v30 = vpop.f32.mrf.mxu0  ;;  %v1973_v11 = vpop.f32.mrf.mxu1  ;;  %v744_v2 = vadd.f32 %v743_v25, %v742_v43  ;;  %v596_v25 = vsel %vm546_vm2, %v1977_v6, 0.0 }
 0x138   :  { %v592_v50 = vsel %vm546_vm2, %v1971_v19, 0.0  ;;  %v674_v38 = vmul.f32 %v1971_v19, %v1971_v19  ;;  %v676_v30 = vmul.f32 %v1977_v6, %v1977_v6 }
 0x139   :  { %v422_v49 = vpop.f32.mrf.mxu0  ;;  %v1306_v29 = vpop.f32.mrf.mxu1  ;;  %v593_v10 = vadd.f32 %v592_v50, %v591_v53  ;;  %v677_v50 = vmul.f32 %v1986_v62, %v1986_v62 }
 0x13a   :  { %v745_v9 = vsel %vm546_vm2, %v674_v38, 0.0  ;;  %v1990_v1 = vadd.f32 %v1750_v41, %v422_v49  ;;  %v2008_v38 = vadd.f32 %v1750_v41, %v1727_v12  ;;  %v749_v49 = vsel %vm546_vm2, %v676_v30, 0.0 }
 0x13b   :  { %v1234_v59 = vpop.f32.mrf.mxu0  ;;  %v746_v27 = vadd.f32 %v745_v9, %v744_v2  ;;  %v598_v29 = vsel %vm546_vm2, %v1986_v62, 0.0  ;;  %v678_v9 = vmul.f32 %v1996_v42, %v1996_v42  ;;  %v2018_v2 = vadd.f32 %v1750_v41, %v1729_v16 }
 0x13c   :  { %v594_v18 = vsel %vm546_vm2, %v1990_v1, 0.0  ;;  %v675_v5 = vmul.f32 %v1990_v1, %v1990_v1  ;;  %v751_v12 = vsel %vm546_vm2, %v677_v50, 0.0  ;;  %v679_v30 = vmul.f32 %v2008_v38, %v2008_v38 }
 0x13d   :  { %v595_v37 = vadd.f32 %v594_v18, %v593_v10  ;;  %v600_v18 = vsel %vm546_vm2, %v1996_v42, 0.0  ;;  %v602_v16 = vsel %vm546_vm2, %v2008_v38, 0.0  ;;  %v680_v50 = vmul.f32 %v2018_v2, %v2018_v2 }
 0x13e   :  { %v747_v8 = vsel %vm546_vm2, %v675_v5, 0.0  ;;  %v2027_v5 = vadd.f32 %v1750_v41, %v1731_v20  ;;  %v604_v20 = vsel %vm546_vm2, %v2018_v2, 0.0 }
 0x13f   :  { %v597_v43 = vadd.f32 %v596_v25, %v595_v37  ;;  %v748_v53 = vadd.f32 %v747_v8, %v746_v27  ;;  %v753_v25 = vsel %vm546_vm2, %v678_v9, 0.0  ;;  %v2036_v8 = vadd.f32 %v1750_v41, %v1733_v24 }
 0x140   :  { %v2045_v9 = vadd.f32 %v1750_v41, %v1735_v28  ;;  %v606_v24 = vsel %vm546_vm2, %v2027_v5, 0.0 }
 0x141   :  { %v599_v10 = vadd.f32 %v598_v29, %v597_v43  ;;  %v750_v59 = vadd.f32 %v749_v49, %v748_v53  ;;  %v755_v49 = vsel %vm546_vm2, %v679_v30, 0.0  ;;  %v681_v29 = vmul.f32 %v2027_v5, %v2027_v5 }
 0x142   :  { %v2054_v30 = vadd.f32 %v1750_v41, %v1737_v32  ;;  %v608_v28 = vsel %vm546_vm2, %v2036_v8, 0.0  ;;  %v610_v32 = vsel %vm546_vm2, %v2045_v9, 0.0 }
 0x143   :  { %v601_v27 = vadd.f32 %v600_v18, %v599_v10  ;;  %v752_v37 = vadd.f32 %v751_v12, %v750_v59  ;;  %v757_v12 = vsel %vm546_vm2, %v680_v50, 0.0  ;;  %v682_v18 = vmul.f32 %v2036_v8, %v2036_v8 }
 0x144   :  { %v2063_v50 = vadd.f32 %v1750_v41, %v1741_v36  ;;  %v612_v36 = vsel %vm546_vm2, %v2054_v30, 0.0 }
 0x145   :  { %v603_v43 = vadd.f32 %v602_v16, %v601_v27  ;;  %v754_v53 = vadd.f32 %v753_v25, %v752_v37  ;;  %v759_v25 = vsel %vm546_vm2, %v681_v29, 0.0  ;;  %v683_v16 = vmul.f32 %v2045_v9, %v2045_v9 }
 0x146   :  { %v2072_v29 = vadd.f32 %v1750_v41, %v1745_v40  ;;  %v614_v40 = vsel %vm546_vm2, %v2063_v50, 0.0 }
 0x147   :  { %v605_v10 = vadd.f32 %v604_v20, %v603_v43  ;;  %v756_v59 = vadd.f32 %v755_v49, %v754_v53  ;;  %v761_v49 = vsel %vm546_vm2, %v682_v18, 0.0  ;;  %v684_v20 = vmul.f32 %v2054_v30, %v2054_v30 }
 0x148   :  { %v2081_v18 = vadd.f32 %v1750_v41, %v1760_v47  ;;  %v616_v47 = vsel %vm546_vm2, %v2072_v29, 0.0 }
 0x149   :  { %v607_v27 = vadd.f32 %v606_v24, %v605_v10  ;;  %v758_v37 = vadd.f32 %v757_v12, %v756_v59  ;;  %v763_v12 = vsel %vm546_vm2, %v683_v16, 0.0  ;;  %v685_v24 = vmul.f32 %v2063_v50, %v2063_v50 }
 0x14a   :  { %v2090_v16 = vadd.f32 %v1750_v41, %v1774_v55  ;;  %v618_v55 = vsel %vm546_vm2, %v2081_v18, 0.0 }
 0x14b   :  { %v760_v43 = vadd.f32 %v759_v25, %v758_v37  ;;  %v609_v53 = vadd.f32 %v608_v28, %v607_v27  ;;  %v765_v25 = vsel %vm546_vm2, %v684_v20, 0.0  ;;  %v686_v28 = vmul.f32 %v2072_v29, %v2072_v29 }
 0x14c   :  { %v2099_v20 = vadd.f32 %v1750_v41, %v1796_v0  ;;  %v620_v0 = vsel %vm546_vm2, %v2090_v16, 0.0 }
 0x14d   :  { %v611_v10 = vadd.f32 %v610_v32, %v609_v53  ;;  %v762_v59 = vadd.f32 %v761_v49, %v760_v43  ;;  %v767_v49 = vsel %vm546_vm2, %v685_v24, 0.0  ;;  %v687_v32 = vmul.f32 %v2081_v18, %v2081_v18 }
 0x14e   :  { %2613 = vst [vmem:[#allocation5_spill] sm:$0xff] %v2099_v20  ;;  %v2108_v24 = vadd.f32 %v1750_v41, %v1814_v21  ;;  %v622_v21 = vsel %vm546_vm2, %v2099_v20, 0.0 }
 0x14f   :  { %v613_v27 = vadd.f32 %v612_v36, %v611_v10  ;;  %v764_v37 = vadd.f32 %v763_v12, %v762_v59  ;;  %v769_v12 = vsel %vm546_vm2, %v686_v28, 0.0  ;;  %v688_v36 = vmul.f32 %v2090_v16, %v2090_v16 }
 0x150   :  { %2614 = vst [vmem:[#allocation6_spill] sm:$0xff] %v2108_v24  ;;  %v2117_v28 = vadd.f32 %v1750_v41, %v1833_v61  ;;  %v624_v61 = vsel %vm546_vm2, %v2108_v24, 0.0 }
 0x151   :  { %v615_v43 = vadd.f32 %v614_v40, %v613_v27  ;;  %v766_v53 = vadd.f32 %v765_v25, %v764_v37  ;;  %v771_v25 = vsel %vm546_vm2, %v687_v32, 0.0  ;;  %v689_v40 = vmul.f32 %v2099_v20, %v2099_v20 }
 0x152   :  { %2615 = vst [vmem:[#allocation7_spill] sm:$0xff] %v2117_v28  ;;  %v2126_v32 = vadd.f32 %v1750_v41, %v1853_v22  ;;  %v2139_v22 = vadd.f32 %v1750_v41, %v1891_v17  ;;  %v2153_v17 = vadd.f32 %v1750_v41, %v1909_v7 }
 0x153   :  { %v617_v10 = vadd.f32 %v616_v47, %v615_v43  ;;  %v768_v59 = vadd.f32 %v767_v49, %v766_v53  ;;  %v773_v49 = vsel %vm546_vm2, %v688_v36, 0.0  ;;  %v690_v47 = vmul.f32 %v2108_v24, %v2108_v24 }
 0x154   :  { %2616 = vst [vmem:[#allocation8_spill] sm:$0xff] %v2126_v32  ;;  %v2135_v36 = vadd.f32 %v1750_v41, %v1873_v57  ;;  %v628_v57 = vsel %vm546_vm2, %v2126_v32, 0.0  ;;  %v632_v7 = vsel %vm546_vm2, %v2139_v22, 0.0 }
 0x155   :  { %v619_v27 = vadd.f32 %v618_v55, %v617_v10  ;;  %v770_v37 = vadd.f32 %v769_v12, %v768_v59  ;;  %v775_v12 = vsel %vm546_vm2, %v689_v40, 0.0  ;;  %v691_v55 = vmul.f32 %v2117_v28, %v2117_v28 }
 0x156   :  { %2617 = vst [vmem:[#allocation9_spill] sm:$0xff] %v2135_v36  ;;  %v692_v40 = vmul.f32 %v2126_v32, %v2126_v32 }
 0x157   :  { %v621_v43 = vadd.f32 %v620_v0, %v619_v27  ;;  %v772_v53 = vadd.f32 %v771_v25, %v770_v37  ;;  %v777_v25 = vsel %vm546_vm2, %v690_v47, 0.0  ;;  %v626_v0 = vsel %vm546_vm2, %v2117_v28, 0.0 }
 0x159   :  { %v774_v10 = vadd.f32 %v773_v49, %v772_v53  ;;  %v623_v59 = vadd.f32 %v622_v21, %v621_v43  ;;  %v779_v49 = vsel %vm546_vm2, %v691_v55, 0.0  ;;  %v693_v21 = vmul.f32 %v2135_v36, %v2135_v36 }
 0x15a   :  { %v2162_v55 = vadd.f32 %v1750_v41, %v1927_v60  ;;  %v634_v60 = vsel %vm546_vm2, %v2153_v17, 0.0 }
 0x15b   :  { %v776_v27 = vadd.f32 %v775_v12, %v774_v10  ;;  %v625_v37 = vadd.f32 %v624_v61, %v623_v59  ;;  %v694_v59 = vmul.f32 %v2139_v22, %v2139_v22  ;;  %v781_v12 = vsel %vm546_vm2, %v692_v40, 0.0 }
 0x15c   :  { %v630_v61 = vsel %vm546_vm2, %v2135_v36, 0.0  ;;  %v2171_v40 = vadd.f32 %v1750_v41, %v1945_v35 }
 0x15d   :  { %v778_v43 = vadd.f32 %v777_v25, %v776_v27  ;;  %v627_v53 = vadd.f32 %v626_v0, %v625_v37  ;;  %v783_v25 = vsel %vm546_vm2, %v693_v21, 0.0  ;;  %v695_v0 = vmul.f32 %v2153_v17, %v2153_v17 }
 0x15e   :  { %v2180_v21 = vadd.f32 %v1750_v41, %v1960_v23  ;;  %v638_v23 = vsel %vm546_vm2, %v2171_v40, 0.0 }
 0x15f   :  { %v780_v47 = vadd.f32 %v779_v49, %v778_v43  ;;  %v629_v10 = vadd.f32 %v628_v57, %v627_v53  ;;  %v785_v49 = vsel %vm546_vm2, %v694_v59, 0.0  ;;  %v696_v57 = vmul.f32 %v2162_v55, %v2162_v55 }
 0x160   :  { %2618 = vst [vmem:[#allocation10_spill] sm:$0xff] %v2180_v21  ;;  %v636_v59 = vsel %vm546_vm2, %v2162_v55, 0.0 }
 0x161   :  { %v782_v27 = vadd.f32 %v781_v12, %v780_v47  ;;  %v631_v37 = vadd.f32 %v630_v61, %v629_v10  ;;  %v2184_v47 = vadd.f32 %v1750_v41, %v1973_v11  ;;  %v787_v12 = vsel %vm546_vm2, %v695_v0, 0.0 }
 0x162   :  { %v697_v61 = vmul.f32 %v2171_v40, %v2171_v40  ;;  %v698_v41 = vmul.f32 %v2180_v21, %v2180_v21 }
 0x163   :  { %v784_v43 = vadd.f32 %v783_v25, %v782_v27  ;;  %v633_v53 = vadd.f32 %v632_v7, %v631_v37  ;;  %2619 = vst [vmem:[#allocation11_spill] sm:$0xff] %v2184_v47  ;;  %v789_v25 = vsel %vm546_vm2, %v696_v57, 0.0  ;;  %v699_v11 = vmul.f32 %v2184_v47, %v2184_v47 }
 0x165   :  { %v786_v35 = vadd.f32 %v785_v49, %v784_v43  ;;  %v635_v10 = vadd.f32 %v634_v60, %v633_v53  ;;  %v791_v43 = vsel %vm546_vm2, %v697_v61, 0.0  ;;  %v640_v53 = vsel %vm546_vm2, %v2180_v21, 0.0 }
 0x166   :  { %v642_v49 = vsel %vm546_vm2, %v2184_v47, 0.0 }
 0x167   :  { %v788_v27 = vadd.f32 %v787_v12, %v786_v35  ;;  %v637_v37 = vadd.f32 %v636_v59, %v635_v10  ;;  %v793_v35 = vsel %vm546_vm2, %v698_v41, 0.0  ;;  %v795_v10 = vsel %vm546_vm2, %v699_v11, 0.0 }
 0x169   :  { %v790_v7 = vadd.f32 %v789_v25, %v788_v27  ;;  %v639_v0 = vadd.f32 %v638_v23, %v637_v37 }
 0x16b   :  { %v792_v60 = vadd.f32 %v791_v43, %v790_v7  ;;  %v641_v57 = vadd.f32 %v640_v53, %v639_v0 }
 0x16d   :  { %v794_v12 = vadd.f32 %v793_v35, %v792_v60  ;;  %v643_v59 = vadd.f32 %v642_v49, %v641_v57  ;;  %v814_v49 = vlaneseq }
 0x16f   :  { %v644_v36 = vrot.slane %v643_v59, 4  ;;  %v796_v32 = vadd.f32 %v795_v10, %v794_v12  ;;  %v815_v60 = vshrl.u32 %v814_v49, 7 }
 0x171   :  { %v645_v27 = vadd.f32 %v644_v36, %v643_v59  ;;  %v797_v37 = vrot.slane %v796_v32, 4  ;;  %v806_v36 = vld [vmem:[%s2597_s3] sm:$0x1] }
 0x173   :  { %v646_v25 = vrot.slane %v645_v27, 2  ;;  %v798_v61 = vadd.f32 %v797_v37, %v796_v32  ;;  %v816_v32 = vsub.s32 0, %v815_v60  ;;  %v2623_v60 = vld [vmem:[#allocation5_spill] sm:$0xff] }
 0x175   :  { %v647_v23 = vadd.f32 %v646_v25, %v645_v27  ;;  %v799_v28 = vrot.slane %v798_v61, 2 }
 0x177   :  { %v648_v24 = vrot.slane %v647_v23, 1  ;;  %v800_v21 = vadd.f32 %v799_v28, %v798_v61 }
 0x179   :  { %v649_v20 = vadd.f32 %v648_v24, %v647_v23  ;;  %v801_v47 = vrot.slane %v800_v21, 1  ;;  %v810_v24 = vld [vmem:[%s2598_s4] sm:$0x1] }
 0x17b   :  { %v650_v7 = vmul.f32 0.0025510204, %v649_v20  ;;  %v802_v0 = vadd.f32 %v801_v47, %v800_v21 }
 0x17d   :  { %v803_v43 = vmul.f32 0.0025510204, %v802_v0  ;;  %v804_v41 = vmul.f32 %v650_v7, %v650_v7  ;;  %v2620_v0 = vld [vmem:[#allocation2_spill] sm:$0xff] }
 0x17f   :  { %v805_v53 = vsub.f32 %v803_v43, %v804_v41  ;;  %v2621_v43 = vld [vmem:[#allocation3_spill] sm:$0xff]  ;;  %v2622_v41 = vld [vmem:[#allocation4_spill] sm:$0xff] }
 0x181   :  { %v807_v11 = vadd.f32 1e-05, %v805_v53 }
 0x183   :  { %1333 = vrsqrt.f32 %v807_v11 }
 0x190   :  { %v1334_v57 = vpop.eup %1333 }
 0x191   :  { %v809_v35 = vmul.f32 %v1334_v57, %v806_v36  ;;  %v2624_v36 = vld [vmem:[#allocation10_spill] sm:$0xff]  ;;  %v2625_v57 = vld [vmem:[#allocation11_spill] sm:$0xff] }
 0x193   :  { %v811_v20 = vmul.f32 %v809_v35, %v650_v7  ;;  %v817_v28 = vrot.slane %v809_v35, %v816_v32 }
 0x195   :  { %v812_v21 = vsub.f32 %v810_v24, %v811_v20  ;;  %v819_v47 = vmul.f32 %v817_v28, %v1758_v45  ;;  %v820_v10 = vmul.f32 %v817_v28, %v1755_v44  ;;  %v821_v12 = vmul.f32 %v817_v28, %v1763_v48 }
 0x196   :  { %v822_v59 = vmul.f32 %v817_v28, %v1770_v52  ;;  %v823_v27 = vmul.f32 %v817_v28, %v1781_v58  ;;  %v824_v37 = vmul.f32 %v817_v28, %v1793_v3  ;;  %v825_v25 = vmul.f32 %v817_v28, %v1804_v13 }
 0x197   :  { %v826_v61 = vmul.f32 %v817_v28, %v1812_v26  ;;  %v827_v23 = vmul.f32 %v817_v28, %v1822_v39  ;;  %v828_v7 = vmul.f32 %v817_v28, %v1831_v56  ;;  %v829_v45 = vmul.f32 %v817_v28, %v1842_v4 }
 0x198   :  { %v830_v44 = vmul.f32 %v817_v28, %v1851_v15  ;;  %v831_v48 = vmul.f32 %v817_v28, %v1862_v31  ;;  %v832_v52 = vmul.f32 %v817_v28, %v1871_v51  ;;  %v833_v58 = vmul.f32 %v817_v28, %v1881_v63 }
 0x199   :  { %v834_v3 = vmul.f32 %v817_v28, %v1889_v14  ;;  %v835_v13 = vmul.f32 %v817_v28, %v1899_v34  ;;  %v836_v26 = vmul.f32 %v817_v28, %v1907_v54  ;;  %v837_v39 = vmul.f32 %v817_v28, %v1917_v33 }
 0x19a   :  { %v838_v56 = vmul.f32 %v817_v28, %v2620_v0  ;;  %v839_v4 = vmul.f32 %v817_v28, %v2621_v43  ;;  %v840_v15 = vmul.f32 %v817_v28, %v2622_v41  ;;  %v841_v31 = vmul.f32 %v817_v28, %v1958_v46 }
 0x19b   :  { %v842_v51 = vmul.f32 %v817_v28, %v1971_v19  ;;  %v843_v63 = vmul.f32 %v817_v28, %v1990_v1  ;;  %v844_v14 = vmul.f32 %v817_v28, %v1977_v6  ;;  %v845_v34 = vmul.f32 %v817_v28, %v1986_v62 }
 0x19c   :  { %v846_v54 = vmul.f32 %v817_v28, %v1996_v42  ;;  %v847_v33 = vmul.f32 %v817_v28, %v2008_v38  ;;  %v848_v53 = vmul.f32 %v817_v28, %v2018_v2  ;;  %v849_v11 = vmul.f32 %v817_v28, %v2027_v5 }
 0x19d   :  { %v850_v49 = vmul.f32 %v817_v28, %v2036_v8  ;;  %v851_v46 = vmul.f32 %v817_v28, %v2045_v9  ;;  %v852_v19 = vmul.f32 %v817_v28, %v2054_v30  ;;  %v853_v1 = vmul.f32 %v817_v28, %v2063_v50 }
 0x19e   :  { %v854_v6 = vmul.f32 %v817_v28, %v2072_v29  ;;  %v855_v62 = vmul.f32 %v817_v28, %v2081_v18  ;;  %v856_v42 = vmul.f32 %v817_v28, %v2090_v16  ;;  %v862_v38 = vmul.f32 %v817_v28, %v2139_v22  ;;  %v2626_v29 = vld [vmem:[#allocation6_spill] sm:$0xff]  ;;  %v2627_v18 = vld [vmem:[#allocation7_spill] sm:$0xff]  ;;  %v2628_v16 = vld [vmem:[#allocation8_spill] sm:$0xff] }
 0x19f   :  { %v863_v2 = vmul.f32 %v817_v28, %v2153_v17  ;;  %v864_v5 = vmul.f32 %v817_v28, %v2162_v55  ;;  %v865_v8 = vmul.f32 %v817_v28, %v2171_v40  ;;  %v857_v9 = vmul.f32 %v817_v28, %v2623_v60  ;;  %v2629_v22 = vld [vmem:[#allocation9_spill] sm:$0xff] }
 0x1a0   :  { %v866_v30 = vmul.f32 %v817_v28, %v2624_v36  ;;  %v867_v50 = vmul.f32 %v817_v28, %v2625_v57  ;;  %v872_v35 = vrot.slane %v812_v21, %v816_v32  ;;  %v858_v24 = vmul.f32 %v817_v28, %v2626_v29 }
 0x1a1   :  { %v859_v20 = vmul.f32 %v817_v28, %v2627_v18  ;;  %v860_v0 = vmul.f32 %v817_v28, %v2628_v16  ;;  %v861_v43 = vmul.f32 %v817_v28, %v2629_v22 }
 0x1a2   :  { %v874_v17 = vadd.f32 %v872_v35, %v819_v47  ;;  %v875_v41 = vadd.f32 %v872_v35, %v820_v10  ;;  %v876_v55 = vadd.f32 %v872_v35, %v821_v12  ;;  %v2260_v40 = vadd.f32 %v872_v35, %v822_v59 }
 0x1a3   :  { %v2262_v60 = vadd.f32 %v872_v35, %v823_v27  ;;  %v2264_v36 = vadd.f32 %v872_v35, %v824_v37  ;;  %v2266_v57 = vadd.f32 %v872_v35, %v825_v25  ;;  %v2268_v32 = vadd.f32 %v872_v35, %v826_v61 }
 0x1a4   :  { %v2270_v21 = vadd.f32 %v872_v35, %v827_v23  ;;  %v2272_v29 = vadd.f32 %v872_v35, %v828_v7  ;;  %v2274_v18 = vadd.f32 %v872_v35, %v829_v45  ;;  %v2276_v28 = vadd.f32 %v872_v35, %v830_v44 }
 0x1a5   :  { %v2278_v47 = vadd.f32 %v872_v35, %v831_v48  ;;  %v2280_v10 = vadd.f32 %v872_v35, %v832_v52  ;;  %v2282_v12 = vadd.f32 %v872_v35, %v833_v58  ;;  %v2284_v59 = vadd.f32 %v872_v35, %v834_v3 }
 0x1a6   :  { %v2286_v27 = vadd.f32 %v872_v35, %v835_v13  ;;  %v2288_v37 = vadd.f32 %v872_v35, %v836_v26  ;;  %v2290_v25 = vadd.f32 %v872_v35, %v837_v39  ;;  %v2292_v61 = vadd.f32 %v872_v35, %v838_v56 }
 0x1a7   :  { %v2294_v23 = vadd.f32 %v872_v35, %v839_v4  ;;  %v2296_v7 = vadd.f32 %v872_v35, %v840_v15  ;;  %v2298_v45 = vadd.f32 %v872_v35, %v841_v31  ;;  %v2300_v44 = vadd.f32 %v872_v35, %v842_v51 }
 0x1a8   :  { %v2302_v48 = vadd.f32 %v872_v35, %v843_v63  ;;  %v2304_v52 = vadd.f32 %v872_v35, %v844_v14  ;;  %v2306_v58 = vadd.f32 %v872_v35, %v845_v34  ;;  %v2308_v3 = vadd.f32 %v872_v35, %v846_v54 }
 0x1a9   :  { %v2310_v13 = vadd.f32 %v872_v35, %v847_v33  ;;  %v2312_v26 = vadd.f32 %v872_v35, %v848_v53  ;;  %v2314_v39 = vadd.f32 %v872_v35, %v849_v11  ;;  %v2316_v56 = vadd.f32 %v872_v35, %v850_v49 }
 0x1aa   :  { %v2318_v4 = vadd.f32 %v872_v35, %v851_v46  ;;  %v2320_v15 = vadd.f32 %v872_v35, %v852_v19  ;;  %v2322_v31 = vadd.f32 %v872_v35, %v853_v1  ;;  %v2324_v51 = vadd.f32 %v872_v35, %v854_v6 }
 0x1ab   :  { %v2326_v63 = vadd.f32 %v872_v35, %v855_v62  ;;  %v2328_v14 = vadd.f32 %v872_v35, %v856_v42  ;;  %v2330_v34 = vadd.f32 %v872_v35, %v857_v9  ;;  %v2332_v54 = vadd.f32 %v872_v35, %v858_v24 }
 0x1ac   :  { %v2334_v33 = vadd.f32 %v872_v35, %v859_v20  ;;  %v2336_v53 = vadd.f32 %v872_v35, %v860_v0  ;;  %v2338_v11 = vadd.f32 %v872_v35, %v861_v43  ;;  %v2340_v49 = vadd.f32 %v872_v35, %v862_v38 }
 0x1ad   :  { %v2342_v46 = vadd.f32 %v872_v35, %v863_v2  ;;  %v2344_v19 = vadd.f32 %v872_v35, %v864_v5  ;;  %v2346_v1 = vadd.f32 %v872_v35, %v865_v8  ;;  %v2348_v6 = vadd.f32 %v872_v35, %v866_v30 }
 0x1ae   :  { %v2350_v62 = vadd.f32 %v872_v35, %v867_v50  ;;  %v923_v42 = vmax.f32 %v874_v17, 0.0  ;;  %v924_v9 = vmax.f32 %v875_v41, 0.0  ;;  %v925_v24 = vmax.f32 %v876_v55, 0.0 }
 0x1af   :  { %v926_v20 = vmax.f32 %v2260_v40, 0.0  ;;  %v927_v16 = vmax.f32 %v2262_v60, 0.0  ;;  %v928_v38 = vmax.f32 %v2264_v36, 0.0  ;;  %v929_v2 = vmax.f32 %v2266_v57, 0.0 }
 0x1b0   :  { %v930_v5 = vmax.f32 %v2268_v32, 0.0  ;;  %v931_v8 = vmax.f32 %v2270_v21, 0.0  ;;  %v932_v30 = vmax.f32 %v2272_v29, 0.0  ;;  %v933_v50 = vmax.f32 %v2274_v18, 0.0  ;;  %972 = vst.msk [vmem:[%s2599_s5] sm:$0xff] %vm546_vm2, %v923_v42  ;;  %973 = vst.msk [vmem:[%s2599_s5 + $0x8] sm:$0xff] %vm546_vm2, %v924_v9 }
 0x1b1   :  { %974 = vst.msk [vmem:[%s2599_s5 + $0x10] sm:$0xff] %vm546_vm2, %v925_v24  ;;  %v934_v35 = vmax.f32 %v2276_v28, 0.0  ;;  %v935_v0 = vmax.f32 %v2278_v47, 0.0  ;;  %v936_v22 = vmax.f32 %v2280_v10, 0.0  ;;  %v937_v43 = vmax.f32 %v2282_v12, 0.0  ;;  %975 = vst.msk [vmem:[%s2599_s5 + $0x18] sm:$0xff] %vm546_vm2, %v926_v20 }
 0x1b2   :  { %976 = vst.msk [vmem:[%s2599_s5 + $0x20] sm:$0xff] %vm546_vm2, %v927_v16  ;;  %977 = vst.msk [vmem:[%s2599_s5 + $0x28] sm:$0xff] %vm546_vm2, %v928_v38  ;;  %v938_v17 = vmax.f32 %v2284_v59, 0.0  ;;  %v939_v41 = vmax.f32 %v2286_v27, 0.0  ;;  %v940_v55 = vmax.f32 %v2288_v37, 0.0  ;;  %v941_v40 = vmax.f32 %v2290_v25, 0.0 }
 0x1b3   :  { %978 = vst.msk [vmem:[%s2599_s5 + $0x30] sm:$0xff] %vm546_vm2, %v929_v2  ;;  %979 = vst.msk [vmem:[%s2599_s5 + $0x38] sm:$0xff] %vm546_vm2, %v930_v5  ;;  %v942_v60 = vmax.f32 %v2292_v61, 0.0  ;;  %v943_v36 = vmax.f32 %v2294_v23, 0.0  ;;  %v944_v57 = vmax.f32 %v2296_v7, 0.0  ;;  %v945_v32 = vmax.f32 %v2298_v45, 0.0 }
 0x1b4   :  { %980 = vst.msk [vmem:[%s2599_s5 + $0x40] sm:$0xff] %vm546_vm2, %v931_v8  ;;  %981 = vst.msk [vmem:[%s2599_s5 + $0x48] sm:$0xff] %vm546_vm2, %v932_v30  ;;  %v946_v21 = vmax.f32 %v2300_v44, 0.0  ;;  %v947_v29 = vmax.f32 %v2302_v48, 0.0  ;;  %v948_v18 = vmax.f32 %v2304_v52, 0.0  ;;  %v949_v28 = vmax.f32 %v2306_v58, 0.0 }
 0x1b5   :  { %982 = vst.msk [vmem:[%s2599_s5 + $0x50] sm:$0xff] %vm546_vm2, %v933_v50  ;;  %983 = vst.msk [vmem:[%s2599_s5 + $0x58] sm:$0xff] %vm546_vm2, %v934_v35  ;;  %v950_v47 = vmax.f32 %v2308_v3, 0.0  ;;  %v951_v10 = vmax.f32 %v2310_v13, 0.0  ;;  %v952_v12 = vmax.f32 %v2312_v26, 0.0  ;;  %v953_v59 = vmax.f32 %v2314_v39, 0.0 }
 0x1b6   :  { %984 = vst.msk [vmem:[%s2599_s5 + $0x60] sm:$0xff] %vm546_vm2, %v935_v0  ;;  %985 = vst.msk [vmem:[%s2599_s5 + $0x68] sm:$0xff] %vm546_vm2, %v936_v22  ;;  %v954_v27 = vmax.f32 %v2316_v56, 0.0  ;;  %v955_v37 = vmax.f32 %v2318_v4, 0.0  ;;  %v956_v25 = vmax.f32 %v2320_v15, 0.0  ;;  %v957_v61 = vmax.f32 %v2322_v31, 0.0 }
 0x1b7   :  { %986 = vst.msk [vmem:[%s2599_s5 + $0x70] sm:$0xff] %vm546_vm2, %v937_v43  ;;  %987 = vst.msk [vmem:[%s2599_s5 + $0x78] sm:$0xff] %vm546_vm2, %v938_v17  ;;  %v958_v23 = vmax.f32 %v2324_v51, 0.0  ;;  %v959_v7 = vmax.f32 %v2326_v63, 0.0  ;;  %v960_v45 = vmax.f32 %v2328_v14, 0.0  ;;  %v961_v44 = vmax.f32 %v2330_v34, 0.0 }
 0x1b8   :  { %988 = vst.msk [vmem:[%s2599_s5 + $0x80] sm:$0xff] %vm546_vm2, %v939_v41  ;;  %989 = vst.msk [vmem:[%s2599_s5 + $0x88] sm:$0xff] %vm546_vm2, %v940_v55  ;;  %v962_v48 = vmax.f32 %v2332_v54, 0.0  ;;  %v963_v52 = vmax.f32 %v2334_v33, 0.0  ;;  %v964_v58 = vmax.f32 %v2336_v53, 0.0  ;;  %v965_v3 = vmax.f32 %v2338_v11, 0.0 }
 0x1b9   :  { %990 = vst.msk [vmem:[%s2599_s5 + $0x90] sm:$0xff] %vm546_vm2, %v941_v40  ;;  %991 = vst.msk [vmem:[%s2599_s5 + $0x98] sm:$0xff] %vm546_vm2, %v942_v60  ;;  %v966_v13 = vmax.f32 %v2340_v49, 0.0  ;;  %v967_v26 = vmax.f32 %v2342_v46, 0.0  ;;  %v968_v39 = vmax.f32 %v2344_v19, 0.0  ;;  %v969_v56 = vmax.f32 %v2346_v1, 0.0 }
 0x1ba   :  { %992 = vst.msk [vmem:[%s2599_s5 + $0xa0] sm:$0xff] %vm546_vm2, %v943_v36  ;;  %993 = vst.msk [vmem:[%s2599_s5 + $0xa8] sm:$0xff] %vm546_vm2, %v944_v57  ;;  %v970_v4 = vmax.f32 %v2348_v6, 0.0  ;;  %v971_v15 = vmax.f32 %v2350_v62, 0.0 }
 0x1bb   :  { %994 = vst.msk [vmem:[%s2599_s5 + $0xb0] sm:$0xff] %vm546_vm2, %v945_v32  ;;  %995 = vst.msk [vmem:[%s2599_s5 + $0xb8] sm:$0xff] %vm546_vm2, %v946_v21 }
 0x1bc   :  { %996 = vst.msk [vmem:[%s2599_s5 + $0xc0] sm:$0xff] %vm546_vm2, %v947_v29  ;;  %997 = vst.msk [vmem:[%s2599_s5 + $0xc8] sm:$0xff] %vm546_vm2, %v948_v18 }
 0x1bd   :  { %998 = vst.msk [vmem:[%s2599_s5 + $0xd0] sm:$0xff] %vm546_vm2, %v949_v28  ;;  %999 = vst.msk [vmem:[%s2599_s5 + $0xd8] sm:$0xff] %vm546_vm2, %v950_v47 }
 0x1be   :  { %1000 = vst.msk [vmem:[%s2599_s5 + $0xe0] sm:$0xff] %vm546_vm2, %v951_v10  ;;  %1001 = vst.msk [vmem:[%s2599_s5 + $0xe8] sm:$0xff] %vm546_vm2, %v952_v12 }
 0x1bf   :  { %1002 = vst.msk [vmem:[%s2599_s5 + $0xf0] sm:$0xff] %vm546_vm2, %v953_v59  ;;  %1003 = vst.msk [vmem:[%s2599_s5 + $0xf8] sm:$0xff] %vm546_vm2, %v954_v27 }
 0x1c0   :  { %1004 = vst.msk [vmem:[%s2599_s5 + $0x100] sm:$0xff] %vm546_vm2, %v955_v37  ;;  %1005 = vst.msk [vmem:[%s2599_s5 + $0x108] sm:$0xff] %vm546_vm2, %v956_v25 }
 0x1c1   :  { %1006 = vst.msk [vmem:[%s2599_s5 + $0x110] sm:$0xff] %vm546_vm2, %v957_v61  ;;  %1007 = vst.msk [vmem:[%s2599_s5 + $0x118] sm:$0xff] %vm546_vm2, %v958_v23 }
 0x1c2   :  { %1008 = vst.msk [vmem:[%s2599_s5 + $0x120] sm:$0xff] %vm546_vm2, %v959_v7  ;;  %1009 = vst.msk [vmem:[%s2599_s5 + $0x128] sm:$0xff] %vm546_vm2, %v960_v45 }
 0x1c3   :  { %1010 = vst.msk [vmem:[%s2599_s5 + $0x130] sm:$0xff] %vm546_vm2, %v961_v44  ;;  %1011 = vst.msk [vmem:[%s2599_s5 + $0x138] sm:$0xff] %vm546_vm2, %v962_v48 }
 0x1c4   :  { %1012 = vst.msk [vmem:[%s2599_s5 + $0x140] sm:$0xff] %vm546_vm2, %v963_v52  ;;  %1013 = vst.msk [vmem:[%s2599_s5 + $0x148] sm:$0xff] %vm546_vm2, %v964_v58 }
 0x1c5   :  { %1014 = vst.msk [vmem:[%s2599_s5 + $0x150] sm:$0xff] %vm546_vm2, %v965_v3  ;;  %1015 = vst.msk [vmem:[%s2599_s5 + $0x158] sm:$0xff] %vm546_vm2, %v966_v13 }
 0x1c6   :  { %1016 = vst.msk [vmem:[%s2599_s5 + $0x160] sm:$0xff] %vm546_vm2, %v967_v26  ;;  %1017 = vst.msk [vmem:[%s2599_s5 + $0x168] sm:$0xff] %vm546_vm2, %v968_v39 }
 0x1c7   :  { %1018 = vst.msk [vmem:[%s2599_s5 + $0x170] sm:$0xff] %vm546_vm2, %v969_v56  ;;  %1019 = vst.msk [vmem:[%s2599_s5 + $0x178] sm:$0xff] %vm546_vm2, %v970_v4 }
 0x1c8   :  { %1020 = vst.msk [vmem:[%s2599_s5 + $0x180] sm:$0xff] %vm546_vm2, %v971_v15 }

// kernel: lenet5_forward.7
= control target key start
LH: loop header
LB: loop body
LE: loop exit
PB: predicated region body
PF: predicated region fallthrough
CT: control target
= control target key end

     0   :  { %v697_v0 = vmov 0.0   ;;  %vm96_vm0 = vcmask 179200   ;;  %vm172_vm1 = vcmask 1045504   ;;  %vm366_vm2 = vcmask 130048   ;;  %s1370_s1 = inlined_call_operand.vmem [shape: f32[150,16], index: 1, kind: input, shape index: {}]   ;;  %s1371_s0 = inlined_call_operand.vmem [shape: f32[200,150], index: 0, kind: input, shape index: {}]   ;;  %s1372_s2 = inlined_call_operand.vmem [shape: f32[1,16], index: 2, kind: input, shape index: {}]   ;;  %s1373_s3 = inlined_call_operand.vmem [shape: f32[1,16], index: 3, kind: input, shape index: {}]   ;;  %s1374_s4 = inlined_call_operand.vmem [shape: f32[1,16], index: 4, kind: input, shape index: {}]   ;;  %s1375_s5 = inlined_call_operand.vmem [shape: f32[200,16], index: 5, kind: output, shape index: {}]  }
   0x1   :  { %176 = vmatprep.subr.mxu0 %v697_v0  ;;  %v85_v1 = vld [vmem:[%s1370_s1 + $0x78] sm:$0xff]  ;;  %v84_v2 = vld [vmem:[%s1370_s1 + $0x70] sm:$0xff]  ;;  %656 = vmatprep.subr.mxu1 %v697_v0  ;;  %v83_v3 = vld [vmem:[%s1370_s1 + $0x68] sm:$0xff] }
   0x2   :  { %177 = vmatpush1.msra.mxu0 %v85_v1  ;;  %675 = vmatpush1.msra.mxu1 %v85_v1  ;;  %v82_v4 = vld [vmem:[%s1370_s1 + $0x60] sm:$0xff]  ;;  %v81_v5 = vld [vmem:[%s1370_s1 + $0x58] sm:$0xff]  ;;  %v80_v6 = vld [vmem:[%s1370_s1 + $0x50] sm:$0xff] }
   0x3   :  { %178 = vmatprep.subr.mxu0 %v697_v0  ;;  %657 = vmatprep.subr.mxu1 %v697_v0  ;;  %v21_v7 = vld [vmem:[%s1371_s0 + $0x8] sm:$0xff]  ;;  %v78_v9 = vld [vmem:[%s1370_s1 + $0x40] sm:$0xff]  ;;  %v77_v10 = vld [vmem:[%s1370_s1 + $0x38] sm:$0xff] }
   0x4   :  { %179 = vmatpush1.msra.mxu0 %v84_v2  ;;  %676 = vmatpush1.msra.mxu1 %v84_v2  ;;  %v79_v8 = vld [vmem:[%s1370_s1 + $0x48] sm:$0xff]  ;;  %v76_v11 = vld [vmem:[%s1370_s1 + $0x30] sm:$0xff]  ;;  %v74_v13 = vld [vmem:[%s1370_s1 + $0x20] sm:$0xff] }
   0x5   :  { %180 = vmatprep.subr.mxu0 %v697_v0  ;;  %658 = vmatprep.subr.mxu1 %v697_v0  ;;  %v75_v12 = vld [vmem:[%s1370_s1 + $0x28] sm:$0xff]  ;;  %v73_v14 = vld [vmem:[%s1370_s1 + $0x18] sm:$0xff]  ;;  %v72_v15 = vld [vmem:[%s1370_s1 + $0x10] sm:$0xff] }
   0x6   :  { %181 = vmatpush1.msra.mxu0 %v83_v3  ;;  %677 = vmatpush1.msra.mxu1 %v83_v3  ;;  %v71_v16 = vld [vmem:[%s1370_s1 + $0x8] sm:$0xff]  ;;  %v70_v17 = vld [vmem:[%s1370_s1] sm:$0xff]  ;;  %v88_v18 = vld [vmem:[%s1370_s1 + $0x90] sm:$0x3f] }
   0x7   :  { %182 = vmatprep.subr.mxu0 %v697_v0  ;;  %659 = vmatprep.subr.mxu1 %v697_v0  ;;  %v87_v19 = vld [vmem:[%s1370_s1 + $0x88] sm:$0xff]  ;;  %v86_v20 = vld [vmem:[%s1370_s1 + $0x80] sm:$0xff]  ;;  %v23_v22 = vld [vmem:[%s1371_s0 + $0x18] sm:$0xff] }
   0x8   :  { %183 = vmatpush1.msra.mxu0 %v82_v4  ;;  %678 = vmatpush1.msra.mxu1 %v82_v4  ;;  %v20_v21 = vld [vmem:[%s1371_s0] sm:$0xff]  ;;  %v47_v23 = vld [vmem:[%s1371_s0 + $0xd8] sm:$0xff]  ;;  %v46_v24 = vld [vmem:[%s1371_s0 + $0xd0] sm:$0xff] }
   0x9   :  { %184 = vmatprep.subr.mxu0 %v697_v0  ;;  %660 = vmatprep.subr.mxu1 %v697_v0  ;;  %v49_v25 = vld [vmem:[%s1371_s0 + $0xe8] sm:$0xff]  ;;  %v22_v26 = vld [vmem:[%s1371_s0 + $0x10] sm:$0xff]  ;;  %v48_v28 = vld [vmem:[%s1371_s0 + $0xe0] sm:$0xff] }
   0xa   :  { %185 = vmatpush1.msra.mxu0 %v81_v5  ;;  %679 = vmatpush1.msra.mxu1 %v81_v5  ;;  %v25_v27 = vld [vmem:[%s1371_s0 + $0x28] sm:$0xff]  ;;  %v51_v29 = vld [vmem:[%s1371_s0 + $0xf8] sm:$0xff]  ;;  %v24_v30 = vld [vmem:[%s1371_s0 + $0x20] sm:$0xff] }
   0xb   :  { %186 = vmatprep.subr.mxu0 %v697_v0  ;;  %661 = vmatprep.subr.mxu1 %v697_v0  ;;  %v27_v31 = vld [vmem:[%s1371_s0 + $0x38] sm:$0xff]  ;;  %v50_v32 = vld [vmem:[%s1371_s0 + $0xf0] sm:$0xff]  ;;  %v53_v33 = vld [vmem:[%s1371_s0 + $0x108] sm:$0xff] }
   0xc   :  { %187 = vmatpush1.msra.mxu0 %v80_v6  ;;  %680 = vmatpush1.msra.mxu1 %v80_v6  ;;  %v26_v34 = vld [vmem:[%s1371_s0 + $0x30] sm:$0xff]  ;;  %v29_v35 = vld [vmem:[%s1371_s0 + $0x48] sm:$0xff]  ;;  %v52_v36 = vld [vmem:[%s1371_s0 + $0x100] sm:$0xff] }
   0xd   :  { %188 = vmatprep.subr.mxu0 %v697_v0  ;;  %631 = vmatprep.mubr.msk.f32.mxu0 %vm96_vm0, %v21_v7  ;;  %v55_v37 = vld [vmem:[%s1371_s0 + $0x118] sm:$0xff]  ;;  %v28_v38 = vld [vmem:[%s1371_s0 + $0x40] sm:$0xff]  ;;  %v54_v40 = vld [vmem:[%s1371_s0 + $0x110] sm:$0xff] }
   0xe   :  { %189 = vmatpush1.msra.mxu0 %v79_v8  ;;  %662 = vmatprep.subr.mxu1 %v697_v0  ;;  %v31_v39 = vld [vmem:[%s1371_s0 + $0x58] sm:$0xff]  ;;  %v57_v41 = vld [vmem:[%s1371_s0 + $0x128] sm:$0xff]  ;;  %v30_v42 = vld [vmem:[%s1371_s0 + $0x50] sm:$0xff] }
   0xf   :  { %190 = vmatprep.subr.mxu0 %v697_v0  ;;  %681 = vmatpush1.msra.mxu1 %v79_v8  ;;  %v33_v43 = vld [vmem:[%s1371_s0 + $0x68] sm:$0xff]  ;;  %v56_v44 = vld [vmem:[%s1371_s0 + $0x120] sm:$0xff]  ;;  %v59_v45 = vld [vmem:[%s1371_s0 + $0x138] sm:$0xff] }
  0x10   :  { %191 = vmatpush1.msra.mxu0 %v78_v9  ;;  %663 = vmatprep.subr.mxu1 %v697_v0  ;;  %v32_v46 = vld [vmem:[%s1371_s0 + $0x60] sm:$0xff]  ;;  %v35_v47 = vld [vmem:[%s1371_s0 + $0x78] sm:$0xff]  ;;  %v58_v48 = vld [vmem:[%s1371_s0 + $0x130] sm:$0xff] }
  0x11   :  { %192 = vmatprep.subr.mxu0 %v697_v0  ;;  %682 = vmatpush1.msra.mxu1 %v78_v9  ;;  %v61_v49 = vld [vmem:[%s1371_s0 + $0x148] sm:$0xff]  ;;  %v34_v50 = vld [vmem:[%s1371_s0 + $0x70] sm:$0xff]  ;;  %v60_v52 = vld [vmem:[%s1371_s0 + $0x140] sm:$0xff] }
  0x12   :  { %193 = vmatpush1.msra.mxu0 %v77_v10  ;;  %664 = vmatprep.subr.mxu1 %v697_v0  ;;  %v37_v51 = vld [vmem:[%s1371_s0 + $0x88] sm:$0xff]  ;;  %v63_v53 = vld [vmem:[%s1371_s0 + $0x158] sm:$0xff]  ;;  %v36_v54 = vld [vmem:[%s1371_s0 + $0x80] sm:$0xff] }
  0x13   :  { %194 = vmatprep.subr.mxu0 %v697_v0  ;;  %683 = vmatpush1.msra.mxu1 %v77_v10  ;;  %v39_v55 = vld [vmem:[%s1371_s0 + $0x98] sm:$0xff]  ;;  %v62_v56 = vld [vmem:[%s1371_s0 + $0x150] sm:$0xff]  ;;  %v65_v57 = vld [vmem:[%s1371_s0 + $0x168] sm:$0xff] }
  0x14   :  { %195 = vmatpush1.msra.mxu0 %v76_v11  ;;  %665 = vmatprep.subr.mxu1 %v697_v0  ;;  %v38_v58 = vld [vmem:[%s1371_s0 + $0x90] sm:$0xff]  ;;  %v41_v59 = vld [vmem:[%s1371_s0 + $0xa8] sm:$0xff]  ;;  %v64_v60 = vld [vmem:[%s1371_s0 + $0x160] sm:$0xff] }
  0x15   :  { %196 = vmatprep.subr.mxu0 %v697_v0  ;;  %684 = vmatpush1.msra.mxu1 %v76_v11  ;;  %v67_v61 = vld [vmem:[%s1371_s0 + $0x178] sm:$0xff]  ;;  %v40_v62 = vld [vmem:[%s1371_s0 + $0xa0] sm:$0xff]  ;;  %v69_v1 = vld [vmem:[%s1371_s0 + $0x188] sm:$0xff] }
  0x16   :  { %197 = vmatpush1.msra.mxu0 %v75_v12  ;;  %666 = vmatprep.subr.mxu1 %v697_v0  ;;  %v43_v63 = vld [vmem:[%s1371_s0 + $0xb8] sm:$0xff]  ;;  %v42_v2 = vld [vmem:[%s1371_s0 + $0xb0] sm:$0xff]  ;;  %v45_v3 = vld [vmem:[%s1371_s0 + $0xc8] sm:$0xff] }
  0x17   :  { %198 = vmatprep.subr.mxu0 %v697_v0  ;;  %685 = vmatpush1.msra.mxu1 %v75_v12  ;;  %v68_v4 = vld [vmem:[%s1371_s0 + $0x180] sm:$0xff] }
  0x18   :  { %199 = vmatpush1.msra.mxu0 %v74_v13  ;;  %667 = vmatprep.subr.mxu1 %v697_v0  ;;  %v44_v5 = vld [vmem:[%s1371_s0 + $0xc0] sm:$0xff] }
  0x19   :  { %200 = vmatprep.subr.mxu0 %v697_v0  ;;  %686 = vmatpush1.msra.mxu1 %v74_v13 }
  0x1a   :  { %201 = vmatpush1.msra.mxu0 %v73_v14  ;;  %668 = vmatprep.subr.mxu1 %v697_v0 }
  0x1b   :  { %202 = vmatprep.subr.mxu0 %v697_v0  ;;  %687 = vmatpush1.msra.mxu1 %v73_v14 }
  0x1c   :  { %203 = vmatpush1.msra.mxu0 %v72_v15  ;;  %669 = vmatprep.subr.mxu1 %v697_v0 }
  0x1d   :  { %204 = vmatprep.subr.mxu0 %v697_v0  ;;  %688 = vmatpush1.msra.mxu1 %v72_v15 }
  0x1e   :  { %205 = vmatpush1.msra.mxu0 %v71_v16  ;;  %670 = vmatprep.subr.mxu1 %v697_v0 }
  0x1f   :  { %206 = vmatprep.subr.mxu0 %v697_v0  ;;  %689 = vmatpush1.msra.mxu1 %v71_v16 }
  0x20   :  { %207 = vmatpush1.msra.mxu0 %v70_v17  ;;  %671 = vmatprep.subr.mxu1 %v697_v0 }
  0x21   :  { %234 = vmatprep.subr.mxu0 %v697_v0  ;;  %690 = vmatpush1.msra.mxu1 %v70_v17 }
  0x22   :  { %630 = vmatpush2.msk.msra.mxu0 %vm172_vm1, %v88_v18  ;;  %672 = vmatprep.subr.mxu1 %v697_v0 }
  0x23   :  { %236 = vmatprep.subr.mxu0 %v697_v0  ;;  %691 = vmatpush2.msk.msra.mxu1 %vm172_vm1, %v88_v18 }
  0x24   :  { %237 = vmatpush2.msra.mxu0 %v87_v19  ;;  %673 = vmatprep.subr.mxu1 %v697_v0 }
  0x25   :  { %238 = vmatprep.subr.mxu0 %v697_v0  ;;  %692 = vmatpush2.msra.mxu1 %v87_v19 }
  0x26   :  { %239 = vmatpush2.msra.mxu0 %v86_v20  ;;  %674 = vmatprep.subr.mxu1 %v697_v0  ;;  %v66_v0 = vld [vmem:[%s1371_s0 + $0x170] sm:$0xff] }
  0x27   :  { %241 = vmatmul.mubr.f32.vlgmr.msra.gmra.mxu0 %v20_v21  ;;  %693 = vmatpush2.msra.mxu1 %v86_v20 }
  0x28   :  { %632 = vmatprep.mubr.msk.f32.mxu0 %vm96_vm0, %v23_v22  ;;  %644 = vmatprep.mubr.msk.f32.mxu1 %vm96_vm0, %v47_v23 }
  0x29   :  { %306 = vmatmul.mubr.f32.vlgmr.msra.gmra.mxu1 %v46_v24 }
  0x2a   :  { %645 = vmatprep.mubr.msk.f32.mxu1 %vm96_vm0, %v49_v25  ;;  %v1011_v25 = vld [vmem:[%s1372_s2] ss:$0 sm:$0xff] }
  0x2b   :  { %246 = vmatmul.mubr.f32.gmra.mxu0 %v22_v26 }
  0x2c   :  { %633 = vmatprep.mubr.msk.f32.mxu0 %vm96_vm0, %v25_v27 }
  0x2d   :  { %311 = vmatmul.mubr.f32.gmra.mxu1 %v48_v28 }
  0x2e   :  { %646 = vmatprep.mubr.msk.f32.mxu1 %vm96_vm0, %v51_v29 }
  0x2f   :  { %251 = vmatmul.mubr.f32.gmra.mxu0 %v24_v30 }
  0x30   :  { %634 = vmatprep.mubr.msk.f32.mxu0 %vm96_vm0, %v27_v31 }
  0x31   :  { %316 = vmatmul.mubr.f32.gmra.mxu1 %v50_v32 }
  0x32   :  { %647 = vmatprep.mubr.msk.f32.mxu1 %vm96_vm0, %v53_v33 }
  0x33   :  { %256 = vmatmul.mubr.f32.gmra.mxu0 %v26_v34 }
  0x34   :  { %635 = vmatprep.mubr.msk.f32.mxu0 %vm96_vm0, %v29_v35 }
  0x35   :  { %321 = vmatmul.mubr.f32.gmra.mxu1 %v52_v36 }
  0x36   :  { %648 = vmatprep.mubr.msk.f32.mxu1 %vm96_vm0, %v55_v37 }
  0x37   :  { %261 = vmatmul.mubr.f32.gmra.mxu0 %v28_v38 }
  0x38   :  { %636 = vmatprep.mubr.msk.f32.mxu0 %vm96_vm0, %v31_v39 }
  0x39   :  { %326 = vmatmul.mubr.f32.gmra.mxu1 %v54_v40 }
  0x3a   :  { %649 = vmatprep.mubr.msk.f32.mxu1 %vm96_vm0, %v57_v41 }
  0x3b   :  { %266 = vmatmul.mubr.f32.gmra.mxu0 %v30_v42 }
  0x3c   :  { %637 = vmatprep.mubr.msk.f32.mxu0 %vm96_vm0, %v33_v43 }
  0x3d   :  { %331 = vmatmul.mubr.f32.gmra.mxu1 %v56_v44 }
  0x3e   :  { %650 = vmatprep.mubr.msk.f32.mxu1 %vm96_vm0, %v59_v45 }
  0x3f   :  { %271 = vmatmul.mubr.f32.gmra.mxu0 %v32_v46 }
  0x40   :  { %638 = vmatprep.mubr.msk.f32.mxu0 %vm96_vm0, %v35_v47 }
  0x41   :  { %336 = vmatmul.mubr.f32.gmra.mxu1 %v58_v48 }
  0x42   :  { %651 = vmatprep.mubr.msk.f32.mxu1 %vm96_vm0, %v61_v49 }
  0x43   :  { %276 = vmatmul.mubr.f32.gmra.mxu0 %v34_v50 }
  0x44   :  { %639 = vmatprep.mubr.msk.f32.mxu0 %vm96_vm0, %v37_v51 }
  0x45   :  { %341 = vmatmul.mubr.f32.gmra.mxu1 %v60_v52 }
  0x46   :  { %652 = vmatprep.mubr.msk.f32.mxu1 %vm96_vm0, %v63_v53 }
  0x47   :  { %281 = vmatmul.mubr.f32.gmra.mxu0 %v36_v54 }
  0x48   :  { %640 = vmatprep.mubr.msk.f32.mxu0 %vm96_vm0, %v39_v55 }
  0x49   :  { %346 = vmatmul.mubr.f32.gmra.mxu1 %v62_v56 }
  0x4a   :  { %653 = vmatprep.mubr.msk.f32.mxu1 %vm96_vm0, %v65_v57 }
  0x4b   :  { %286 = vmatmul.mubr.f32.gmra.mxu0 %v38_v58 }
  0x4c   :  { %641 = vmatprep.mubr.msk.f32.mxu0 %vm96_vm0, %v41_v59 }
  0x4d   :  { %351 = vmatmul.mubr.f32.gmra.mxu1 %v64_v60 }
  0x4e   :  { %654 = vmatprep.mubr.msk.f32.mxu1 %vm96_vm0, %v67_v61 }
  0x4f   :  { %291 = vmatmul.mubr.f32.gmra.mxu0 %v40_v62 }
  0x50   :  { %642 = vmatprep.mubr.msk.f32.mxu0 %vm96_vm0, %v43_v63 }
  0x51   :  { %356 = vmatmul.mubr.f32.gmra.mxu1 %v66_v0 }
  0x52   :  { %655 = vmatprep.mubr.msk.f32.mxu1 %vm96_vm0, %v69_v1 }
  0x53   :  { %296 = vmatmul.mubr.f32.gmra.mxu0 %v42_v2 }
  0x54   :  { %643 = vmatprep.mubr.msk.f32.mxu0 %vm96_vm0, %v45_v3 }
  0x55   :  { %361 = vmatmul.mubr.f32.gmra.mxu1 %v68_v4 }
  0x57   :  { %301 = vmatmul.mubr.f32.gmra.mxu0 %v44_v5 }
  0xe7   :  { %v242_v6 = vpop.f32.mrf.mxu0 }
  0xe8   :  { %v1017_v29 = vadd.f32 %v1011_v25, %v242_v6 }
  0xe9   :  { %v244_v7 = vpop.f32.mrf.mxu0  ;;  %v998_v8 = vpop.f32.mrf.mxu1 }
  0xea   :  { %v423_v37 = vmul.f32 %v1017_v29, %v1017_v29  ;;  %v367_v43 = vsel %vm366_vm2, %v1017_v29, 0.0 }
  0xeb   :  { %v247_v9 = vpop.f32.mrf.mxu0  ;;  %v309_v10 = vpop.f32.mrf.mxu1 }
  0xec   :  { %v1014_v28 = vadd.f32 %v1011_v25, %v247_v9  ;;  %v448_v50 = vsel %vm366_vm2, %v423_v37, 0.0 }
  0xed   :  { %v249_v11 = vpop.f32.mrf.mxu0  ;;  %v1000_v12 = vpop.f32.mrf.mxu1 }
  0xee   :  { %v424_v35 = vmul.f32 %v1014_v28, %v1014_v28  ;;  %v368_v40 = vsel %vm366_vm2, %v1014_v28, 0.0 }
  0xef   :  { %v252_v13 = vpop.f32.mrf.mxu0  ;;  %v314_v14 = vpop.f32.mrf.mxu1  ;;  %v369_v51 = vadd.f32 %v368_v40, %v367_v43 }
  0xf0   :  { %v1022_v32 = vadd.f32 %v1011_v25, %v252_v13  ;;  %v449_v46 = vsel %vm366_vm2, %v424_v35, 0.0 }
  0xf1   :  { %v254_v15 = vpop.f32.mrf.mxu0  ;;  %v1002_v16 = vpop.f32.mrf.mxu1  ;;  %v450_v58 = vadd.f32 %v449_v46, %v448_v50 }
  0xf2   :  { %v425_v41 = vmul.f32 %v1022_v32, %v1022_v32  ;;  %v370_v47 = vsel %vm366_vm2, %v1022_v32, 0.0 }
  0xf3   :  { %v257_v17 = vpop.f32.mrf.mxu0  ;;  %v319_v18 = vpop.f32.mrf.mxu1  ;;  %v371_v59 = vadd.f32 %v370_v47, %v369_v51 }
  0xf4   :  { %v1027_v36 = vadd.f32 %v1011_v25, %v257_v17  ;;  %v451_v54 = vsel %vm366_vm2, %v425_v41, 0.0 }
  0xf5   :  { %v259_v19 = vpop.f32.mrf.mxu0  ;;  %v1004_v20 = vpop.f32.mrf.mxu1  ;;  %v452_v2 = vadd.f32 %v451_v54, %v450_v58 }
  0xf6   :  { %v426_v48 = vmul.f32 %v1027_v36, %v1027_v36  ;;  %v372_v55 = vsel %vm366_vm2, %v1027_v36, 0.0 }
  0xf7   :  { %v262_v21 = vpop.f32.mrf.mxu0  ;;  %v324_v22 = vpop.f32.mrf.mxu1  ;;  %v373_v3 = vadd.f32 %v372_v55, %v371_v59 }
  0xf8   :  { %v1038_v42 = vadd.f32 %v1011_v25, %v262_v21  ;;  %v453_v62 = vsel %vm366_vm2, %v426_v48, 0.0 }
  0xf9   :  { %v264_v23 = vpop.f32.mrf.mxu0  ;;  %v1006_v24 = vpop.f32.mrf.mxu1  ;;  %v454_v11 = vadd.f32 %v453_v62, %v452_v2 }
  0xfa   :  { %v427_v56 = vmul.f32 %v1038_v42, %v1038_v42  ;;  %v374_v63 = vsel %vm366_vm2, %v1038_v42, 0.0 }
  0xfb   :  { %v267_v26 = vpop.f32.mrf.mxu0  ;;  %v329_v27 = vpop.f32.mrf.mxu1  ;;  %v375_v13 = vadd.f32 %v374_v63, %v373_v3 }
  0xfc   :  { %v1048_v49 = vadd.f32 %v1011_v25, %v267_v26  ;;  %v455_v6 = vsel %vm366_vm2, %v427_v56, 0.0 }
  0xfd   :  { %v269_v30 = vpop.f32.mrf.mxu0  ;;  %v1019_v31 = vpop.f32.mrf.mxu1  ;;  %v456_v22 = vadd.f32 %v455_v6, %v454_v11 }
  0xfe   :  { %v428_v0 = vmul.f32 %v1048_v49, %v1048_v49  ;;  %v376_v7 = vsel %vm366_vm2, %v1048_v49, 0.0 }
  0xff   :  { %v272_v33 = vpop.f32.mrf.mxu0  ;;  %v334_v34 = vpop.f32.mrf.mxu1  ;;  %v377_v23 = vadd.f32 %v376_v7, %v375_v13 }
 0x100   :  { %v1059_v57 = vadd.f32 %v1011_v25, %v272_v33  ;;  %v457_v17 = vsel %vm366_vm2, %v428_v0, 0.0 }
 0x101   :  { %v274_v38 = vpop.f32.mrf.mxu0  ;;  %v1031_v39 = vpop.f32.mrf.mxu1  ;;  %v458_v35 = vadd.f32 %v457_v17, %v456_v22  ;;  %v1128_v17 = vadd.f32 %v1011_v25, %v1000_v12 }
 0x102   :  { %v429_v9 = vmul.f32 %v1059_v57, %v1059_v57  ;;  %v378_v18 = vsel %vm366_vm2, %v1059_v57, 0.0 }
 0x103   :  { %v277_v44 = vpop.f32.mrf.mxu0  ;;  %v339_v45 = vpop.f32.mrf.mxu1  ;;  %v379_v37 = vadd.f32 %v378_v18, %v377_v23 }
 0x104   :  { %v1067_v1 = vadd.f32 %v1011_v25, %v277_v44  ;;  %v459_v30 = vsel %vm366_vm2, %v429_v9, 0.0 }
 0x105   :  { %v279_v52 = vpop.f32.mrf.mxu0  ;;  %v1051_v53 = vpop.f32.mrf.mxu1  ;;  %v460_v46 = vadd.f32 %v459_v30, %v458_v35  ;;  %v1138_v30 = vadd.f32 %v1011_v25, %v1002_v16 }
 0x106   :  { %v430_v19 = vmul.f32 %v1067_v1, %v1067_v1  ;;  %v380_v33 = vsel %vm366_vm2, %v1067_v1, 0.0 }
 0x107   :  { %v282_v60 = vpop.f32.mrf.mxu0  ;;  %v344_v61 = vpop.f32.mrf.mxu1  ;;  %v381_v47 = vadd.f32 %v380_v33, %v379_v37 }
 0x108   :  { %v1077_v10 = vadd.f32 %v1011_v25, %v282_v60  ;;  %v461_v41 = vsel %vm366_vm2, %v430_v19, 0.0 }
 0x109   :  { %v284_v4 = vpop.f32.mrf.mxu0  ;;  %v1069_v5 = vpop.f32.mrf.mxu1  ;;  %v462_v55 = vadd.f32 %v461_v41, %v460_v46  ;;  %v394_v46 = vsel %vm366_vm2, %v1128_v17, 0.0 }
 0x10a   :  { %v431_v34 = vmul.f32 %v1077_v10, %v1077_v10  ;;  %v382_v43 = vsel %vm366_vm2, %v1077_v10, 0.0  ;;  %v1119_v4 = vadd.f32 %v1011_v25, %v998_v8 }
 0x10b   :  { %v287_v14 = vpop.f32.mrf.mxu0  ;;  %v349_v15 = vpop.f32.mrf.mxu1  ;;  %v383_v56 = vadd.f32 %v382_v43, %v381_v47  ;;  %v438_v47 = vmul.f32 %v1138_v30, %v1138_v30 }
 0x10c   :  { %v1085_v21 = vadd.f32 %v1011_v25, %v287_v14  ;;  %v463_v51 = vsel %vm366_vm2, %v431_v34, 0.0  ;;  %v392_v37 = vsel %vm366_vm2, %v1119_v4, 0.0 }
 0x10d   :  { %v289_v26 = vpop.f32.mrf.mxu0  ;;  %v1087_v27 = vpop.f32.mrf.mxu1  ;;  %v464_v63 = vadd.f32 %v463_v51, %v462_v55 }
 0x10e   :  { %v432_v44 = vmul.f32 %v1085_v21, %v1085_v21  ;;  %v384_v52 = vsel %vm366_vm2, %v1085_v21, 0.0  ;;  %v436_v26 = vmul.f32 %v1119_v4, %v1119_v4 }
 0x10f   :  { %v292_v38 = vpop.f32.mrf.mxu0  ;;  %v354_v40 = vpop.f32.mrf.mxu1  ;;  %v385_v0 = vadd.f32 %v384_v52, %v383_v56  ;;  %v1169_v56 = vadd.f32 %v1011_v25, %v1019_v31 }
 0x110   :  { %v1100_v45 = vadd.f32 %v1011_v25, %v292_v38  ;;  %v465_v60 = vsel %vm366_vm2, %v432_v44, 0.0  ;;  %v437_v38 = vmul.f32 %v1128_v17, %v1128_v17  ;;  %v1150_v40 = vadd.f32 %v1011_v25, %v1004_v20 }
 0x111   :  { %v294_v48 = vpop.f32.mrf.mxu0  ;;  %v1102_v50 = vpop.f32.mrf.mxu1  ;;  %v466_v11 = vadd.f32 %v465_v60, %v464_v63  ;;  %v473_v44 = vsel %vm366_vm2, %v436_v26, 0.0  ;;  %v477_v60 = vsel %vm366_vm2, %v438_v47, 0.0 }
 0x112   :  { %v433_v54 = vmul.f32 %v1100_v45, %v1100_v45  ;;  %v386_v61 = vsel %vm366_vm2, %v1100_v45, 0.0  ;;  %v1160_v48 = vadd.f32 %v1011_v25, %v1006_v24  ;;  %v475_v20 = vsel %vm366_vm2, %v437_v38, 0.0 }
 0x113   :  { %v297_v58 = vpop.f32.mrf.mxu0  ;;  %v359_v59 = vpop.f32.mrf.mxu1  ;;  %v387_v13 = vadd.f32 %v386_v61, %v385_v0  ;;  %v439_v55 = vmul.f32 %v1150_v40, %v1150_v40  ;;  %v1173_v24 = vadd.f32 %v1011_v25, %v1031_v39  ;;  %v398_v61 = vsel %vm366_vm2, %v1150_v40, 0.0 }
 0x114   :  { %v1113_v62 = vadd.f32 %v1011_v25, %v297_v58  ;;  %v467_v6 = vsel %vm366_vm2, %v433_v54, 0.0  ;;  %v396_v54 = vsel %vm366_vm2, %v1138_v30, 0.0  ;;  %v440_v63 = vmul.f32 %v1160_v48, %v1160_v48 }
 0x115   :  { %v299_v2 = vpop.f32.mrf.mxu0  ;;  %v1115_v3 = vpop.f32.mrf.mxu1  ;;  %v468_v19 = vadd.f32 %v467_v6, %v466_v11  ;;  %v479_v6 = vsel %vm366_vm2, %v439_v55, 0.0  ;;  %v400_v31 = vsel %vm366_vm2, %v1160_v48, 0.0  ;;  %v1187_v39 = vadd.f32 %v1011_v25, %v1051_v53 }
 0x116   :  { %v388_v7 = vsel %vm366_vm2, %v1113_v62, 0.0  ;;  %v434_v9 = vmul.f32 %v1113_v62, %v1113_v62  ;;  %v442_v11 = vmul.f32 %v1173_v24, %v1173_v24  ;;  %v404_v53 = vsel %vm366_vm2, %v1173_v24, 0.0 }
 0x117   :  { %v302_v14 = vpop.f32.mrf.mxu0  ;;  %v364_v15 = vpop.f32.mrf.mxu1  ;;  %v389_v22 = vadd.f32 %v388_v7, %v387_v13  ;;  %v441_v7 = vmul.f32 %v1169_v56, %v1169_v56  ;;  %v443_v26 = vmul.f32 %v1187_v39, %v1187_v39  ;;  %v1214_v38 = vadd.f32 %v1011_v25, %v1102_v50 }
 0x118   :  { %v469_v18 = vsel %vm366_vm2, %v434_v9, 0.0  ;;  %v1132_v8 = vadd.f32 %v1011_v25, %v302_v14  ;;  %v481_v14 = vsel %vm366_vm2, %v440_v63, 0.0  ;;  %v402_v15 = vsel %vm366_vm2, %v1169_v56, 0.0 }
 0x119   :  { %v304_v23 = vpop.f32.mrf.mxu0  ;;  %v470_v34 = vadd.f32 %v469_v18, %v468_v19  ;;  %v1196_v18 = vadd.f32 %v1011_v25, %v1069_v5  ;;  %v406_v5 = vsel %vm366_vm2, %v1187_v39, 0.0 }
 0x11a   :  { %v390_v33 = vsel %vm366_vm2, %v1132_v8, 0.0  ;;  %v435_v12 = vmul.f32 %v1132_v8, %v1132_v8  ;;  %v483_v23 = vsel %vm366_vm2, %v441_v7, 0.0 }
 0x11b   :  { %v391_v35 = vadd.f32 %v390_v33, %v389_v22  ;;  %v1205_v33 = vadd.f32 %v1011_v25, %v1087_v27 }
 0x11c   :  { %v471_v16 = vsel %vm366_vm2, %v435_v12, 0.0 }
 0x11d   :  { %v393_v41 = vadd.f32 %v392_v37, %v391_v35  ;;  %v472_v43 = vadd.f32 %v471_v16, %v470_v34  ;;  %v485_v35 = vsel %vm366_vm2, %v442_v11, 0.0  ;;  %v444_v37 = vmul.f32 %v1196_v18, %v1196_v18 }
 0x11e   :  { %v1218_v16 = vadd.f32 %v1011_v25, %v1115_v3  ;;  %v410_v50 = vsel %vm366_vm2, %v1205_v33, 0.0  ;;  %v446_v25 = vmul.f32 %v1214_v38, %v1214_v38 }
 0x11f   :  { %v395_v51 = vadd.f32 %v394_v46, %v393_v41  ;;  %v474_v52 = vadd.f32 %v473_v44, %v472_v43  ;;  %v487_v43 = vsel %vm366_vm2, %v443_v26, 0.0  ;;  %v408_v44 = vsel %vm366_vm2, %v1196_v18, 0.0 }
 0x120   :  { %v445_v46 = vmul.f32 %v1205_v33, %v1205_v33  ;;  %v447_v3 = vmul.f32 %v1218_v16, %v1218_v16  ;;  %v493_v63 = vsel %vm366_vm2, %v446_v25, 0.0 }
 0x121   :  { %v397_v58 = vadd.f32 %v396_v54, %v395_v51  ;;  %v476_v59 = vadd.f32 %v475_v20, %v474_v52  ;;  %v489_v52 = vsel %vm366_vm2, %v444_v37, 0.0 }
 0x122   :  { %v491_v55 = vsel %vm366_vm2, %v445_v46, 0.0 }
 0x123   :  { %v478_v0 = vadd.f32 %v477_v60, %v476_v59  ;;  %v399_v2 = vadd.f32 %v398_v61, %v397_v58  ;;  %v412_v58 = vsel %vm366_vm2, %v1214_v38, 0.0  ;;  %v414_v59 = vsel %vm366_vm2, %v1218_v16, 0.0 }
 0x125   :  { %v401_v9 = vadd.f32 %v400_v31, %v399_v2  ;;  %v480_v13 = vadd.f32 %v479_v6, %v478_v0  ;;  %v495_v0 = vsel %vm366_vm2, %v447_v3, 0.0 }
 0x127   :  { %v403_v19 = vadd.f32 %v402_v15, %v401_v9  ;;  %v482_v22 = vadd.f32 %v481_v14, %v480_v13 }
 0x129   :  { %v405_v12 = vadd.f32 %v404_v53, %v403_v19  ;;  %v484_v34 = vadd.f32 %v483_v23, %v482_v22 }
 0x12b   :  { %v486_v27 = vadd.f32 %v485_v35, %v484_v34  ;;  %v407_v41 = vadd.f32 %v406_v5, %v405_v12 }
 0x12d   :  { %v488_v47 = vadd.f32 %v487_v43, %v486_v27  ;;  %v409_v51 = vadd.f32 %v408_v44, %v407_v41  ;;  %v514_v41 = vlaneseq  ;;  %v506_v44 = vld [vmem:[%s1373_s3] sm:$0x1] }
 0x12f   :  { %v490_v20 = vadd.f32 %v489_v52, %v488_v47  ;;  %v411_v54 = vadd.f32 %v410_v50, %v409_v51  ;;  %v515_v43 = vshrl.u32 %v514_v41, 7  ;;  %v510_v52 = vld [vmem:[%s1374_s4] sm:$0x1] }
 0x131   :  { %v492_v60 = vadd.f32 %v491_v55, %v490_v20  ;;  %v413_v61 = vadd.f32 %v412_v58, %v411_v54  ;;  %v516_v46 = vsub.s32 0, %v515_v43 }
 0x133   :  { %v494_v2 = vadd.f32 %v493_v63, %v492_v60  ;;  %v415_v6 = vadd.f32 %v414_v59, %v413_v61 }
 0x135   :  { %v416_v31 = vrot.slane %v415_v6, 4  ;;  %v496_v7 = vadd.f32 %v495_v0, %v494_v2 }
 0x137   :  { %v417_v9 = vadd.f32 %v416_v31, %v415_v6  ;;  %v497_v11 = vrot.slane %v496_v7, 4 }
 0x139   :  { %v418_v13 = vrot.slane %v417_v9, 2  ;;  %v498_v14 = vadd.f32 %v497_v11, %v496_v7 }
 0x13b   :  { %v419_v15 = vadd.f32 %v418_v13, %v417_v9  ;;  %v499_v19 = vrot.slane %v498_v14, 2 }
 0x13d   :  { %v420_v22 = vrot.slane %v419_v15, 1  ;;  %v500_v23 = vadd.f32 %v499_v19, %v498_v14 }
 0x13f   :  { %v421_v53 = vadd.f32 %v420_v22, %v419_v15  ;;  %v501_v26 = vrot.slane %v500_v23, 1 }
 0x141   :  { %v422_v12 = vmul.f32 0.005, %v421_v53  ;;  %v502_v34 = vadd.f32 %v501_v26, %v500_v23 }
 0x143   :  { %v503_v35 = vmul.f32 0.005, %v502_v34  ;;  %v504_v5 = vmul.f32 %v422_v12, %v422_v12 }
 0x145   :  { %v505_v37 = vsub.f32 %v503_v35, %v504_v5 }
 0x147   :  { %v507_v27 = vadd.f32 1e-05, %v505_v37 }
 0x149   :  { %695 = vrsqrt.f32 %v507_v27 }
 0x156   :  { %v696_v47 = vpop.eup %695 }
 0x157   :  { %v509_v51 = vmul.f32 %v696_v47, %v506_v44 }
 0x159   :  { %v511_v50 = vmul.f32 %v509_v51, %v422_v12  ;;  %v517_v25 = vrot.slane %v509_v51, %v516_v46 }
 0x15b   :  { %v512_v3 = vsub.f32 %v510_v52, %v511_v50  ;;  %v519_v20 = vmul.f32 %v517_v25, %v1017_v29  ;;  %v520_v54 = vmul.f32 %v517_v25, %v1014_v28  ;;  %v521_v55 = vmul.f32 %v517_v25, %v1022_v32 }
 0x15c   :  { %v522_v58 = vmul.f32 %v517_v25, %v1027_v36  ;;  %v523_v59 = vmul.f32 %v517_v25, %v1038_v42  ;;  %v524_v60 = vmul.f32 %v517_v25, %v1048_v49  ;;  %v525_v61 = vmul.f32 %v517_v25, %v1059_v57 }
 0x15d   :  { %v526_v63 = vmul.f32 %v517_v25, %v1067_v1  ;;  %v527_v0 = vmul.f32 %v517_v25, %v1077_v10  ;;  %v528_v2 = vmul.f32 %v517_v25, %v1085_v21  ;;  %v529_v29 = vmul.f32 %v517_v25, %v1100_v45 }
 0x15e   :  { %v530_v28 = vmul.f32 %v517_v25, %v1113_v62  ;;  %v531_v32 = vmul.f32 %v517_v25, %v1132_v8  ;;  %v532_v36 = vmul.f32 %v517_v25, %v1119_v4  ;;  %v533_v42 = vmul.f32 %v517_v25, %v1128_v17 }
 0x15f   :  { %v534_v49 = vmul.f32 %v517_v25, %v1138_v30  ;;  %v535_v57 = vmul.f32 %v517_v25, %v1150_v40  ;;  %v536_v1 = vmul.f32 %v517_v25, %v1160_v48  ;;  %v537_v10 = vmul.f32 %v517_v25, %v1169_v56 }
 0x160   :  { %v538_v21 = vmul.f32 %v517_v25, %v1173_v24  ;;  %v539_v45 = vmul.f32 %v517_v25, %v1187_v39  ;;  %v548_v6 = vrot.slane %v512_v3, %v516_v46  ;;  %v540_v62 = vmul.f32 %v517_v25, %v1196_v18 }
 0x161   :  { %v541_v8 = vmul.f32 %v517_v25, %v1205_v33  ;;  %v542_v4 = vmul.f32 %v517_v25, %v1214_v38  ;;  %v543_v17 = vmul.f32 %v517_v25, %v1218_v16 }
 0x162   :  { %v550_v30 = vadd.f32 %v548_v6, %v519_v20  ;;  %v551_v31 = vadd.f32 %v548_v6, %v520_v54  ;;  %v552_v40 = vadd.f32 %v548_v6, %v521_v55  ;;  %v553_v7 = vadd.f32 %v548_v6, %v522_v58 }
 0x163   :  { %v554_v48 = vadd.f32 %v548_v6, %v523_v59  ;;  %v555_v9 = vadd.f32 %v548_v6, %v524_v60  ;;  %v556_v56 = vadd.f32 %v548_v6, %v525_v61  ;;  %v557_v11 = vadd.f32 %v548_v6, %v526_v63 }
 0x164   :  { %v558_v24 = vadd.f32 %v548_v6, %v527_v0  ;;  %v559_v13 = vadd.f32 %v548_v6, %v528_v2  ;;  %v560_v39 = vadd.f32 %v548_v6, %v529_v29  ;;  %v561_v14 = vadd.f32 %v548_v6, %v530_v28 }
 0x165   :  { %v562_v15 = vadd.f32 %v548_v6, %v531_v32  ;;  %v563_v18 = vadd.f32 %v548_v6, %v532_v36  ;;  %v564_v19 = vadd.f32 %v548_v6, %v533_v42  ;;  %v565_v33 = vadd.f32 %v548_v6, %v534_v49 }
 0x166   :  { %v566_v22 = vadd.f32 %v548_v6, %v535_v57  ;;  %v567_v38 = vadd.f32 %v548_v6, %v536_v1  ;;  %v568_v23 = vadd.f32 %v548_v6, %v537_v10  ;;  %v569_v16 = vadd.f32 %v548_v6, %v538_v21 }
 0x167   :  { %v570_v53 = vadd.f32 %v548_v6, %v539_v45  ;;  %v571_v26 = vadd.f32 %v548_v6, %v540_v62  ;;  %v572_v12 = vadd.f32 %v548_v6, %v541_v8  ;;  %v573_v34 = vadd.f32 %v548_v6, %v542_v4 }
 0x168   :  { %v574_v35 = vadd.f32 %v548_v6, %v543_v17  ;;  %v575_v5 = vmax.f32 %v550_v30, 0.0  ;;  %v576_v37 = vmax.f32 %v551_v31, 0.0  ;;  %v577_v27 = vmax.f32 %v552_v40, 0.0 }
 0x169   :  { %v578_v41 = vmax.f32 %v553_v7, 0.0  ;;  %v579_v43 = vmax.f32 %v554_v48, 0.0  ;;  %v580_v44 = vmax.f32 %v555_v9, 0.0  ;;  %v581_v46 = vmax.f32 %v556_v56, 0.0 }
 0x16a   :  { %v582_v47 = vmax.f32 %v557_v11, 0.0  ;;  %v583_v51 = vmax.f32 %v558_v24, 0.0  ;;  %v584_v52 = vmax.f32 %v559_v13, 0.0  ;;  %v585_v50 = vmax.f32 %v560_v39, 0.0  ;;  %600 = vst.msk [vmem:[%s1375_s5] sm:$0xff] %vm366_vm2, %v575_v5  ;;  %601 = vst.msk [vmem:[%s1375_s5 + $0x8] sm:$0xff] %vm366_vm2, %v576_v37 }
 0x16b   :  { %602 = vst.msk [vmem:[%s1375_s5 + $0x10] sm:$0xff] %vm366_vm2, %v577_v27  ;;  %v586_v25 = vmax.f32 %v561_v14, 0.0  ;;  %v587_v3 = vmax.f32 %v562_v15, 0.0  ;;  %v588_v20 = vmax.f32 %v563_v18, 0.0  ;;  %v589_v54 = vmax.f32 %v564_v19, 0.0  ;;  %603 = vst.msk [vmem:[%s1375_s5 + $0x18] sm:$0xff] %vm366_vm2, %v578_v41 }
 0x16c   :  { %604 = vst.msk [vmem:[%s1375_s5 + $0x20] sm:$0xff] %vm366_vm2, %v579_v43  ;;  %605 = vst.msk [vmem:[%s1375_s5 + $0x28] sm:$0xff] %vm366_vm2, %v580_v44  ;;  %v590_v55 = vmax.f32 %v565_v33, 0.0  ;;  %v591_v58 = vmax.f32 %v566_v22, 0.0  ;;  %v592_v59 = vmax.f32 %v567_v38, 0.0  ;;  %v593_v60 = vmax.f32 %v568_v23, 0.0 }
 0x16d   :  { %606 = vst.msk [vmem:[%s1375_s5 + $0x30] sm:$0xff] %vm366_vm2, %v581_v46  ;;  %607 = vst.msk [vmem:[%s1375_s5 + $0x38] sm:$0xff] %vm366_vm2, %v582_v47  ;;  %v594_v61 = vmax.f32 %v569_v16, 0.0  ;;  %v595_v63 = vmax.f32 %v570_v53, 0.0  ;;  %v596_v0 = vmax.f32 %v571_v26, 0.0  ;;  %v597_v2 = vmax.f32 %v572_v12, 0.0 }
 0x16e   :  { %608 = vst.msk [vmem:[%s1375_s5 + $0x40] sm:$0xff] %vm366_vm2, %v583_v51  ;;  %609 = vst.msk [vmem:[%s1375_s5 + $0x48] sm:$0xff] %vm366_vm2, %v584_v52  ;;  %v598_v29 = vmax.f32 %v573_v34, 0.0  ;;  %v599_v28 = vmax.f32 %v574_v35, 0.0 }
 0x16f   :  { %610 = vst.msk [vmem:[%s1375_s5 + $0x50] sm:$0xff] %vm366_vm2, %v585_v50  ;;  %611 = vst.msk [vmem:[%s1375_s5 + $0x58] sm:$0xff] %vm366_vm2, %v586_v25 }
 0x170   :  { %612 = vst.msk [vmem:[%s1375_s5 + $0x60] sm:$0xff] %vm366_vm2, %v587_v3  ;;  %613 = vst.msk [vmem:[%s1375_s5 + $0x68] sm:$0xff] %vm366_vm2, %v588_v20 }
 0x171   :  { %614 = vst.msk [vmem:[%s1375_s5 + $0x70] sm:$0xff] %vm366_vm2, %v589_v54  ;;  %615 = vst.msk [vmem:[%s1375_s5 + $0x78] sm:$0xff] %vm366_vm2, %v590_v55 }
 0x172   :  { %616 = vst.msk [vmem:[%s1375_s5 + $0x80] sm:$0xff] %vm366_vm2, %v591_v58  ;;  %617 = vst.msk [vmem:[%s1375_s5 + $0x88] sm:$0xff] %vm366_vm2, %v592_v59 }
 0x173   :  { %618 = vst.msk [vmem:[%s1375_s5 + $0x90] sm:$0xff] %vm366_vm2, %v593_v60  ;;  %619 = vst.msk [vmem:[%s1375_s5 + $0x98] sm:$0xff] %vm366_vm2, %v594_v61 }
 0x174   :  { %620 = vst.msk [vmem:[%s1375_s5 + $0xa0] sm:$0xff] %vm366_vm2, %v595_v63  ;;  %621 = vst.msk [vmem:[%s1375_s5 + $0xa8] sm:$0xff] %vm366_vm2, %v596_v0 }
 0x175   :  { %622 = vst.msk [vmem:[%s1375_s5 + $0xb0] sm:$0xff] %vm366_vm2, %v597_v2  ;;  %623 = vst.msk [vmem:[%s1375_s5 + $0xb8] sm:$0xff] %vm366_vm2, %v598_v29 }
 0x176   :  { %624 = vst.msk [vmem:[%s1375_s5 + $0xc0] sm:$0xff] %vm366_vm2, %v599_v28 }

// kernel: lenet5_forward.8
= control target key start
LH: loop header
LB: loop body
LE: loop exit
PB: predicated region body
PF: predicated region fallthrough
CT: control target
= control target key end

     0   :  { %vm173_vm0 = vcmask 130048   ;;  %vm185_vm1 = vcmask 123904   ;;  %s606_s1 = inlined_call_operand.vmem [shape: f32[256,16], index: 1, kind: input, shape index: {}]   ;;  %s607_s0 = inlined_call_operand.vmem [shape: f32[50,256], index: 0, kind: input, shape index: {}]   ;;  %s608_s2 = inlined_call_operand.vmem [shape: f32[1,16], index: 2, kind: input, shape index: {}]   ;;  %s609_s3 = inlined_call_operand.vmem [shape: f32[1,16], index: 3, kind: input, shape index: {}]   ;;  %s610_s4 = inlined_call_operand.vmem [shape: f32[1,16], index: 4, kind: input, shape index: {}]   ;;  %s611_s5 = inlined_call_operand.vmem [shape: f32[50,16], index: 5, kind: output, shape index: {}]  }
   0x1   :  { %v65_v0 = vld [vmem:[%s606_s1 + $0xf8] sm:$0xff]  ;;  %v64_v2 = vld [vmem:[%s606_s1 + $0xf0] sm:$0xff]  ;;  %v63_v4 = vld [vmem:[%s606_s1 + $0xe8] sm:$0xff] }
   0x2   :  { %v49_v1 = vld [vmem:[%s606_s1 + $0x78] sm:$0xff]  ;;  %276 = vmatprep.subr.mxu0 %v65_v0  ;;  %v48_v3 = vld [vmem:[%s606_s1 + $0x70] sm:$0xff]  ;;  %329 = vmatprep.subr.mxu1 %v65_v0  ;;  %v47_v5 = vld [vmem:[%s606_s1 + $0x68] sm:$0xff] }
   0x3   :  { %277 = vmatpush3.msra.mxu0 %v49_v1  ;;  %345 = vmatpush3.msra.mxu1 %v49_v1  ;;  %v62_v6 = vld [vmem:[%s606_s1 + $0xe0] sm:$0xff]  ;;  %v61_v8 = vld [vmem:[%s606_s1 + $0xd8] sm:$0xff]  ;;  %v60_v10 = vld [vmem:[%s606_s1 + $0xd0] sm:$0xff] }
   0x4   :  { %278 = vmatprep.subr.mxu0 %v64_v2  ;;  %330 = vmatprep.subr.mxu1 %v64_v2  ;;  %v46_v7 = vld [vmem:[%s606_s1 + $0x60] sm:$0xff]  ;;  %v45_v9 = vld [vmem:[%s606_s1 + $0x58] sm:$0xff]  ;;  %v44_v11 = vld [vmem:[%s606_s1 + $0x50] sm:$0xff] }
   0x5   :  { %279 = vmatpush3.msra.mxu0 %v48_v3  ;;  %346 = vmatpush3.msra.mxu1 %v48_v3  ;;  %v59_v12 = vld [vmem:[%s606_s1 + $0xc8] sm:$0xff]  ;;  %v58_v14 = vld [vmem:[%s606_s1 + $0xc0] sm:$0xff]  ;;  %v57_v16 = vld [vmem:[%s606_s1 + $0xb8] sm:$0xff] }
   0x6   :  { %280 = vmatprep.subr.mxu0 %v63_v4  ;;  %331 = vmatprep.subr.mxu1 %v63_v4  ;;  %v43_v13 = vld [vmem:[%s606_s1 + $0x48] sm:$0xff]  ;;  %v42_v15 = vld [vmem:[%s606_s1 + $0x40] sm:$0xff]  ;;  %v41_v17 = vld [vmem:[%s606_s1 + $0x38] sm:$0xff] }
   0x7   :  { %281 = vmatpush3.msra.mxu0 %v47_v5  ;;  %347 = vmatpush3.msra.mxu1 %v47_v5  ;;  %v56_v18 = vld [vmem:[%s606_s1 + $0xb0] sm:$0xff]  ;;  %v55_v20 = vld [vmem:[%s606_s1 + $0xa8] sm:$0xff]  ;;  %v54_v22 = vld [vmem:[%s606_s1 + $0xa0] sm:$0xff] }
   0x8   :  { %282 = vmatprep.subr.mxu0 %v62_v6  ;;  %332 = vmatprep.subr.mxu1 %v62_v6  ;;  %v40_v19 = vld [vmem:[%s606_s1 + $0x30] sm:$0xff]  ;;  %v39_v21 = vld [vmem:[%s606_s1 + $0x28] sm:$0xff]  ;;  %v38_v23 = vld [vmem:[%s606_s1 + $0x20] sm:$0xff] }
   0x9   :  { %283 = vmatpush3.msra.mxu0 %v46_v7  ;;  %348 = vmatpush3.msra.mxu1 %v46_v7  ;;  %v53_v24 = vld [vmem:[%s606_s1 + $0x98] sm:$0xff]  ;;  %v21_v25 = vld [vmem:[%s607_s0 + $0x8] sm:$0xff]  ;;  %v52_v27 = vld [vmem:[%s606_s1 + $0x90] sm:$0xff] }
   0xa   :  { %284 = vmatprep.subr.mxu0 %v61_v8  ;;  %333 = vmatprep.subr.mxu1 %v61_v8  ;;  %v37_v26 = vld [vmem:[%s606_s1 + $0x18] sm:$0xff]  ;;  %v36_v28 = vld [vmem:[%s606_s1 + $0x10] sm:$0xff]  ;;  %v51_v29 = vld [vmem:[%s606_s1 + $0x88] sm:$0xff] }
   0xb   :  { %285 = vmatpush3.msra.mxu0 %v45_v9  ;;  %349 = vmatpush3.msra.mxu1 %v45_v9  ;;  %v35_v30 = vld [vmem:[%s606_s1 + $0x8] sm:$0xff]  ;;  %v50_v31 = vld [vmem:[%s606_s1 + $0x80] sm:$0xff]  ;;  %v23_v34 = vld [vmem:[%s607_s0 + $0x18] sm:$0xff] }
   0xc   :  { %286 = vmatprep.subr.mxu0 %v60_v10  ;;  %334 = vmatprep.subr.mxu1 %v60_v10  ;;  %v34_v32 = vld [vmem:[%s606_s1] sm:$0xff]  ;;  %v29_v35 = vld [vmem:[%s607_s0 + $0x48] sm:$0xff]  ;;  %v31_v37 = vld [vmem:[%s607_s0 + $0x58] sm:$0xff] }
   0xd   :  { %287 = vmatpush3.msra.mxu0 %v44_v11  ;;  %350 = vmatpush3.msra.mxu1 %v44_v11  ;;  %v20_v33 = vld [vmem:[%s607_s0] sm:$0xff]  ;;  %v22_v38 = vld [vmem:[%s607_s0 + $0x10] sm:$0xff]  ;;  %v25_v39 = vld [vmem:[%s607_s0 + $0x28] sm:$0xff] }
   0xe   :  { %288 = vmatprep.subr.mxu0 %v59_v12  ;;  %335 = vmatprep.subr.mxu1 %v59_v12  ;;  %v28_v36 = vld [vmem:[%s607_s0 + $0x40] sm:$0xff]  ;;  %v30_v40 = vld [vmem:[%s607_s0 + $0x50] sm:$0xff]  ;;  %v33_v41 = vld [vmem:[%s607_s0 + $0x68] sm:$0x3] }
   0xf   :  { %289 = vmatpush3.msra.mxu0 %v43_v13  ;;  %351 = vmatpush3.msra.mxu1 %v43_v13  ;;  %v24_v42 = vld [vmem:[%s607_s0 + $0x20] sm:$0xff]  ;;  %v27_v43 = vld [vmem:[%s607_s0 + $0x38] sm:$0xff]  ;;  %v26_v45 = vld [vmem:[%s607_s0 + $0x30] sm:$0xff] }
  0x10   :  { %290 = vmatprep.subr.mxu0 %v58_v14  ;;  %336 = vmatprep.subr.mxu1 %v58_v14  ;;  %v32_v44 = vld [vmem:[%s607_s0 + $0x60] sm:$0x3] }
  0x11   :  { %291 = vmatpush3.msra.mxu0 %v42_v15  ;;  %352 = vmatpush3.msra.mxu1 %v42_v15  ;;  %v275_v52 = vld [vmem:[%s608_s2] ss:$0 sm:$0xff] }
  0x12   :  { %292 = vmatprep.subr.mxu0 %v57_v16  ;;  %337 = vmatprep.subr.mxu1 %v57_v16 }
  0x13   :  { %293 = vmatpush3.msra.mxu0 %v41_v17  ;;  %353 = vmatpush3.msra.mxu1 %v41_v17 }
  0x14   :  { %294 = vmatprep.subr.mxu0 %v56_v18  ;;  %338 = vmatprep.subr.mxu1 %v56_v18 }
  0x15   :  { %295 = vmatpush3.msra.mxu0 %v40_v19  ;;  %354 = vmatpush3.msra.mxu1 %v40_v19 }
  0x16   :  { %296 = vmatprep.subr.mxu0 %v55_v20  ;;  %339 = vmatprep.subr.mxu1 %v55_v20 }
  0x17   :  { %297 = vmatpush3.msra.mxu0 %v39_v21  ;;  %355 = vmatpush3.msra.mxu1 %v39_v21 }
  0x18   :  { %298 = vmatprep.subr.mxu0 %v54_v22  ;;  %340 = vmatprep.subr.mxu1 %v54_v22 }
  0x19   :  { %299 = vmatpush3.msra.mxu0 %v38_v23  ;;  %356 = vmatpush3.msra.mxu1 %v38_v23 }
  0x1a   :  { %300 = vmatprep.subr.mxu0 %v53_v24  ;;  %137 = vmatprep.mubr.f32.mxu0 %v21_v25 }
  0x1b   :  { %301 = vmatpush3.msra.mxu0 %v37_v26  ;;  %341 = vmatprep.subr.mxu1 %v53_v24 }
  0x1c   :  { %302 = vmatprep.subr.mxu0 %v52_v27  ;;  %357 = vmatpush3.msra.mxu1 %v37_v26 }
  0x1d   :  { %303 = vmatpush3.msra.mxu0 %v36_v28  ;;  %342 = vmatprep.subr.mxu1 %v52_v27 }
  0x1e   :  { %304 = vmatprep.subr.mxu0 %v51_v29  ;;  %358 = vmatpush3.msra.mxu1 %v36_v28 }
  0x1f   :  { %305 = vmatpush3.msra.mxu0 %v35_v30  ;;  %343 = vmatprep.subr.mxu1 %v51_v29 }
  0x20   :  { %306 = vmatprep.subr.mxu0 %v50_v31  ;;  %359 = vmatpush3.msra.mxu1 %v35_v30 }
  0x21   :  { %307 = vmatpush3.msra.mxu0 %v34_v32  ;;  %344 = vmatprep.subr.mxu1 %v50_v31 }
  0x22   :  { %138 = vmatmul.mubr.f32.vlgmr.msra.gmra.mxu0 %v20_v33  ;;  %360 = vmatpush3.msra.mxu1 %v34_v32 }
  0x23   :  { %142 = vmatprep.mubr.f32.mxu0 %v23_v34  ;;  %157 = vmatprep.mubr.f32.mxu1 %v29_v35 }
  0x24   :  { %158 = vmatmul.mubr.f32.vlgmr.msra.gmra.mxu1 %v28_v36 }
  0x25   :  { %162 = vmatprep.mubr.f32.mxu1 %v31_v37 }
  0x26   :  { %143 = vmatmul.mubr.f32.gmra.mxu0 %v22_v38 }
  0x27   :  { %147 = vmatprep.mubr.f32.mxu0 %v25_v39 }
  0x28   :  { %163 = vmatmul.mubr.f32.gmra.mxu1 %v30_v40 }
  0x29   :  { %167 = vmatprep.mubr.f32.mxu1 %v33_v41 }
  0x2a   :  { %148 = vmatmul.mubr.f32.gmra.mxu0 %v24_v42 }
  0x2b   :  { %152 = vmatprep.mubr.f32.mxu0 %v27_v43 }
  0x2c   :  { %168 = vmatmul.mubr.f32.gmra.mxu1 %v32_v44 }
  0x2e   :  { %153 = vmatmul.mubr.f32.gmra.mxu0 %v26_v45 }
  0xe2   :  { %v308_v46 = vpop.f32.mrf.mxu0 }
  0xe4   :  { %v309_v47 = vpop.f32.mrf.mxu0  ;;  %v320_v48 = vpop.f32.mrf.mxu1 }
  0xe5   :  { %v310_v51 = vadd.f32 %v309_v47, %v308_v46 }
  0xe6   :  { %v311_v49 = vpop.f32.mrf.mxu0  ;;  %v321_v50 = vpop.f32.mrf.mxu1 }
  0xe7   :  { %v534_v58 = vadd.f32 %v310_v51, %v275_v52  ;;  %v322_v61 = vadd.f32 %v321_v50, %v320_v48 }
  0xe8   :  { %v312_v53 = vpop.f32.mrf.mxu0  ;;  %v323_v54 = vpop.f32.mrf.mxu1 }
  0xe9   :  { %v313_v55 = vadd.f32 %v312_v53, %v311_v49  ;;  %v195_v3 = vmul.f32 %v534_v58, %v534_v58  ;;  %v174_v7 = vsel %vm173_vm0, %v534_v58, 0.0  ;;  %v549_v9 = vadd.f32 %v322_v61, %v275_v52 }
  0xea   :  { %v314_v56 = vpop.f32.mrf.mxu0  ;;  %v324_v57 = vpop.f32.mrf.mxu1 }
  0xeb   :  { %v536_v59 = vadd.f32 %v313_v55, %v275_v52  ;;  %v325_v6 = vadd.f32 %v324_v57, %v323_v54  ;;  %v202_v16 = vsel %vm173_vm0, %v195_v3, 0.0  ;;  %v199_v22 = vmul.f32 %v549_v9, %v549_v9 }
  0xec   :  { %v315_v60 = vpop.f32.mrf.mxu0  ;;  %v326_v62 = vpop.f32.mrf.mxu1  ;;  %v181_v28 = vsel %vm173_vm0, %v549_v9, 0.0 }
  0xed   :  { %v196_v63 = vmul.f32 %v536_v59, %v536_v59  ;;  %v316_v0 = vadd.f32 %v315_v60, %v314_v56  ;;  %v175_v4 = vsel %vm173_vm0, %v536_v59, 0.0  ;;  %v165_v19 = vadd.f32 %v325_v6, %v275_v52  ;;  %v228_v6 = vld [vmem:[%s610_s4] sm:$0x1] }
  0xee   :  { %v317_v1 = vpop.f32.mrf.mxu0  ;;  %v327_v2 = vpop.f32.mrf.mxu1  ;;  %v176_v15 = vadd.f32 %v175_v4, %v174_v7  ;;  %v209_v33 = vsel %vm173_vm0, %v199_v22, 0.0 }
  0xef   :  { %v544_v5 = vadd.f32 %v316_v0, %v275_v52  ;;  %v203_v8 = vsel %vm173_vm0, %v196_v63, 0.0  ;;  %v328_v14 = vadd.f32 %v327_v2, %v326_v62  ;;  %v200_v30 = vmul.f32 %v165_v19, %v165_v19 }
  0xf0   :  { %v318_v10 = vpop.f32.mrf.mxu0  ;;  %v204_v20 = vadd.f32 %v203_v8, %v202_v16  ;;  %v183_v34 = vsel %vm173_vm0, %v165_v19, 0.0  ;;  %v232_v63 = vlaneseq }
  0xf1   :  { %v177_v11 = vsel %vm173_vm0, %v544_v5, 0.0  ;;  %v197_v12 = vmul.f32 %v544_v5, %v544_v5  ;;  %v319_v13 = vadd.f32 %v318_v10, %v317_v1  ;;  %v170_v25 = vadd.f32 %v328_v14, %v275_v52  ;;  %v224_v1 = vld [vmem:[%s609_s3] sm:$0x1] }
  0xf2   :  { %v178_v21 = vadd.f32 %v177_v11, %v176_v15  ;;  %v211_v38 = vsel %vm173_vm0, %v200_v30, 0.0  ;;  %v233_v0 = vshrl.u32 %v232_v63, 7 }
  0xf3   :  { %v205_v17 = vsel %vm173_vm0, %v197_v12, 0.0  ;;  %v155_v18 = vadd.f32 %v319_v13, %v275_v52  ;;  %v201_v35 = vmul.f32 %v170_v25, %v170_v25  ;;  %v186_v39 = vsel %vm185_vm1, %v170_v25, 0.0 }
  0xf4   :  { %v206_v26 = vadd.f32 %v205_v17, %v204_v20  ;;  %v234_v2 = vsub.s32 0, %v233_v0 }
  0xf5   :  { %v179_v23 = vsel %vm173_vm0, %v155_v18, 0.0  ;;  %v198_v24 = vmul.f32 %v155_v18, %v155_v18  ;;  %v213_v42 = vsel %vm185_vm1, %v201_v35, 0.0 }
  0xf6   :  { %v180_v27 = vadd.f32 %v179_v23, %v178_v21 }
  0xf7   :  { %v207_v29 = vsel %vm173_vm0, %v198_v24, 0.0 }
  0xf8   :  { %v208_v31 = vadd.f32 %v207_v29, %v206_v26  ;;  %v182_v32 = vadd.f32 %v181_v28, %v180_v27 }
  0xfa   :  { %v184_v36 = vadd.f32 %v183_v34, %v182_v32  ;;  %v210_v37 = vadd.f32 %v209_v33, %v208_v31 }
  0xfc   :  { %v212_v40 = vadd.f32 %v211_v38, %v210_v37  ;;  %v187_v41 = vadd.f32 %v186_v39, %v184_v36 }
  0xfe   :  { %v188_v43 = vrot.slane %v187_v41, 4  ;;  %v214_v44 = vadd.f32 %v213_v42, %v212_v40 }
 0x100   :  { %v189_v45 = vadd.f32 %v188_v43, %v187_v41  ;;  %v215_v46 = vrot.slane %v214_v44, 4 }
 0x102   :  { %v190_v47 = vrot.slane %v189_v45, 2  ;;  %v216_v48 = vadd.f32 %v215_v46, %v214_v44 }
 0x104   :  { %v191_v49 = vadd.f32 %v190_v47, %v189_v45  ;;  %v217_v50 = vrot.slane %v216_v48, 2 }
 0x106   :  { %v192_v51 = vrot.slane %v191_v49, 1  ;;  %v218_v52 = vadd.f32 %v217_v50, %v216_v48 }
 0x108   :  { %v193_v53 = vadd.f32 %v192_v51, %v191_v49  ;;  %v219_v54 = vrot.slane %v218_v52, 1 }
 0x10a   :  { %v194_v55 = vmul.f32 0.02, %v193_v53  ;;  %v220_v56 = vadd.f32 %v219_v54, %v218_v52 }
 0x10c   :  { %v221_v57 = vmul.f32 0.02, %v220_v56  ;;  %v222_v60 = vmul.f32 %v194_v55, %v194_v55 }
 0x10e   :  { %v223_v61 = vsub.f32 %v221_v57, %v222_v60 }
 0x110   :  { %v225_v62 = vadd.f32 1e-05, %v223_v61 }
 0x112   :  { %361 = vrsqrt.f32 %v225_v62 }
 0x11f   :  { %v362_v3 = vpop.eup %361 }
 0x120   :  { %v227_v4 = vmul.f32 %v362_v3, %v224_v1 }
 0x122   :  { %v229_v7 = vmul.f32 %v227_v4, %v194_v55  ;;  %v235_v8 = vrot.slane %v227_v4, %v234_v2 }
 0x124   :  { %v230_v10 = vsub.f32 %v228_v6, %v229_v7  ;;  %v237_v11 = vmul.f32 %v235_v8, %v534_v58  ;;  %v238_v12 = vmul.f32 %v235_v8, %v536_v59  ;;  %v239_v13 = vmul.f32 %v235_v8, %v544_v5 }
 0x125   :  { %v240_v14 = vmul.f32 %v235_v8, %v155_v18  ;;  %v241_v16 = vmul.f32 %v235_v8, %v549_v9  ;;  %v242_v17 = vmul.f32 %v235_v8, %v165_v19  ;;  %v243_v20 = vmul.f32 %v235_v8, %v170_v25 }
 0x126   :  { %v248_v15 = vrot.slane %v230_v10, %v234_v2 }
 0x128   :  { %v250_v21 = vadd.f32 %v248_v15, %v237_v11  ;;  %v251_v22 = vadd.f32 %v248_v15, %v238_v12  ;;  %v252_v23 = vadd.f32 %v248_v15, %v239_v13  ;;  %v253_v24 = vadd.f32 %v248_v15, %v240_v14 }
 0x129   :  { %v254_v26 = vadd.f32 %v248_v15, %v241_v16  ;;  %v255_v27 = vadd.f32 %v248_v15, %v242_v17  ;;  %v256_v28 = vadd.f32 %v248_v15, %v243_v20 }
 0x12a   :  { %v257_v29 = vmax.f32 %v250_v21, 0.0  ;;  %v258_v30 = vmax.f32 %v251_v22, 0.0  ;;  %v259_v58 = vmax.f32 %v252_v23, 0.0  ;;  %v260_v31 = vmax.f32 %v253_v24, 0.0 }
 0x12b   :  { %v261_v59 = vmax.f32 %v254_v26, 0.0  ;;  %v262_v32 = vmax.f32 %v255_v27, 0.0  ;;  %v263_v5 = vmax.f32 %v256_v28, 0.0 }
 0x12c   :  { %264 = vst.msk [vmem:[%s611_s5] sm:$0xff] %vm173_vm0, %v257_v29  ;;  %265 = vst.msk [vmem:[%s611_s5 + $0x8] sm:$0xff] %vm173_vm0, %v258_v30 }
 0x12d   :  { %266 = vst.msk [vmem:[%s611_s5 + $0x10] sm:$0xff] %vm173_vm0, %v259_v58  ;;  %267 = vst.msk [vmem:[%s611_s5 + $0x18] sm:$0xff] %vm173_vm0, %v260_v31 }
 0x12e   :  { %268 = vst.msk [vmem:[%s611_s5 + $0x20] sm:$0xff] %vm173_vm0, %v261_v59  ;;  %269 = vst.msk [vmem:[%s611_s5 + $0x28] sm:$0xff] %vm173_vm0, %v262_v32 }
 0x12f   :  { %270 = vst.msk [vmem:[%s611_s5 + $0x30] sm:$0x3] %vm185_vm1, %v263_v5 }

// kernel: lenet5_forward.9
= control target key start
LH: loop header
LB: loop body
LE: loop exit
PB: predicated region body
PF: predicated region fallthrough
CT: control target
= control target key end

     0   :  { %14 = vsyncpa [#allocation3], 0  ;;  %v664_v3 = vmov 0.0   ;;  %v665_v23 = vmov 1983009808   ;;  %v93_v25 = vlaneseq  ;;  %s1006_s0 = inlined_call_operand.vmem [shape: f32[2,400], index: 0, kind: input, shape index: {}]   ;;  %s1007_s1 = inlined_call_operand.vmem [shape: f32[400,120], index: 1, kind: input, shape index: {}]   ;;  %s1008_s2 = inlined_call_operand.vmem [shape: f32[1,120], index: 2, kind: input, shape index: {}]   ;;  %s1009_s3 = inlined_call_operand.vmem [shape: f32[120,84], index: 3, kind: input, shape index: {}]   ;;  %s1010_s4 = inlined_call_operand.vmem [shape: f32[1,84], index: 4, kind: input, shape index: {}]   ;;  %s1011_s5 = inlined_call_operand.vmem [shape: f32[84,10], index: 5, kind: input, shape index: {}]   ;;  %s1012_s6 = inlined_call_operand.vmem [shape: f32[1,10], index: 6, kind: input, shape index: {}]   ;;  %s1013_s7 = inlined_call_operand.hbm [shape: f32[2,120], index: 7, kind: output, shape index: {0}]   ;;  %s1014_s8 = inlined_call_operand.hbm [shape: f32[2,10], index: 8, kind: output, shape index: {1}]  }
   0x1   :  { %v62_v0 = vld [vmem:[%s1007_s1 + $0xf8] sm:$0xff]  ;;  %182 = vmatprep.subr.mxu1 %v664_v3  ;;  %v61_v4 = vld [vmem:[%s1007_s1 + $0xf0] sm:$0xff]  ;;  %v60_v7 = vld [vmem:[%s1007_s1 + $0xe8] sm:$0xff]  ;;  %v91_v24 = vunpack.c.l.s4 %v665_v23 }
   0x2   :  { %v46_v1 = vld [vmem:[%s1007_s1 + $0x78] sm:$0xff]  ;;  %489 = vmatprep.subr.mxu0 %v62_v0  ;;  %v45_v5 = vld [vmem:[%s1007_s1 + $0x70] sm:$0xff]  ;;  %v44_v8 = vld [vmem:[%s1007_s1 + $0x68] sm:$0xff]  ;;  %v94_v33 = vshrl.u32 %v93_v25, 7 }
   0x3   :  { %v78_v2 = vld [vmem:[%s1007_s1 + $0x178] sm:$0xff]  ;;  %v77_v6 = vld [vmem:[%s1007_s1 + $0x170] sm:$0xff]  ;;  %490 = vmatpush3.msra.mxu0 %v46_v1  ;;  %v76_v9 = vld [vmem:[%s1007_s1 + $0x168] sm:$0xff]  ;;  %v92_v32 = vunpack.c.0.s8 %v91_v24 }
   0x4   :  { %183 = vmatpush1.msra.mxu1 %v78_v2  ;;  %491 = vmatprep.subr.mxu0 %v61_v4  ;;  %v59_v10 = vld [vmem:[%s1007_s1 + $0xe0] sm:$0xff]  ;;  %v58_v13 = vld [vmem:[%s1007_s1 + $0xd8] sm:$0xff]  ;;  %v57_v16 = vld [vmem:[%s1007_s1 + $0xd0] sm:$0xff] }
   0x5   :  { %184 = vmatprep.subr.mxu1 %v664_v3  ;;  %492 = vmatpush3.msra.mxu0 %v45_v5  ;;  %v43_v11 = vld [vmem:[%s1007_s1 + $0x60] sm:$0xff]  ;;  %v42_v14 = vld [vmem:[%s1007_s1 + $0x58] sm:$0xff]  ;;  %v41_v17 = vld [vmem:[%s1007_s1 + $0x50] sm:$0xff]  ;;  %v95_v40 = vsub.s32 %v92_v32, %v94_v33 }
   0x6   :  { %185 = vmatpush1.msra.mxu1 %v77_v6  ;;  %493 = vmatprep.subr.mxu0 %v60_v7  ;;  %v75_v12 = vld [vmem:[%s1007_s1 + $0x160] sm:$0xff]  ;;  %v74_v15 = vld [vmem:[%s1007_s1 + $0x158] sm:$0xff]  ;;  %v73_v18 = vld [vmem:[%s1007_s1 + $0x150] sm:$0xff] }
   0x7   :  { %186 = vmatprep.subr.mxu1 %v664_v3  ;;  %494 = vmatpush3.msra.mxu0 %v44_v8  ;;  %v56_v19 = vld [vmem:[%s1007_s1 + $0xc8] sm:$0xff]  ;;  %v55_v22 = vld [vmem:[%s1007_s1 + $0xc0] sm:$0xff]  ;;  %v54_v28 = vld [vmem:[%s1007_s1 + $0xb8] sm:$0xff] }
   0x8   :  { %187 = vmatpush1.msra.mxu1 %v76_v9  ;;  %495 = vmatprep.subr.mxu0 %v59_v10  ;;  %v40_v20 = vld [vmem:[%s1007_s1 + $0x48] sm:$0xff]  ;;  %v39_v26 = vld [vmem:[%s1007_s1 + $0x40] sm:$0xff]  ;;  %v38_v29 = vld [vmem:[%s1007_s1 + $0x38] sm:$0xff] }
   0x9   :  { %188 = vmatprep.subr.mxu1 %v664_v3  ;;  %496 = vmatpush3.msra.mxu0 %v43_v11  ;;  %v72_v21 = vld [vmem:[%s1007_s1 + $0x148] sm:$0xff]  ;;  %v71_v27 = vld [vmem:[%s1007_s1 + $0x140] sm:$0xff]  ;;  %v70_v30 = vld [vmem:[%s1007_s1 + $0x138] sm:$0xff] }
   0xa   :  { %189 = vmatpush1.msra.mxu1 %v75_v12  ;;  %497 = vmatprep.subr.mxu0 %v58_v13  ;;  %v53_v31 = vld [vmem:[%s1007_s1 + $0xb0] sm:$0xff]  ;;  %v52_v36 = vld [vmem:[%s1007_s1 + $0xa8] sm:$0xff]  ;;  %v51_v39 = vld [vmem:[%s1007_s1 + $0xa0] sm:$0xff] }
   0xb   :  { %190 = vmatprep.subr.mxu1 %v664_v3  ;;  %498 = vmatpush3.msra.mxu0 %v42_v14  ;;  %v37_v34 = vld [vmem:[%s1007_s1 + $0x30] sm:$0xff]  ;;  %v36_v37 = vld [vmem:[%s1007_s1 + $0x28] sm:$0xff] }
   0xc   :  { %191 = vmatpush1.msra.mxu1 %v74_v15  ;;  %499 = vmatprep.subr.mxu0 %v57_v16  ;;  %v69_v35 = vld [vmem:[%s1007_s1 + $0x130] sm:$0xff]  ;;  %v68_v38 = vld [vmem:[%s1007_s1 + $0x128] sm:$0xff] }
   0xd   :  { %192 = vmatprep.subr.mxu1 %v664_v3  ;;  %500 = vmatpush3.msra.mxu0 %v41_v17 }
   0xe   :  { %193 = vmatpush1.msra.mxu1 %v73_v18  ;;  %501 = vmatprep.subr.mxu0 %v56_v19 }
   0xf   :  { %194 = vmatprep.subr.mxu1 %v664_v3  ;;  %502 = vmatpush3.msra.mxu0 %v40_v20 }
  0x10   :  { %195 = vmatpush1.msra.mxu1 %v72_v21  ;;  %503 = vmatprep.subr.mxu0 %v55_v22 }
  0x11   :  { %196 = vmatprep.subr.mxu1 %v664_v3  ;;  %504 = vmatpush3.msra.mxu0 %v39_v26 }
  0x12   :  { %197 = vmatpush1.msra.mxu1 %v71_v27  ;;  %505 = vmatprep.subr.mxu0 %v54_v28 }
  0x13   :  { %198 = vmatprep.subr.mxu1 %v664_v3  ;;  %506 = vmatpush3.msra.mxu0 %v38_v29 }
  0x14   :  { %199 = vmatpush1.msra.mxu1 %v70_v30  ;;  %507 = vmatprep.subr.mxu0 %v53_v31 }
  0x15   :  { %200 = vmatprep.subr.mxu1 %v664_v3  ;;  %508 = vmatpush3.msra.mxu0 %v37_v34 }
  0x16   :  { %201 = vmatpush1.msra.mxu1 %v69_v35 }
  0x17   :  { %15 = vsyncpa [#allocation5], 0  ;;  %509 = vmatprep.subr.mxu0 %v52_v36  ;;  %202 = vmatprep.subr.mxu1 %v664_v3  ;;  %v35_v41 = vld [vmem:[%s1007_s1 + $0x20] sm:$0xff]  ;;  %v50_v44 = vld [vmem:[%s1007_s1 + $0x98] sm:$0xff]  ;;  %vm109_vm0 = vcmask 130048   ;;  %vm666_vm1 = vmmov 0  }
  0x18   :  { %v67_v42 = vld [vmem:[%s1007_s1 + $0x120] sm:$0xff]  ;;  %510 = vmatpush3.msra.mxu0 %v36_v37  ;;  %203 = vmatpush1.msra.mxu1 %v68_v38  ;;  %v34_v46 = vld [vmem:[%s1007_s1 + $0x18] sm:$0xff]  ;;  %v49_v48 = vld [vmem:[%s1007_s1 + $0x90] sm:$0xff]  ;;  %vm378_vm2 = vcmask 1043456   ;;  %vm282_vm3 = vcmask 982016   ;;  %vm258_vm4 = vcmask 975872  }
  0x19   :  { %v30_v43 = vld [vmem:[%s1006_s0] sm:$0xff]  ;;  %511 = vmatprep.subr.mxu0 %v51_v39  ;;  %204 = vmatprep.subr.mxu1 %v664_v3  ;;  %v66_v47 = vld [vmem:[%s1007_s1 + $0x118] sm:$0xff]  ;;  %v33_v50 = vld [vmem:[%s1007_s1 + $0x10] sm:$0xff]  ;;  %vm374_vm5 = vcmask 687104  }
  0x1a   :  { %v89_v45 = vcombine.high %v30_v43, %v30_v43  ;;  %512 = vmatpush3.msra.mxu0 %v35_v41  ;;  %205 = vmatpush1.msra.mxu1 %v67_v42  ;;  %v96_v49 = vrot.slane %v30_v43, %v95_v40  ;;  %v65_v51 = vld [vmem:[%s1007_s1 + $0x110] sm:$0xff]  ;;  %v48_v52 = vld [vmem:[%s1007_s1 + $0x88] sm:$0xff]  ;;  %v47_v56 = vld [vmem:[%s1007_s1 + $0x80] sm:$0xff] }
  0x1b   :  { %513 = vmatprep.subr.mxu0 %v50_v44  ;;  %206 = vmatprep.subr.mxu1 %v664_v3  ;;  %v32_v54 = vld [vmem:[%s1007_s1 + $0x8] sm:$0xff]  ;;  %v31_v58 = vld [vmem:[%s1007_s1] sm:$0xff]  ;;  %v274_v62 = vld [vmem:[%s1009_s3 + $0x70] sm:$0xff] }
  0x1c   :  { %514 = vmatpush3.msra.mxu0 %v34_v46  ;;  %207 = vmatpush1.msra.mxu1 %v66_v47  ;;  %v103_v53 = vrot.slane %v89_v45, %v95_v40  ;;  %v64_v55 = vld [vmem:[%s1007_s1 + $0x108] sm:$0xff]  ;;  %v104_v57 = vcombine.high %v96_v49, %v96_v49  ;;  %v63_v59 = vld [vmem:[%s1007_s1 + $0x100] sm:$0xff]  ;;  %v271_v2 = vld [vmem:[%s1009_s3 + $0x58] sm:$0xff] }
  0x1d   :  { %515 = vmatprep.subr.mxu0 %v49_v48  ;;  %208 = vmatprep.subr.mxu1 %v664_v3  ;;  %v80_v61 = vld [vmem:[%s1007_s1 + $0x188] sm:$0xff]  ;;  %v79_v63 = vld [vmem:[%s1007_s1 + $0x180] sm:$0xff]  ;;  %v270_v4 = vld [vmem:[%s1009_s3 + $0x50] sm:$0xff]  ;;  %s667_s1 = smov [#allocation2]  }
  0x1e   :  { %516 = vmatpush3.msra.mxu0 %v33_v50  ;;  %209 = vmatpush1.msra.mxu1 %v65_v51  ;;  %v105_v60 = vcombine.high %v103_v53, %v103_v53  ;;  %v273_v0 = vld [vmem:[%s1009_s3 + $0x68] sm:$0xff]  ;;  %v272_v1 = vld [vmem:[%s1009_s3 + $0x60] sm:$0xff]  ;;  %v267_v7 = vld [vmem:[%s1009_s3 + $0x38] sm:$0xff]  ;;  %s460_s23 = sshll.u32 %s667_s1, 4  ;;  %s461_s23 = int_to_ptr.vmem [resolvable:$true] %s460_s23 }
  0x1f   :  { %517 = vmatprep.subr.mxu0 %v48_v52  ;;  %210 = vmatprep.subr.mxu1 %v664_v3  ;;  %v269_v5 = vld [vmem:[%s1009_s3 + $0x48] sm:$0xff]  ;;  %v268_v6 = vld [vmem:[%s1009_s3 + $0x40] sm:$0xff]  ;;  %v266_v8 = vld [vmem:[%s1009_s3 + $0x30] sm:$0xff]  ;;  %s620_s24 = scalar_lea.vmem %s461_s23, 32  ;;  %p625_p1 = scmp.lt.s32.totalorder %s461_s23, %s461_s23 }
  0x20   :  { %518 = vmatpush3.msra.mxu0 %v32_v54  ;;  %211 = vmatpush1.msra.mxu1 %v64_v55  ;;  %v265_v9 = vld [vmem:[%s1009_s3 + $0x28] sm:$0xff]  ;;  %v264_v10 = vld [vmem:[%s1009_s3 + $0x20] sm:$0xff]  ;;  %v263_v11 = vld [vmem:[%s1009_s3 + $0x18] sm:$0xff]  ;;  %p621_p0 = scmp.ne.s32.totalorder %s461_s23, %s620_s24  ;;  %p626_p2 = scmp.lt.s32.totalorder %s620_s24, %s620_s24 }
  0x21   :  { %519 = vmatprep.subr.mxu0 %v47_v56  ;;  %212 = vmatprep.subr.mxu1 %v664_v3  ;;  %v262_v12 = vld [vmem:[%s1009_s3 + $0x10] sm:$0xff]  ;;  %v261_v13 = vld [vmem:[%s1009_s3 + $0x8] sm:$0xff]  ;;  %v260_v14 = vld [vmem:[%s1009_s3] sm:$0xff] }
  0x22   :  { %520 = vmatpush3.msra.mxu0 %v31_v58  ;;  %176 = vmatprep.mubr.f32.mxu0 %v104_v57  ;;  %v366_v15 = vld [vmem:[%s1011_s5 + $0x50] sm:$0xf]  ;;  %v365_v16 = vld [vmem:[%s1011_s5 + $0x48] sm:$0xff]  ;;  %v364_v17 = vld [vmem:[%s1011_s5 + $0x40] sm:$0xff]  ;;  %p627_p3 = por %p626_p2, %p625_p1 }
  0x23   :  { %213 = vmatpush1.msra.mxu1 %v63_v59  ;;  %177 = vmatmul.mubr.f32.vlgmr.msra.gmra.mxu0 %v96_v49  ;;  %v363_v18 = vld [vmem:[%s1011_s5 + $0x38] sm:$0xff]  ;;  %v362_v19 = vld [vmem:[%s1011_s5 + $0x30] sm:$0xff]  ;;  %v361_v20 = vld [vmem:[%s1011_s5 + $0x28] sm:$0xff] }
  0x24   :  { %242 = vmatprep.subr.mxu1 %v664_v3  ;;  %483 = vmatprep.mubr.msk.f32.mxu1 %vm109_vm0, %v105_v60  ;;  %v360_v21 = vld [vmem:[%s1011_s5 + $0x20] sm:$0xff]  ;;  %v359_v22 = vld [vmem:[%s1011_s5 + $0x18] sm:$0xff]  ;;  %v358_v23 = vld [vmem:[%s1011_s5 + $0x10] sm:$0xff]  ;;  %p628_p4 = pnand %p627_p3, %p621_p0 }
  0x25   :  { %243 = vmatpush2.msra.mxu1 %v80_v61  ;;  %552 = vmatprep.subr.mxu0 %v664_v3  ;;  %v482_v26 = vld [vmem:[%s1008_s2] ss:$0 sm:$0xff]  ;;  %v357_v37 = vld [vmem:[%s1011_s5 + $0x8] sm:$0xff] }
  0x26   :  { %244 = vmatprep.subr.mxu1 %v664_v3  ;;  %553 = vmatpush3.msra.mxu0 %v274_v62  ;;  %v356_v38 = vld [vmem:[%s1011_s5] sm:$0xff] }
  0x27   :  { %245 = vmatpush2.msra.mxu1 %v79_v63  ;;  %554 = vmatprep.subr.mxu0 %v664_v3  ;;  %v484_v39 = vld [vmem:[%s1010_s4] ss:$0 sm:$0xff] }
  0x28   :  { %247 = vmatmul.mubr.f32.vlgmr.msra.gmra.mxu1 %v103_v53  ;;  %555 = vmatpush3.msra.mxu0 %v273_v0 }
  0x29   :  { %556 = vmatprep.subr.mxu0 %v664_v3  ;;  %585 = vmatprep.subr.mxu1 %v664_v3 }
  0x2a   :  { %557 = vmatpush3.msra.mxu0 %v272_v1  ;;  %582 = vmatprep.mubr.msk.f32.mxu0 %vm666_vm1, %v664_v3 }
  0x2b   :  { %558 = vmatprep.subr.mxu0 %v664_v3  ;;  %607 = vmatprep.mubr.msk.f32.mxu1 %vm666_vm1, %v664_v3 }
  0x2c   :  { %559 = vmatpush3.msra.mxu0 %v271_v2  ;;  %586 = vmatpush3.msk.msra.mxu1 %vm378_vm2, %v366_v15 }
  0x2d   :  { %560 = vmatprep.subr.mxu0 %v664_v3  ;;  %587 = vmatprep.subr.mxu1 %v664_v3 }
  0x2e   :  { %561 = vmatpush3.msra.mxu0 %v270_v4  ;;  %588 = vmatpush3.msra.mxu1 %v365_v16 }
  0x2f   :  { %562 = vmatprep.subr.mxu0 %v664_v3  ;;  %589 = vmatprep.subr.mxu1 %v664_v3 }
  0x30   :  { %563 = vmatpush3.msra.mxu0 %v269_v5  ;;  %590 = vmatpush3.msra.mxu1 %v364_v17 }
  0x31   :  { %564 = vmatprep.subr.mxu0 %v664_v3  ;;  %591 = vmatprep.subr.mxu1 %v664_v3 }
  0x32   :  { %565 = vmatpush3.msra.mxu0 %v268_v6  ;;  %592 = vmatpush3.msra.mxu1 %v363_v18 }
  0x33   :  { %566 = vmatprep.subr.mxu0 %v664_v3  ;;  %593 = vmatprep.subr.mxu1 %v664_v3 }
  0x34   :  { %567 = vmatpush3.msra.mxu0 %v267_v7  ;;  %594 = vmatpush3.msra.mxu1 %v362_v19 }
  0x35   :  { %568 = vmatprep.subr.mxu0 %v664_v3  ;;  %595 = vmatprep.subr.mxu1 %v664_v3 }
  0x36   :  { %569 = vmatpush3.msra.mxu0 %v266_v8  ;;  %596 = vmatpush3.msra.mxu1 %v361_v20 }
  0x37   :  { %570 = vmatprep.subr.mxu0 %v664_v3  ;;  %597 = vmatprep.subr.mxu1 %v664_v3 }
  0x38   :  { %571 = vmatpush3.msra.mxu0 %v265_v9  ;;  %598 = vmatpush3.msra.mxu1 %v360_v21 }
  0x39   :  { %572 = vmatprep.subr.mxu0 %v664_v3  ;;  %599 = vmatprep.subr.mxu1 %v664_v3 }
  0x3a   :  { %573 = vmatpush3.msra.mxu0 %v264_v10  ;;  %600 = vmatpush3.msra.mxu1 %v359_v22 }
  0x3b   :  { %574 = vmatprep.subr.mxu0 %v664_v3  ;;  %601 = vmatprep.subr.mxu1 %v664_v3 }
  0x3c   :  { %575 = vmatpush3.msra.mxu0 %v263_v11  ;;  %602 = vmatpush3.msra.mxu1 %v358_v23 }
  0x3d   :  { %576 = vmatprep.subr.mxu0 %v664_v3  ;;  %603 = vmatprep.subr.mxu1 %v664_v3 }
  0x3e   :  { %577 = vmatpush3.msra.mxu0 %v262_v12  ;;  %604 = vmatpush3.msra.mxu1 %v357_v37 }
  0x3f   :  { %578 = vmatprep.subr.mxu0 %v664_v3  ;;  %605 = vmatprep.subr.mxu1 %v664_v3 }
  0x40   :  { %579 = vmatpush3.msra.mxu0 %v261_v13  ;;  %606 = vmatpush3.msra.mxu1 %v356_v38 }
  0x41   :  { %580 = vmatprep.subr.mxu0 %v664_v3 }
  0x42   :  { %581 = vmatpush3.msra.mxu0 %v260_v14 }
  0xe3   :  { %v521_v24 = vpop.f32.mrf.mxu0 }
  0xe5   :  { %v522_v25 = vpop.f32.mrf.mxu0 }
  0xe6   :  { %v523_v27 = vadd.f32 %v522_v25, %v521_v24 }
  0xe8   :  { %v179_v28 = vadd.f32 %v523_v27, %v482_v26  ;;  %v248_v29 = vpop.f32.mrf.mxu1 }
  0xea   :  { %v249_v30 = vadd.f32 %v248_v29, %v179_v28  ;;  %v250_v31 = vpop.f32.mrf.mxu1 }
  0xec   :  { %v252_v32 = vsub.f32 0.0, %v249_v30  ;;  %583 = vmatmul.mubr.msk.f32.vlgmr.msra.gmra.mxu0 %vm282_vm3, %v249_v30 }
  0xee   :  { %v253_v33 = vmul.f32 1.442695, %v252_v32 }
  0xf0   :  { %616 = vpow2.f32 %v253_v33 }
  0xfd   :  { %v617_v34 = vpop.eup %616 }
  0xfe   :  { %v255_v35 = vadd.f32 1.0, %v617_v34 }
 0x100   :  { %618 = vrcp.f32 %v255_v35 }
 0x10d   :  { %v619_v36 = vpop.eup %618 }
 0x10e   :  { %259 = vst.msk [vmem:[#allocation2] sm:$0x3] %vm258_vm4, %v619_v36 }
 0x1ac   :  { %v352_v40 = vpop.f32.mrf.mxu0 }
 0x1ad   :  { %v353_v41 = vadd.f32 %v484_v39, %v352_v40 }
 0x1ae   :  { %v584_v42 = vpop.f32.mrf.mxu0 }
 0x1af   :  { %608 = vmatmul.mubr.msk.f32.vlgmr.msra.gmra.mxu1 %vm374_vm5, %v353_v41 }
 0x1b0   :  { %631 = shalt.err (!%p628_p4)
}
 0x1b1   :  { %463 = dma.vmem_to_hbm [thread:$0]  %s461_s23, 32, %s1013_s7, [#allocation3]   ;;  %v486_v3 = vld [vmem:[%s1012_s6] ss:$0 sm:$0xff]  ;;  %vm452_vm6 = vcmask 74752  }
 0x1b2   :  { %s668_s3 = smov [#allocation4]  }
 0x1b3   :  { %s470_s27 = sshll.u32 %s668_s3, 4  ;;  %s471_s27 = int_to_ptr.vmem [resolvable:$true] %s470_s27 }
 0x1b4   :  { %s640_s28 = scalar_lea.vmem %s471_s27, 32  ;;  %p645_p6 = scmp.lt.s32.totalorder %s471_s27, %s471_s27 }
 0x1b5   :  { %p641_p5 = scmp.ne.s32.totalorder %s471_s27, %s640_s28  ;;  %p646_p7 = scmp.lt.s32.totalorder %s640_s28, %s640_s28 }
 0x1b7   :  { %p647_p8 = por %p646_p7, %p645_p6 }
 0x1b9   :  { %p648_p9 = pnand %p647_p8, %p641_p5 }
 0x26f   :  { %v448_v43 = vpop.f32.mrf.mxu1 }
 0x270   :  { %v449_v44 = vadd.f32 %v486_v3, %v448_v43 }
 0x271   :  { %v609_v45 = vpop.f32.mrf.mxu1 }
 0x272   :  { %453 = vst.msk [vmem:[#allocation4] sm:$0x3] %vm452_vm6, %v449_v44 }
 0x273   :  { %651 = shalt.err (!%p648_p9)
}
 0x274   :  { %473 = dma.vmem_to_hbm [thread:$0]  %s471_s27, 32, %s1014_s8, [#allocation5]  }
 0x275   :  { %660 = dma.done.wait [#allocation3], 32  }
 0x276   :  { %661 = vsyncadd [#allocation3], 4294967264 }
 0x277   :  { %662 = dma.done.wait [#allocation5], 32  }
 0x278   :  { %663 = vsyncadd [#allocation5], 4294967264 }
 0x279   :  { %480 = vsyncpa [#allocation3], 1 }
 0x27a   :  { %481 = vsyncpa [#allocation5], 1 }

</bundles_post_ra>
